<compile_context>
chip_gen: v6e
topology: v6e:2x2x1
jax: 0.10.0
libtpu: 0.0.40
codegen_flags: <defaults>
</compile_context>

<pallas_src>
import functools
import math

import jax
import jax.numpy as jnp
from jax import lax
from jax.experimental import pallas as pl
from jax.experimental.pallas import tpu as pltpu


# -----------------------------------------------------------------------------
# Fused tiled matmul kernel:  out = act((X @ W) * scale + bias)
# -----------------------------------------------------------------------------
def _fused_matmul_kernel(x_ref, w_ref, s_ref, b_ref, o_ref, acc_ref, *, activation):
    k = pl.program_id(2)

    @pl.when(k == 0)
    def _():
        acc_ref[...] = jnp.zeros_like(acc_ref)

    # bf16 x bf16 -> f32 accumulation on the MXU.
    acc_ref[...] += jnp.dot(x_ref[...], w_ref[...],
                            preferred_element_type=jnp.float32)

    @pl.when(k == pl.num_programs(2) - 1)
    def _():
        y = acc_ref[...] * s_ref[...] + b_ref[...]   # f32 epilogue on the VPU
        if activation == "relu":
            y = jnp.maximum(y, 0.0)
        o_ref[...] = y.astype(o_ref.dtype)


def _round_up(x, m):
    return ((x + m - 1) // m) * m


def fused_matmul(x, w, scale=None, bias=None, activation="none",
                 tm_max=256, tn_max=512, tk_max=512):
    """x: (M, K) f32, w: (K, N) f32  ->  (M, N) f32 = act((x @ w) * scale + bias)."""
    M, K = x.shape
    K2, N = w.shape
    assert K == K2
    if scale is None:
        scale = jnp.ones((N,), jnp.float32)
    if bias is None:
        bias = jnp.zeros((N,), jnp.float32)

    # ---- tile selection: 256-row tiles when M allows, lane-dense N, tiled K ----
    tm = min(tm_max, _round_up(M, 8))
    Mp = _round_up(M, tm)
    tn = min(tn_max, _round_up(N, 128))
    Np = _round_up(N, tn)
    k128 = _round_up(K, 128)
    tk = k128 if k128 <= 1024 else tk_max
    Kp = _round_up(K, tk)

    # Pad to tile multiples (zero padding is exact for the accumulate) and cast the
    # matmul operands to bf16; accumulation stays f32 in the kernel scratch.
    x_p = jnp.pad(x, ((0, Mp - M), (0, Kp - K))).astype(jnp.bfloat16)
    w_p = jnp.pad(w, ((0, Kp - K), (0, Np - N))).astype(jnp.bfloat16)
    s_p = jnp.pad(scale.astype(jnp.float32), ((0, Np - N),)).reshape(1, Np)
    b_p = jnp.pad(bias.astype(jnp.float32), ((0, Np - N),)).reshape(1, Np)

    grid = (Mp // tm, Np // tn, Kp // tk)

    # Explicit VMEM budget: double-buffered operand/output tiles + f32 accumulator.
    vmem_bytes = (2 * tm * tk * 2        # x tiles (bf16, double buffered)
                  + 2 * tk * tn * 2      # w tiles (bf16, double buffered)
                  + 2 * tm * tn * 4      # output tiles (f32)
                  + 4 * tn * 4           # scale / bias tiles
                  + tm * tn * 4)         # accumulator scratch
    vmem_limit = int(min(max(2 * vmem_bytes + (4 << 20), 32 << 20), 64 << 20))

    kernel = functools.partial(_fused_matmul_kernel, activation=activation)
    out = pl.pallas_call(
        kernel,
        out_shape=jax.ShapeDtypeStruct((Mp, Np), jnp.float32),
        grid_spec=pltpu.PrefetchScalarGridSpec(
            num_scalar_prefetch=0,
            grid=grid,
            in_specs=[
                pl.BlockSpec((tm, tk), lambda i, j, k: (i, k)),   # X row-slab x K-slab
                pl.BlockSpec((tk, tn), lambda i, j, k: (k, j)),   # W K-slab x N-slab
                pl.BlockSpec((1, tn), lambda i, j, k: (0, j)),    # per-channel scale
                pl.BlockSpec((1, tn), lambda i, j, k: (0, j)),    # per-channel bias
            ],
            out_specs=pl.BlockSpec((tm, tn), lambda i, j, k: (i, j)),
            scratch_shapes=[pltpu.VMEM((tm, tn), jnp.float32)],
        ),
        compiler_params=pltpu.CompilerParams(
            dimension_semantics=("parallel", "parallel", "arbitrary"),
            vmem_limit_bytes=vmem_limit,
        ),
    )(x_p, w_p, s_p, b_p)
    return out[:M, :N]


# -----------------------------------------------------------------------------
# Elementwise tensor_max fusion (fuse_scheme == 0) as a tiny Pallas kernel
# -----------------------------------------------------------------------------
def _max_kernel(a_ref, b_ref, o_ref):
    o_ref[...] = jnp.maximum(a_ref[...], b_ref[...])


def fuse_tensor_max(a, b):
    return pl.pallas_call(
        _max_kernel, out_shape=jax.ShapeDtypeStruct(a.shape, a.dtype)
    )(a, b)


# -----------------------------------------------------------------------------
# Module building blocks
# -----------------------------------------------------------------------------
def replicate_pad(x, p):
    # F.pad(..., mode='replicate')
    return jnp.pad(x, ((0, 0), (0, 0), (p, p), (p, p)), mode="edge")


def max_pool2d(x, k, stride, padding):
    # TODO(synk): nn.MaxPool2d kept as an XLA reduce_window (no bespoke Pallas pool kernel).
    return lax.reduce_window(
        x, -jnp.inf, lax.max,
        window_dimensions=(1, 1, k, k),
        window_strides=(1, 1, stride, stride),
        padding=((0, 0), (0, 0), (padding, padding), (padding, padding)))


def bn_fold(gamma, beta, mean, var, eps=1e-5):
    # Eval-mode BatchNorm2d folded into a per-channel affine (scale, shift).
    scale = gamma / jnp.sqrt(var + eps)
    return scale, beta - mean * scale


def conv2d_bn_act(x, w, stride, padding, scale=None, shift=None, relu=False):
    """Conv2d(bias=False) [+ folded BN] [+ ReLU] as im2col + fused Pallas matmul."""
    B, Cin, H, W = x.shape
    Cout, _, KH, KW = w.shape
    if padding > 0:
        x = jnp.pad(x, ((0, 0), (0, 0), (padding, padding), (padding, padding)))
    Hp, Wp = x.shape[2], x.shape[3]
    Hout = (Hp - KH) // stride + 1
    Wout = (Wp - KW) // stride + 1
    # im2col: feature ordering (Cin, KH, KW) matches w.reshape(Cout, Cin*KH*KW).
    cols = []
    for i in range(KH):
        for j in range(KW):
            cols.append(x[:, :, i:i + stride * Hout:stride, j:j + stride * Wout:stride])
    patches = jnp.stack(cols, axis=2).reshape(B, Cin * KH * KW, Hout, Wout)
    patches = patches.transpose(0, 2, 3, 1).reshape(B * Hout * Wout, Cin * KH * KW)
    w_mat = w.reshape(Cout, Cin * KH * KW).T
    y = fused_matmul(patches, w_mat, scale, shift,
                     activation="relu" if relu else "none")
    return y.reshape(B, Hout, Wout, Cout).transpose(0, 3, 1, 2)


# -----------------------------------------------------------------------------
# IFCNN forward (eval mode)
# -----------------------------------------------------------------------------
def ifcnn_forward(params, rgb, msr, fuse_scheme=0):
    s2, b2 = bn_fold(*params["bn2"])
    s3, b3 = bn_fold(*params["bn3"])
    s4, b4 = bn_fold(*params["bn4"])

    def conv1(t):        # frozen resnet.conv1; stride forced to 1, padding (0, 0), no bias
        return conv2d_bn_act(t, params["conv1_w"], stride=1, padding=0)

    def conv2_block(t):  # Conv(7, s2, p3, no bias) + BN + ReLU + MaxPool(3, s2, p1)
        return max_pool2d(conv2d_bn_act(t, params["conv2_w"], 2, 3, s2, b2, True), 3, 2, 1)

    def conv3_block(t):  # Conv(3, s2, p1, no bias) + BN + ReLU + MaxPool(3, s1, p1)
        return max_pool2d(conv2d_bn_act(t, params["conv3_w"], 2, 1, s3, b3, True), 3, 1, 1)

    def conv4_block(t):  # Conv(1, s1, p0, no bias) + BN + ReLU (+ MaxPool(1) == identity)
        return conv2d_bn_act(t, params["conv4_w"], 1, 0, s4, b4, True)

    def ffn(t):
        # FFN: Linear + ReLU + Dropout(0.5) + Linear + ReLU + Dropout(0.5).
        # TODO(synk): Dropout is modelled in eval mode (identity); train-mode RNG masks
        #             are not translated.
        x1 = t.reshape(t.shape[0], -1)
        h = fused_matmul(x1, params["fc1_w"], None, params["fc1_b"], activation="relu")
        return fused_matmul(h, params["fc2_w"], None, params["fc2_b"], activation="relu")

    outs = [replicate_pad(t, 3) for t in (rgb, msr)]
    outs = [conv1(t) for t in outs]
    outs = [conv2_block(t) for t in outs]

    sh_feature = [conv3_block(t) for t in outs]
    sp_feature_rgb = conv3_block(outs[0])
    sp_feature_msr = conv3_block(outs[1])

    sh_feature = [conv4_block(t) for t in sh_feature]
    sp_feature_rgb = conv4_block(sp_feature_rgb)
    sp_feature_msr = conv4_block(sp_feature_msr)

    sh_feature_1d = [ffn(t) for t in sh_feature]
    sp_feature_rgb_1d = ffn(sp_feature_rgb)
    sp_feature_msr_1d = ffn(sp_feature_msr)

    if fuse_scheme == 1:
        sh_final = sh_feature_1d[0] + sh_feature_1d[1]
    elif fuse_scheme == 2:
        sh_final = (sh_feature_1d[0] + sh_feature_1d[1]) / 2.0
    else:  # 0 / default: elementwise max (Pallas kernel)
        sh_final = fuse_tensor_max(sh_feature_1d[0], sh_feature_1d[1])

    return sp_feature_rgb_1d, sp_feature_msr_1d, sh_feature_1d, sh_final


# -----------------------------------------------------------------------------
# Pure-JAX (XLA) reference with the same bf16 matmul / f32 accumulate convention
# -----------------------------------------------------------------------------
def _ref_conv(x, w, stride, padding, scale=None, shift=None, relu=False):
    y = lax.conv_general_dilated(
        x.astype(jnp.bfloat16), w.astype(jnp.bfloat16),
        window_strides=(stride, stride),
        padding=((padding, padding), (padding, padding)),
        dimension_numbers=("NCHW", "OIHW", "NCHW"),
        preferred_element_type=jnp.float32)
    if scale is not None:
        y = y * scale[None, :, None, None] + shift[None, :, None, None]
    if relu:
        y = jnp.maximum(y, 0.0)
    return y


def _ref_linear_relu(x, w, b):
    y = jnp.dot(x.astype(jnp.bfloat16), w.astype(jnp.bfloat16),
                preferred_element_type=jnp.float32) + b
    return jnp.maximum(y, 0.0)


def ifcnn_reference(params, rgb, msr, fuse_scheme=0):
    s2, b2 = bn_fold(*params["bn2"])
    s3, b3 = bn_fold(*params["bn3"])
    s4, b4 = bn_fold(*params["bn4"])

    outs = [replicate_pad(t, 3) for t in (rgb, msr)]
    outs = [_ref_conv(t, params["conv1_w"], 1, 0) for t in outs]
    outs = [max_pool2d(_ref_conv(t, params["conv2_w"], 2, 3, s2, b2, True), 3, 2, 1)
            for t in outs]

    def c3(t):
        return max_pool2d(_ref_conv(t, params["conv3_w"], 2, 1, s3, b3, True), 3, 1, 1)

    def c4(t):
        return _ref_conv(t, params["conv4_w"], 1, 0, s4, b4, True)

    def ffn(t):
        x1 = t.reshape(t.shape[0], -1)
        return _ref_linear_relu(_ref_linear_relu(x1, params["fc1_w"], params["fc1_b"]),
                                params["fc2_w"], params["fc2_b"])

    sh = [c3(t) for t in outs]
    sp_r, sp_m = c3(outs[0]), c3(outs[1])
    sh = [c4(t) for t in sh]
    sp_r, sp_m = c4(sp_r), c4(sp_m)
    sh_1d = [ffn(t) for t in sh]
    sp_r_1d, sp_m_1d = ffn(sp_r), ffn(sp_m)
    if fuse_scheme == 1:
        fin = sh_1d[0] + sh_1d[1]
    elif fuse_scheme == 2:
        fin = (sh_1d[0] + sh_1d[1]) / 2.0
    else:
        fin = jnp.maximum(sh_1d[0], sh_1d[1])
    return sp_r_1d, sp_m_1d, sh_1d, fin


if __name__ == "__main__":
    # Small shapes consistent with IFCNN: two 3-channel 32x32 input images.
    # 32x32 -> conv1 32x32x64 -> conv2 8x8x64 -> conv3 4x4x64 -> conv4 4x4x16,
    # so the FFN is FFN(16*4*4 = 256, 4096, 1024) (hidden/output dims as in the module;
    # input dim follows the smaller spatial size).
    B, H, W = 2, 32, 32
    HIDDEN, OUT_DIM = 4096, 1024

    key = jax.random.PRNGKey(0)
    ks = jax.random.split(key, 12)

    def conv_init(k, cout, cin, kh, kw):
        # matches the module's m.weight.data.normal_(0, sqrt(2/n)) init
        n = kh * kw * cout
        return jax.random.normal(k, (cout, cin, kh, kw), jnp.float32) * math.sqrt(2.0 / n)

    def bn_init(k, c):
        k1, k2, k3, k4 = jax.random.split(k, 4)
        gamma = jax.random.uniform(k1, (c,), jnp.float32, 0.5, 1.5)
        beta = 0.1 * jax.random.normal(k2, (c,), jnp.float32)
        mean = 0.1 * jax.random.normal(k3, (c,), jnp.float32)
        var = jax.random.uniform(k4, (c,), jnp.float32, 0.5, 1.5)
        return gamma, beta, mean, var

    def linear_init(k, fin, fout):
        k1, k2 = jax.random.split(k)
        bound = 1.0 / math.sqrt(fin)
        w = jax.random.uniform(k1, (fin, fout), jnp.float32, -bound, bound)
        b = jax.random.uniform(k2, (fout,), jnp.float32, -bound, bound)
        return w, b

    rgb = jax.random.normal(ks[0], (B, 3, H, W), jnp.float32)
    msr = jax.random.normal(ks[1], (B, 3, H, W), jnp.float32)

    fc1_w, fc1_b = linear_init(ks[8], 16 * 4 * 4, HIDDEN)
    fc2_w, fc2_b = linear_init(ks[9], HIDDEN, OUT_DIM)
    params = {
        "conv1_w": conv_init(ks[2], 64, 3, 7, 7),    # frozen resnet.conv1
        "conv2_w": conv_init(ks[3], 64, 64, 7, 7),
        "conv3_w": conv_init(ks[4], 64, 64, 3, 3),
        "conv4_w": conv_init(ks[5], 16, 64, 1, 1),
        "bn2": bn_init(ks[6], 64),
        "bn3": bn_init(ks[7], 64),
        "bn4": bn_init(ks[10], 16),
        "fc1_w": fc1_w, "fc1_b": fc1_b,
        "fc2_w": fc2_w, "fc2_b": fc2_b,
    }

    forward = jax.jit(functools.partial(ifcnn_forward, fuse_scheme=0))
    out = jax.block_until_ready(forward(params, rgb, msr))
    sp_rgb_1d, sp_msr_1d, sh_1d, sh_final = out

    ref = ifcnn_reference(params, rgb, msr, fuse_scheme=0)
    checks = [(sp_rgb_1d, ref[0]), (sp_msr_1d, ref[1]),
              (sh_1d[0], ref[2][0]), (sh_1d[1], ref[2][1]), (sh_final, ref[3])]
    for got, want in checks:
        assert got.shape == want.shape, (got.shape, want.shape)
        assert jnp.allclose(got, want, atol=2e-2, rtol=2e-2), "mismatch vs reference"

    print("KERNEL_OK")
</pallas_src>

<mosaic_0001>
module attributes {stable_mosaic.version = 11 : i64} {
  func.func @_fused_matmul_kernel(%arg0: i32, %arg1: i32, %arg2: i32, %arg3: memref<256x256xbf16, #tpu.memory_space<vmem>>, %arg4: memref<256x128xbf16, #tpu.memory_space<vmem>>, %arg5: memref<1x128xf32, #tpu.memory_space<vmem>>, %arg6: memref<1x128xf32, #tpu.memory_space<vmem>>, %arg7: memref<256x128xf32, #tpu.memory_space<vmem>>, %arg8: memref<256x128xf32, #tpu.memory_space<vmem>>) attributes {dimension_semantics = [#tpu.dimension_semantics<parallel>, #tpu.dimension_semantics<parallel>, #tpu.dimension_semantics<arbitrary>], iteration_bounds = array<i64: 8, 1, 1>, scalar_prefetch = 0 : i64, scratch_operands = 1 : i64, tpu.core_type = #tpu.core_type<tc>, window_params = [{transform_indices = @transform_0, window_bounds = array<i64: 256, 256>}, {transform_indices = @transform_1, window_bounds = array<i64: 256, 128>}, {transform_indices = @transform_2, window_bounds = array<i64: 1, 128>}, {transform_indices = @transform_3, window_bounds = array<i64: 1, 128>}, {transform_indices = @transform_4, window_bounds = array<i64: 256, 128>}]} {
    %c0_i32 = arith.constant 0 : i32
    %0 = arith.cmpi eq, %arg2, %c0_i32 : i32
    %1 = arith.extui %0 : i1 to i32
    %c0_i32_0 = arith.constant 0 : i32
    %2 = arith.cmpi ne, %1, %c0_i32_0 : i32
    scf.if %2 {
      %cst_10 = arith.constant 0.000000e+00 : f32
      %12 = vector.broadcast %cst_10 : f32 to vector<256x128xf32>
      %c0_11 = arith.constant 0 : index
      %c0_12 = arith.constant 0 : index
      %13 = vector.load %arg8[%c0_11, %c0_12] : memref<256x128xf32, #tpu.memory_space<vmem>>, vector<256x128xf32>
      tpu.vector_store %arg8[%c0_11, %c0_12], %12 {strides = array<i32>} : memref<256x128xf32, #tpu.memory_space<vmem>>, vector<256x128xf32>,
    } else {
    }
    %c0 = arith.constant 0 : index
    %c0_1 = arith.constant 0 : index
    %3 = vector.load %arg8[%c0, %c0_1] : memref<256x128xf32, #tpu.memory_space<vmem>>, vector<256x128xf32>
    %c0_2 = arith.constant 0 : index
    %c0_3 = arith.constant 0 : index
    %4 = vector.load %arg3[%c0_2, %c0_3] : memref<256x256xbf16, #tpu.memory_space<vmem>>, vector<256x256xbf16>
    %c0_4 = arith.constant 0 : index
    %c0_5 = arith.constant 0 : index
    %5 = vector.load %arg4[%c0_4, %c0_5] : memref<256x128xbf16, #tpu.memory_space<vmem>>, vector<256x128xbf16>
    %cst = arith.constant dense<0.000000e+00> : vector<256x128xf32>
    %6 = tpu.matmul %4, %5, %cst {dimension_numbers = #tpu.dot_dimension_numbers<[1], [0], [0], [1], [0, 0, 1, 1], [], []>} : vector<256x256xbf16>, vector<256x128xbf16>, vector<256x128xf32> -> vector<256x128xf32>
    %7 = arith.addf %3, %6 : vector<256x128xf32>
    %c0_6 = arith.constant 0 : index
    %c0_7 = arith.constant 0 : index
    %8 = vector.load %arg8[%c0_6, %c0_7] : memref<256x128xf32, #tpu.memory_space<vmem>>, vector<256x128xf32>
    tpu.vector_store %arg8[%c0_6, %c0_7], %7 {strides = array<i32>} : memref<256x128xf32, #tpu.memory_space<vmem>>, vector<256x128xf32>,
    %c0_i32_8 = arith.constant 0 : i32
    %9 = arith.cmpi eq, %arg2, %c0_i32_8 : i32
    %10 = arith.extui %9 : i1 to i32
    %c0_i32_9 = arith.constant 0 : i32
    %11 = arith.cmpi ne, %10, %c0_i32_9 : i32
    scf.if %11 {
      %c0_10 = arith.constant 0 : index
      %c0_11 = arith.constant 0 : index
      %12 = vector.load %arg8[%c0_10, %c0_11] : memref<256x128xf32, #tpu.memory_space<vmem>>, vector<256x128xf32>
      %c0_12 = arith.constant 0 : index
      %c0_13 = arith.constant 0 : index
      %13 = vector.load %arg5[%c0_12, %c0_13] : memref<1x128xf32, #tpu.memory_space<vmem>>, vector<1x128xf32>
      %14 = vector.broadcast %13 : vector<1x128xf32> to vector<256x128xf32>
      %15 = arith.mulf %12, %14 : vector<256x128xf32>
      %c0_14 = arith.constant 0 : index
      %c0_15 = arith.constant 0 : index
      %16 = vector.load %arg6[%c0_14, %c0_15] : memref<1x128xf32, #tpu.memory_space<vmem>>, vector<1x128xf32>
      %17 = vector.broadcast %16 : vector<1x128xf32> to vector<256x128xf32>
      %18 = arith.addf %15, %17 : vector<256x128xf32>
      %c0_16 = arith.constant 0 : index
      %c0_17 = arith.constant 0 : index
      %19 = vector.load %arg7[%c0_16, %c0_17] : memref<256x128xf32, #tpu.memory_space<vmem>>, vector<256x128xf32>
      tpu.vector_store %arg7[%c0_16, %c0_17], %18 {strides = array<i32>} : memref<256x128xf32, #tpu.memory_space<vmem>>, vector<256x128xf32>,
    } else {
    }
    return
  }
  func.func @transform_0(%arg0: i32, %arg1: i32, %arg2: i32) -> (i32, i32) {
    %c0_i32 = arith.constant 0 : i32
    return %arg0, %arg2 : i32, i32
  }
  func.func @transform_1(%arg0: i32, %arg1: i32, %arg2: i32) -> (i32, i32) {
    %c0_i32 = arith.constant 0 : i32
    return %arg2, %arg1 : i32, i32
  }
  func.func @transform_2(%arg0: i32, %arg1: i32, %arg2: i32) -> (i32, i32) {
    %c0_i32 = arith.constant 0 : i32
    %c0_i32_0 = arith.constant 0 : i32
    return %c0_i32, %arg1 : i32, i32
  }
  func.func @transform_3(%arg0: i32, %arg1: i32, %arg2: i32) -> (i32, i32) {
    %c0_i32 = arith.constant 0 : i32
    %c0_i32_0 = arith.constant 0 : i32
    return %c0_i32, %arg1 : i32, i32
  }
  func.func @transform_4(%arg0: i32, %arg1: i32, %arg2: i32) -> (i32, i32) {
    %c0_i32 = arith.constant 0 : i32
    return %arg0, %arg1 : i32, i32
  }
}

module attributes {stable_mosaic.version = 11 : i64} {
  func.func @_fused_matmul_kernel(%arg0: i32, %arg1: i32, %arg2: i32, %arg3: memref<256x512xbf16, #tpu.memory_space<vmem>>, %arg4: memref<512x128xbf16, #tpu.memory_space<vmem>>, %arg5: memref<1x128xf32, #tpu.memory_space<vmem>>, %arg6: memref<1x128xf32, #tpu.memory_space<vmem>>, %arg7: memref<256x128xf32, #tpu.memory_space<vmem>>, %arg8: memref<256x128xf32, #tpu.memory_space<vmem>>) attributes {dimension_semantics = [#tpu.dimension_semantics<parallel>, #tpu.dimension_semantics<parallel>, #tpu.dimension_semantics<arbitrary>], iteration_bounds = array<i64: 2, 1, 7>, scalar_prefetch = 0 : i64, scratch_operands = 1 : i64, tpu.core_type = #tpu.core_type<tc>, window_params = [{transform_indices = @transform_0, window_bounds = array<i64: 256, 512>}, {transform_indices = @transform_1, window_bounds = array<i64: 512, 128>}, {transform_indices = @transform_2, window_bounds = array<i64: 1, 128>}, {transform_indices = @transform_3, window_bounds = array<i64: 1, 128>}, {transform_indices = @transform_4, window_bounds = array<i64: 256, 128>}]} {
    %c0_i32 = arith.constant 0 : i32
    %0 = arith.cmpi eq, %arg2, %c0_i32 : i32
    %1 = arith.extui %0 : i1 to i32
    %c0_i32_0 = arith.constant 0 : i32
    %2 = arith.cmpi ne, %1, %c0_i32_0 : i32
    scf.if %2 {
      %cst_9 = arith.constant 0.000000e+00 : f32
      %12 = vector.broadcast %cst_9 : f32 to vector<256x128xf32>
      %c0_10 = arith.constant 0 : index
      %c0_11 = arith.constant 0 : index
      %13 = vector.load %arg8[%c0_10, %c0_11] : memref<256x128xf32, #tpu.memory_space<vmem>>, vector<256x128xf32>
      tpu.vector_store %arg8[%c0_10, %c0_11], %12 {strides = array<i32>} : memref<256x128xf32, #tpu.memory_space<vmem>>, vector<256x128xf32>,
    } else {
    }
    %c0 = arith.constant 0 : index
    %c0_1 = arith.constant 0 : index
    %3 = vector.load %arg8[%c0, %c0_1] : memref<256x128xf32, #tpu.memory_space<vmem>>, vector<256x128xf32>
    %c0_2 = arith.constant 0 : index
    %c0_3 = arith.constant 0 : index
    %4 = vector.load %arg3[%c0_2, %c0_3] : memref<256x512xbf16, #tpu.memory_space<vmem>>, vector<256x512xbf16>
    %c0_4 = arith.constant 0 : index
    %c0_5 = arith.constant 0 : index
    %5 = vector.load %arg4[%c0_4, %c0_5] : memref<512x128xbf16, #tpu.memory_space<vmem>>, vector<512x128xbf16>
    %cst = arith.constant dense<0.000000e+00> : vector<256x128xf32>
    %6 = tpu.matmul %4, %5, %cst {dimension_numbers = #tpu.dot_dimension_numbers<[1], [0], [0], [1], [0, 0, 1, 1], [], []>} : vector<256x512xbf16>, vector<512x128xbf16>, vector<256x128xf32> -> vector<256x128xf32>
    %7 = arith.addf %3, %6 : vector<256x128xf32>
    %c0_6 = arith.constant 0 : index
    %c0_7 = arith.constant 0 : index
    %8 = vector.load %arg8[%c0_6, %c0_7] : memref<256x128xf32, #tpu.memory_space<vmem>>, vector<256x128xf32>
    tpu.vector_store %arg8[%c0_6, %c0_7], %7 {strides = array<i32>} : memref<256x128xf32, #tpu.memory_space<vmem>>, vector<256x128xf32>,
    %c6_i32 = arith.constant 6 : i32
    %9 = arith.cmpi eq, %arg2, %c6_i32 : i32
    %10 = arith.extui %9 : i1 to i32
    %c0_i32_8 = arith.constant 0 : i32
    %11 = arith.cmpi ne, %10, %c0_i32_8 : i32
    scf.if %11 {
      %c0_9 = arith.constant 0 : index
      %c0_10 = arith.constant 0 : index
      %12 = vector.load %arg8[%c0_9, %c0_10] : memref<256x128xf32, #tpu.memory_space<vmem>>, vector<256x128xf32>
      %c0_11 = arith.constant 0 : index
      %c0_12 = arith.constant 0 : index
      %13 = vector.load %arg5[%c0_11, %c0_12] : memref<1x128xf32, #tpu.memory_space<vmem>>, vector<1x128xf32>
      %14 = vector.broadcast %13 : vector<1x128xf32> to vector<256x128xf32>
      %15 = arith.mulf %12, %14 : vector<256x128xf32>
      %c0_13 = arith.constant 0 : index
      %c0_14 = arith.constant 0 : index
      %16 = vector.load %arg6[%c0_13, %c0_14] : memref<1x128xf32, #tpu.memory_space<vmem>>, vector<1x128xf32>
      %17 = vector.broadcast %16 : vector<1x128xf32> to vector<256x128xf32>
      %18 = arith.addf %15, %17 : vector<256x128xf32>
      %cst_15 = arith.constant 0.000000e+00 : f32
      %19 = vector.broadcast %cst_15 : f32 to vector<256x128xf32>
      %20 = arith.maximumf %18, %19 : vector<256x128xf32>
      %c0_16 = arith.constant 0 : index
      %c0_17 = arith.constant 0 : index
      %21 = vector.load %arg7[%c0_16, %c0_17] : memref<256x128xf32, #tpu.memory_space<vmem>>, vector<256x128xf32>
      tpu.vector_store %arg7[%c0_16, %c0_17], %20 {strides = array<i32>} : memref<256x128xf32, #tpu.memory_space<vmem>>, vector<256x128xf32>,
    } else {
    }
    return
  }
  func.func @transform_0(%arg0: i32, %arg1: i32, %arg2: i32) -> (i32, i32) {
    %c0_i32 = arith.constant 0 : i32
    return %arg0, %arg2 : i32, i32
  }
  func.func @transform_1(%arg0: i32, %arg1: i32, %arg2: i32) -> (i32, i32) {
    %c0_i32 = arith.constant 0 : i32
    return %arg2, %arg1 : i32, i32
  }
  func.func @transform_2(%arg0: i32, %arg1: i32, %arg2: i32) -> (i32, i32) {
    %c0_i32 = arith.constant 0 : i32
    %c0_i32_0 = arith.constant 0 : i32
    return %c0_i32, %arg1 : i32, i32
  }
  func.func @transform_3(%arg0: i32, %arg1: i32, %arg2: i32) -> (i32, i32) {
    %c0_i32 = arith.constant 0 : i32
    %c0_i32_0 = arith.constant 0 : i32
    return %c0_i32, %arg1 : i32, i32
  }
  func.func @transform_4(%arg0: i32, %arg1: i32, %arg2: i32) -> (i32, i32) {
    %c0_i32 = arith.constant 0 : i32
    return %arg0, %arg1 : i32, i32
  }
}

module attributes {stable_mosaic.version = 11 : i64} {
  func.func @_fused_matmul_kernel(%arg0: i32, %arg1: i32, %arg2: i32, %arg3: memref<32x640xbf16, #tpu.memory_space<vmem>>, %arg4: memref<640x128xbf16, #tpu.memory_space<vmem>>, %arg5: memref<1x128xf32, #tpu.memory_space<vmem>>, %arg6: memref<1x128xf32, #tpu.memory_space<vmem>>, %arg7: memref<32x128xf32, #tpu.memory_space<vmem>>, %arg8: memref<32x128xf32, #tpu.memory_space<vmem>>) attributes {dimension_semantics = [#tpu.dimension_semantics<parallel>, #tpu.dimension_semantics<parallel>, #tpu.dimension_semantics<arbitrary>], iteration_bounds = array<i64: 1, 1, 1>, scalar_prefetch = 0 : i64, scratch_operands = 1 : i64, tpu.core_type = #tpu.core_type<tc>, window_params = [{transform_indices = @transform_0, window_bounds = array<i64: 32, 640>}, {transform_indices = @transform_1, window_bounds = array<i64: 640, 128>}, {transform_indices = @transform_2, window_bounds = array<i64: 1, 128>}, {transform_indices = @transform_3, window_bounds = array<i64: 1, 128>}, {transform_indices = @transform_4, window_bounds = array<i64: 32, 128>}]} {
    %c0_i32 = arith.constant 0 : i32
    %0 = arith.cmpi eq, %arg2, %c0_i32 : i32
    %1 = arith.extui %0 : i1 to i32
    %c0_i32_0 = arith.constant 0 : i32
    %2 = arith.cmpi ne, %1, %c0_i32_0 : i32
    scf.if %2 {
      %cst_10 = arith.constant 0.000000e+00 : f32
      %12 = vector.broadcast %cst_10 : f32 to vector<32x128xf32>
      %c0_11 = arith.constant 0 : index
      %c0_12 = arith.constant 0 : index
      %13 = vector.load %arg8[%c0_11, %c0_12] : memref<32x128xf32, #tpu.memory_space<vmem>>, vector<32x128xf32>
      tpu.vector_store %arg8[%c0_11, %c0_12], %12 {strides = array<i32>} : memref<32x128xf32, #tpu.memory_space<vmem>>, vector<32x128xf32>,
    } else {
    }
    %c0 = arith.constant 0 : index
    %c0_1 = arith.constant 0 : index
    %3 = vector.load %arg8[%c0, %c0_1] : memref<32x128xf32, #tpu.memory_space<vmem>>, vector<32x128xf32>
    %c0_2 = arith.constant 0 : index
    %c0_3 = arith.constant 0 : index
    %4 = vector.load %arg3[%c0_2, %c0_3] : memref<32x640xbf16, #tpu.memory_space<vmem>>, vector<32x640xbf16>
    %c0_4 = arith.constant 0 : index
    %c0_5 = arith.constant 0 : index
    %5 = vector.load %arg4[%c0_4, %c0_5] : memref<640x128xbf16, #tpu.memory_space<vmem>>, vector<640x128xbf16>
    %cst = arith.constant dense<0.000000e+00> : vector<32x128xf32>
    %6 = tpu.matmul %4, %5, %cst {dimension_numbers = #tpu.dot_dimension_numbers<[1], [0], [0], [1], [0, 0, 1, 1], [], []>} : vector<32x640xbf16>, vector<640x128xbf16>, vector<32x128xf32> -> vector<32x128xf32>
    %7 = arith.addf %3, %6 : vector<32x128xf32>
    %c0_6 = arith.constant 0 : index
    %c0_7 = arith.constant 0 : index
    %8 = vector.load %arg8[%c0_6, %c0_7] : memref<32x128xf32, #tpu.memory_space<vmem>>, vector<32x128xf32>
    tpu.vector_store %arg8[%c0_6, %c0_7], %7 {strides = array<i32>} : memref<32x128xf32, #tpu.memory_space<vmem>>, vector<32x128xf32>,
    %c0_i32_8 = arith.constant 0 : i32
    %9 = arith.cmpi eq, %arg2, %c0_i32_8 : i32
    %10 = arith.extui %9 : i1 to i32
    %c0_i32_9 = arith.constant 0 : i32
    %11 = arith.cmpi ne, %10, %c0_i32_9 : i32
    scf.if %11 {
      %c0_10 = arith.constant 0 : index
      %c0_11 = arith.constant 0 : index
      %12 = vector.load %arg8[%c0_10, %c0_11] : memref<32x128xf32, #tpu.memory_space<vmem>>, vector<32x128xf32>
      %c0_12 = arith.constant 0 : index
      %c0_13 = arith.constant 0 : index
      %13 = vector.load %arg5[%c0_12, %c0_13] : memref<1x128xf32, #tpu.memory_space<vmem>>, vector<1x128xf32>
      %14 = vector.broadcast %13 : vector<1x128xf32> to vector<32x128xf32>
      %15 = arith.mulf %12, %14 : vector<32x128xf32>
      %c0_14 = arith.constant 0 : index
      %c0_15 = arith.constant 0 : index
      %16 = vector.load %arg6[%c0_14, %c0_15] : memref<1x128xf32, #tpu.memory_space<vmem>>, vector<1x128xf32>
      %17 = vector.broadcast %16 : vector<1x128xf32> to vector<32x128xf32>
      %18 = arith.addf %15, %17 : vector<32x128xf32>
      %cst_16 = arith.constant 0.000000e+00 : f32
      %19 = vector.broadcast %cst_16 : f32 to vector<32x128xf32>
      %20 = arith.maximumf %18, %19 : vector<32x128xf32>
      %c0_17 = arith.constant 0 : index
      %c0_18 = arith.constant 0 : index
      %21 = vector.load %arg7[%c0_17, %c0_18] : memref<32x128xf32, #tpu.memory_space<vmem>>, vector<32x128xf32>
      tpu.vector_store %arg7[%c0_17, %c0_18], %20 {strides = array<i32>} : memref<32x128xf32, #tpu.memory_space<vmem>>, vector<32x128xf32>,
    } else {
    }
    return
  }
  func.func @transform_0(%arg0: i32, %arg1: i32, %arg2: i32) -> (i32, i32) {
    %c0_i32 = arith.constant 0 : i32
    return %arg0, %arg2 : i32, i32
  }
  func.func @transform_1(%arg0: i32, %arg1: i32, %arg2: i32) -> (i32, i32) {
    %c0_i32 = arith.constant 0 : i32
    return %arg2, %arg1 : i32, i32
  }
  func.func @transform_2(%arg0: i32, %arg1: i32, %arg2: i32) -> (i32, i32) {
    %c0_i32 = arith.constant 0 : i32
    %c0_i32_0 = arith.constant 0 : i32
    return %c0_i32, %arg1 : i32, i32
  }
  func.func @transform_3(%arg0: i32, %arg1: i32, %arg2: i32) -> (i32, i32) {
    %c0_i32 = arith.constant 0 : i32
    %c0_i32_0 = arith.constant 0 : i32
    return %c0_i32, %arg1 : i32, i32
  }
  func.func @transform_4(%arg0: i32, %arg1: i32, %arg2: i32) -> (i32, i32) {
    %c0_i32 = arith.constant 0 : i32
    return %arg0, %arg1 : i32, i32
  }
}

module attributes {stable_mosaic.version = 11 : i64} {
  func.func @_fused_matmul_kernel(%arg0: i32, %arg1: i32, %arg2: i32, %arg3: memref<32x128xbf16, #tpu.memory_space<vmem>>, %arg4: memref<128x128xbf16, #tpu.memory_space<vmem>>, %arg5: memref<1x128xf32, #tpu.memory_space<vmem>>, %arg6: memref<1x128xf32, #tpu.memory_space<vmem>>, %arg7: memref<32x128xf32, #tpu.memory_space<vmem>>, %arg8: memref<32x128xf32, #tpu.memory_space<vmem>>) attributes {dimension_semantics = [#tpu.dimension_semantics<parallel>, #tpu.dimension_semantics<parallel>, #tpu.dimension_semantics<arbitrary>], iteration_bounds = array<i64: 1, 1, 1>, scalar_prefetch = 0 : i64, scratch_operands = 1 : i64, tpu.core_type = #tpu.core_type<tc>, window_params = [{transform_indices = @transform_0, window_bounds = array<i64: 32, 128>}, {transform_indices = @transform_1, window_bounds = array<i64: 128, 128>}, {transform_indices = @transform_2, window_bounds = array<i64: 1, 128>}, {transform_indices = @transform_3, window_bounds = array<i64: 1, 128>}, {transform_indices = @transform_4, window_bounds = array<i64: 32, 128>}]} {
    %c0_i32 = arith.constant 0 : i32
    %0 = arith.cmpi eq, %arg2, %c0_i32 : i32
    %1 = arith.extui %0 : i1 to i32
    %c0_i32_0 = arith.constant 0 : i32
    %2 = arith.cmpi ne, %1, %c0_i32_0 : i32
    scf.if %2 {
      %cst_10 = arith.constant 0.000000e+00 : f32
      %12 = vector.broadcast %cst_10 : f32 to vector<32x128xf32>
      %c0_11 = arith.constant 0 : index
      %c0_12 = arith.constant 0 : index
      %13 = vector.load %arg8[%c0_11, %c0_12] : memref<32x128xf32, #tpu.memory_space<vmem>>, vector<32x128xf32>
      tpu.vector_store %arg8[%c0_11, %c0_12], %12 {strides = array<i32>} : memref<32x128xf32, #tpu.memory_space<vmem>>, vector<32x128xf32>,
    } else {
    }
    %c0 = arith.constant 0 : index
    %c0_1 = arith.constant 0 : index
    %3 = vector.load %arg8[%c0, %c0_1] : memref<32x128xf32, #tpu.memory_space<vmem>>, vector<32x128xf32>
    %c0_2 = arith.constant 0 : index
    %c0_3 = arith.constant 0 : index
    %4 = vector.load %arg3[%c0_2, %c0_3] : memref<32x128xbf16, #tpu.memory_space<vmem>>, vector<32x128xbf16>
    %c0_4 = arith.constant 0 : index
    %c0_5 = arith.constant 0 : index
    %5 = vector.load %arg4[%c0_4, %c0_5] : memref<128x128xbf16, #tpu.memory_space<vmem>>, vector<128x128xbf16>
    %cst = arith.constant dense<0.000000e+00> : vector<32x128xf32>
    %6 = tpu.matmul %4, %5, %cst {dimension_numbers = #tpu.dot_dimension_numbers<[1], [0], [0], [1], [0, 0, 1, 1], [], []>} : vector<32x128xbf16>, vector<128x128xbf16>, vector<32x128xf32> -> vector<32x128xf32>
    %7 = arith.addf %3, %6 : vector<32x128xf32>
    %c0_6 = arith.constant 0 : index
    %c0_7 = arith.constant 0 : index
    %8 = vector.load %arg8[%c0_6, %c0_7] : memref<32x128xf32, #tpu.memory_space<vmem>>, vector<32x128xf32>
    tpu.vector_store %arg8[%c0_6, %c0_7], %7 {strides = array<i32>} : memref<32x128xf32, #tpu.memory_space<vmem>>, vector<32x128xf32>,
    %c0_i32_8 = arith.constant 0 : i32
    %9 = arith.cmpi eq, %arg2, %c0_i32_8 : i32
    %10 = arith.extui %9 : i1 to i32
    %c0_i32_9 = arith.constant 0 : i32
    %11 = arith.cmpi ne, %10, %c0_i32_9 : i32
    scf.if %11 {
      %c0_10 = arith.constant 0 : index
      %c0_11 = arith.constant 0 : index
      %12 = vector.load %arg8[%c0_10, %c0_11] : memref<32x128xf32, #tpu.memory_space<vmem>>, vector<32x128xf32>
      %c0_12 = arith.constant 0 : index
      %c0_13 = arith.constant 0 : index
      %13 = vector.load %arg5[%c0_12, %c0_13] : memref<1x128xf32, #tpu.memory_space<vmem>>, vector<1x128xf32>
      %14 = vector.broadcast %13 : vector<1x128xf32> to vector<32x128xf32>
      %15 = arith.mulf %12, %14 : vector<32x128xf32>
      %c0_14 = arith.constant 0 : index
      %c0_15 = arith.constant 0 : index
      %16 = vector.load %arg6[%c0_14, %c0_15] : memref<1x128xf32, #tpu.memory_space<vmem>>, vector<1x128xf32>
      %17 = vector.broadcast %16 : vector<1x128xf32> to vector<32x128xf32>
      %18 = arith.addf %15, %17 : vector<32x128xf32>
      %cst_16 = arith.constant 0.000000e+00 : f32
      %19 = vector.broadcast %cst_16 : f32 to vector<32x128xf32>
      %20 = arith.maximumf %18, %19 : vector<32x128xf32>
      %c0_17 = arith.constant 0 : index
      %c0_18 = arith.constant 0 : index
      %21 = vector.load %arg7[%c0_17, %c0_18] : memref<32x128xf32, #tpu.memory_space<vmem>>, vector<32x128xf32>
      tpu.vector_store %arg7[%c0_17, %c0_18], %20 {strides = array<i32>} : memref<32x128xf32, #tpu.memory_space<vmem>>, vector<32x128xf32>,
    } else {
    }
    return
  }
  func.func @transform_0(%arg0: i32, %arg1: i32, %arg2: i32) -> (i32, i32) {
    %c0_i32 = arith.constant 0 : i32
    return %arg0, %arg2 : i32, i32
  }
  func.func @transform_1(%arg0: i32, %arg1: i32, %arg2: i32) -> (i32, i32) {
    %c0_i32 = arith.constant 0 : i32
    return %arg2, %arg1 : i32, i32
  }
  func.func @transform_2(%arg0: i32, %arg1: i32, %arg2: i32) -> (i32, i32) {
    %c0_i32 = arith.constant 0 : i32
    %c0_i32_0 = arith.constant 0 : i32
    return %c0_i32, %arg1 : i32, i32
  }
  func.func @transform_3(%arg0: i32, %arg1: i32, %arg2: i32) -> (i32, i32) {
    %c0_i32 = arith.constant 0 : i32
    %c0_i32_0 = arith.constant 0 : i32
    return %c0_i32, %arg1 : i32, i32
  }
  func.func @transform_4(%arg0: i32, %arg1: i32, %arg2: i32) -> (i32, i32) {
    %c0_i32 = arith.constant 0 : i32
    return %arg0, %arg1 : i32, i32
  }
}

module attributes {stable_mosaic.version = 11 : i64} {
  func.func @_fused_matmul_kernel(%arg0: i32, %arg1: i32, %arg2: i32, %arg3: memref<8x256xbf16, #tpu.memory_space<vmem>>, %arg4: memref<256x512xbf16, #tpu.memory_space<vmem>>, %arg5: memref<1x512xf32, #tpu.memory_space<vmem>>, %arg6: memref<1x512xf32, #tpu.memory_space<vmem>>, %arg7: memref<8x512xf32, #tpu.memory_space<vmem>>, %arg8: memref<8x512xf32, #tpu.memory_space<vmem>>) attributes {dimension_semantics = [#tpu.dimension_semantics<parallel>, #tpu.dimension_semantics<parallel>, #tpu.dimension_semantics<arbitrary>], iteration_bounds = array<i64: 1, 8, 1>, scalar_prefetch = 0 : i64, scratch_operands = 1 : i64, tpu.core_type = #tpu.core_type<tc>, window_params = [{transform_indices = @transform_0, window_bounds = array<i64: 8, 256>}, {transform_indices = @transform_1, window_bounds = array<i64: 256, 512>}, {transform_indices = @transform_2, window_bounds = array<i64: 1, 512>}, {transform_indices = @transform_3, window_bounds = array<i64: 1, 512>}, {transform_indices = @transform_4, window_bounds = array<i64: 8, 512>}]} {
    %c0_i32 = arith.constant 0 : i32
    %0 = arith.cmpi eq, %arg2, %c0_i32 : i32
    %1 = arith.extui %0 : i1 to i32
    %c0_i32_0 = arith.constant 0 : i32
    %2 = arith.cmpi ne, %1, %c0_i32_0 : i32
    scf.if %2 {
      %cst_10 = arith.constant 0.000000e+00 : f32
      %12 = vector.broadcast %cst_10 : f32 to vector<8x512xf32>
      %c0_11 = arith.constant 0 : index
      %c0_12 = arith.constant 0 : index
      %13 = vector.load %arg8[%c0_11, %c0_12] : memref<8x512xf32, #tpu.memory_space<vmem>>, vector<8x512xf32>
      tpu.vector_store %arg8[%c0_11, %c0_12], %12 {strides = array<i32>} : memref<8x512xf32, #tpu.memory_space<vmem>>, vector<8x512xf32>,
    } else {
    }
    %c0 = arith.constant 0 : index
    %c0_1 = arith.constant 0 : index
    %3 = vector.load %arg8[%c0, %c0_1] : memref<8x512xf32, #tpu.memory_space<vmem>>, vector<8x512xf32>
    %c0_2 = arith.constant 0 : index
    %c0_3 = arith.constant 0 : index
    %4 = vector.load %arg3[%c0_2, %c0_3] : memref<8x256xbf16, #tpu.memory_space<vmem>>, vector<8x256xbf16>
    %c0_4 = arith.constant 0 : index
    %c0_5 = arith.constant 0 : index
    %5 = vector.load %arg4[%c0_4, %c0_5] : memref<256x512xbf16, #tpu.memory_space<vmem>>, vector<256x512xbf16>
    %cst = arith.constant dense<0.000000e+00> : vector<8x512xf32>
    %6 = tpu.matmul %4, %5, %cst {dimension_numbers = #tpu.dot_dimension_numbers<[1], [0], [0], [1], [0, 0, 1, 1], [], []>} : vector<8x256xbf16>, vector<256x512xbf16>, vector<8x512xf32> -> vector<8x512xf32>
    %7 = arith.addf %3, %6 : vector<8x512xf32>
    %c0_6 = arith.constant 0 : index
    %c0_7 = arith.constant 0 : index
    %8 = vector.load %arg8[%c0_6, %c0_7] : memref<8x512xf32, #tpu.memory_space<vmem>>, vector<8x512xf32>
    tpu.vector_store %arg8[%c0_6, %c0_7], %7 {strides = array<i32>} : memref<8x512xf32, #tpu.memory_space<vmem>>, vector<8x512xf32>,
    %c0_i32_8 = arith.constant 0 : i32
    %9 = arith.cmpi eq, %arg2, %c0_i32_8 : i32
    %10 = arith.extui %9 : i1 to i32
    %c0_i32_9 = arith.constant 0 : i32
    %11 = arith.cmpi ne, %10, %c0_i32_9 : i32
    scf.if %11 {
      %c0_10 = arith.constant 0 : index
      %c0_11 = arith.constant 0 : index
      %12 = vector.load %arg8[%c0_10, %c0_11] : memref<8x512xf32, #tpu.memory_space<vmem>>, vector<8x512xf32>
      %c0_12 = arith.constant 0 : index
      %c0_13 = arith.constant 0 : index
      %13 = vector.load %arg5[%c0_12, %c0_13] : memref<1x512xf32, #tpu.memory_space<vmem>>, vector<1x512xf32>
      %14 = vector.broadcast %13 : vector<1x512xf32> to vector<8x512xf32>
      %15 = arith.mulf %12, %14 : vector<8x512xf32>
      %c0_14 = arith.constant 0 : index
      %c0_15 = arith.constant 0 : index
      %16 = vector.load %arg6[%c0_14, %c0_15] : memref<1x512xf32, #tpu.memory_space<vmem>>, vector<1x512xf32>
      %17 = vector.broadcast %16 : vector<1x512xf32> to vector<8x512xf32>
      %18 = arith.addf %15, %17 : vector<8x512xf32>
      %cst_16 = arith.constant 0.000000e+00 : f32
      %19 = vector.broadcast %cst_16 : f32 to vector<8x512xf32>
      %20 = arith.maximumf %18, %19 : vector<8x512xf32>
      %c0_17 = arith.constant 0 : index
      %c0_18 = arith.constant 0 : index
      %21 = vector.load %arg7[%c0_17, %c0_18] : memref<8x512xf32, #tpu.memory_space<vmem>>, vector<8x512xf32>
      tpu.vector_store %arg7[%c0_17, %c0_18], %20 {strides = array<i32>} : memref<8x512xf32, #tpu.memory_space<vmem>>, vector<8x512xf32>,
    } else {
    }
    return
  }
  func.func @transform_0(%arg0: i32, %arg1: i32, %arg2: i32) -> (i32, i32) {
    %c0_i32 = arith.constant 0 : i32
    return %arg0, %arg2 : i32, i32
  }
  func.func @transform_1(%arg0: i32, %arg1: i32, %arg2: i32) -> (i32, i32) {
    %c0_i32 = arith.constant 0 : i32
    return %arg2, %arg1 : i32, i32
  }
  func.func @transform_2(%arg0: i32, %arg1: i32, %arg2: i32) -> (i32, i32) {
    %c0_i32 = arith.constant 0 : i32
    %c0_i32_0 = arith.constant 0 : i32
    return %c0_i32, %arg1 : i32, i32
  }
  func.func @transform_3(%arg0: i32, %arg1: i32, %arg2: i32) -> (i32, i32) {
    %c0_i32 = arith.constant 0 : i32
    %c0_i32_0 = arith.constant 0 : i32
    return %c0_i32, %arg1 : i32, i32
  }
  func.func @transform_4(%arg0: i32, %arg1: i32, %arg2: i32) -> (i32, i32) {
    %c0_i32 = arith.constant 0 : i32
    return %arg0, %arg1 : i32, i32
  }
}

module attributes {stable_mosaic.version = 11 : i64} {
  func.func @_fused_matmul_kernel(%arg0: i32, %arg1: i32, %arg2: i32, %arg3: memref<8x512xbf16, #tpu.memory_space<vmem>>, %arg4: memref<512x512xbf16, #tpu.memory_space<vmem>>, %arg5: memref<1x512xf32, #tpu.memory_space<vmem>>, %arg6: memref<1x512xf32, #tpu.memory_space<vmem>>, %arg7: memref<8x512xf32, #tpu.memory_space<vmem>>, %arg8: memref<8x512xf32, #tpu.memory_space<vmem>>) attributes {dimension_semantics = [#tpu.dimension_semantics<parallel>, #tpu.dimension_semantics<parallel>, #tpu.dimension_semantics<arbitrary>], iteration_bounds = array<i64: 1, 2, 8>, scalar_prefetch = 0 : i64, scratch_operands = 1 : i64, tpu.core_type = #tpu.core_type<tc>, window_params = [{transform_indices = @transform_0, window_bounds = array<i64: 8, 512>}, {transform_indices = @transform_1, window_bounds = array<i64: 512, 512>}, {transform_indices = @transform_2, window_bounds = array<i64: 1, 512>}, {transform_indices = @transform_3, window_bounds = array<i64: 1, 512>}, {transform_indices = @transform_4, window_bounds = array<i64: 8, 512>}]} {
    %c0_i32 = arith.constant 0 : i32
    %0 = arith.cmpi eq, %arg2, %c0_i32 : i32
    %1 = arith.extui %0 : i1 to i32
    %c0_i32_0 = arith.constant 0 : i32
    %2 = arith.cmpi ne, %1, %c0_i32_0 : i32
    scf.if %2 {
      %cst_9 = arith.constant 0.000000e+00 : f32
      %12 = vector.broadcast %cst_9 : f32 to vector<8x512xf32>
      %c0_10 = arith.constant 0 : index
      %c0_11 = arith.constant 0 : index
      %13 = vector.load %arg8[%c0_10, %c0_11] : memref<8x512xf32, #tpu.memory_space<vmem>>, vector<8x512xf32>
      tpu.vector_store %arg8[%c0_10, %c0_11], %12 {strides = array<i32>} : memref<8x512xf32, #tpu.memory_space<vmem>>, vector<8x512xf32>,
    } else {
    }
    %c0 = arith.constant 0 : index
    %c0_1 = arith.constant 0 : index
    %3 = vector.load %arg8[%c0, %c0_1] : memref<8x512xf32, #tpu.memory_space<vmem>>, vector<8x512xf32>
    %c0_2 = arith.constant 0 : index
    %c0_3 = arith.constant 0 : index
    %4 = vector.load %arg3[%c0_2, %c0_3] : memref<8x512xbf16, #tpu.memory_space<vmem>>, vector<8x512xbf16>
    %c0_4 = arith.constant 0 : index
    %c0_5 = arith.constant 0 : index
    %5 = vector.load %arg4[%c0_4, %c0_5] : memref<512x512xbf16, #tpu.memory_space<vmem>>, vector<512x512xbf16>
    %cst = arith.constant dense<0.000000e+00> : vector<8x512xf32>
    %6 = tpu.matmul %4, %5, %cst {dimension_numbers = #tpu.dot_dimension_numbers<[1], [0], [0], [1], [0, 0, 1, 1], [], []>} : vector<8x512xbf16>, vector<512x512xbf16>, vector<8x512xf32> -> vector<8x512xf32>
    %7 = arith.addf %3, %6 : vector<8x512xf32>
    %c0_6 = arith.constant 0 : index
    %c0_7 = arith.constant 0 : index
    %8 = vector.load %arg8[%c0_6, %c0_7] : memref<8x512xf32, #tpu.memory_space<vmem>>, vector<8x512xf32>
    tpu.vector_store %arg8[%c0_6, %c0_7], %7 {strides = array<i32>} : memref<8x512xf32, #tpu.memory_space<vmem>>, vector<8x512xf32>,
    %c7_i32 = arith.constant 7 : i32
    %9 = arith.cmpi eq, %arg2, %c7_i32 : i32
    %10 = arith.extui %9 : i1 to i32
    %c0_i32_8 = arith.constant 0 : i32
    %11 = arith.cmpi ne, %10, %c0_i32_8 : i32
    scf.if %11 {
      %c0_9 = arith.constant 0 : index
      %c0_10 = arith.constant 0 : index
      %12 = vector.load %arg8[%c0_9, %c0_10] : memref<8x512xf32, #tpu.memory_space<vmem>>, vector<8x512xf32>
      %c0_11 = arith.constant 0 : index
      %c0_12 = arith.constant 0 : index
      %13 = vector.load %arg5[%c0_11, %c0_12] : memref<1x512xf32, #tpu.memory_space<vmem>>, vector<1x512xf32>
      %14 = vector.broadcast %13 : vector<1x512xf32> to vector<8x512xf32>
      %15 = arith.mulf %12, %14 : vector<8x512xf32>
      %c0_13 = arith.constant 0 : index
      %c0_14 = arith.constant 0 : index
      %16 = vector.load %arg6[%c0_13, %c0_14] : memref<1x512xf32, #tpu.memory_space<vmem>>, vector<1x512xf32>
      %17 = vector.broadcast %16 : vector<1x512xf32> to vector<8x512xf32>
      %18 = arith.addf %15, %17 : vector<8x512xf32>
      %cst_15 = arith.constant 0.000000e+00 : f32
      %19 = vector.broadcast %cst_15 : f32 to vector<8x512xf32>
      %20 = arith.maximumf %18, %19 : vector<8x512xf32>
      %c0_16 = arith.constant 0 : index
      %c0_17 = arith.constant 0 : index
      %21 = vector.load %arg7[%c0_16, %c0_17] : memref<8x512xf32, #tpu.memory_space<vmem>>, vector<8x512xf32>
      tpu.vector_store %arg7[%c0_16, %c0_17], %20 {strides = array<i32>} : memref<8x512xf32, #tpu.memory_space<vmem>>, vector<8x512xf32>,
    } else {
    }
    return
  }
  func.func @transform_0(%arg0: i32, %arg1: i32, %arg2: i32) -> (i32, i32) {
    %c0_i32 = arith.constant 0 : i32
    return %arg0, %arg2 : i32, i32
  }
  func.func @transform_1(%arg0: i32, %arg1: i32, %arg2: i32) -> (i32, i32) {
    %c0_i32 = arith.constant 0 : i32
    return %arg2, %arg1 : i32, i32
  }
  func.func @transform_2(%arg0: i32, %arg1: i32, %arg2: i32) -> (i32, i32) {
    %c0_i32 = arith.constant 0 : i32
    %c0_i32_0 = arith.constant 0 : i32
    return %c0_i32, %arg1 : i32, i32
  }
  func.func @transform_3(%arg0: i32, %arg1: i32, %arg2: i32) -> (i32, i32) {
    %c0_i32 = arith.constant 0 : i32
    %c0_i32_0 = arith.constant 0 : i32
    return %c0_i32, %arg1 : i32, i32
  }
  func.func @transform_4(%arg0: i32, %arg1: i32, %arg2: i32) -> (i32, i32) {
    %c0_i32 = arith.constant 0 : i32
    return %arg0, %arg1 : i32, i32
  }
}

module attributes {stable_mosaic.version = 11 : i64} {
  func.func @_max_kernel(%arg0: memref<2x1024xf32, #tpu.memory_space<vmem>>, %arg1: memref<2x1024xf32, #tpu.memory_space<vmem>>, %arg2: memref<2x1024xf32, #tpu.memory_space<vmem>>) attributes {dimension_semantics = [], scalar_prefetch = 0 : i64, scratch_operands = 0 : i64, tpu.core_type = #tpu.core_type<tc>} {
    %c0 = arith.constant 0 : index
    %c0_0 = arith.constant 0 : index
    %0 = vector.load %arg0[%c0, %c0_0] : memref<2x1024xf32, #tpu.memory_space<vmem>>, vector<2x1024xf32>
    %c0_1 = arith.constant 0 : index
    %c0_2 = arith.constant 0 : index
    %1 = vector.load %arg1[%c0_1, %c0_2] : memref<2x1024xf32, #tpu.memory_space<vmem>>, vector<2x1024xf32>
    %2 = arith.maximumf %0, %1 : vector<2x1024xf32>
    %c0_3 = arith.constant 0 : index
    %c0_4 = arith.constant 0 : index
    %3 = vector.load %arg2[%c0_3, %c0_4] : memref<2x1024xf32, #tpu.memory_space<vmem>>, vector<2x1024xf32>
    tpu.vector_store %arg2[%c0_3, %c0_4], %2 {strides = array<i32>} : memref<2x1024xf32, #tpu.memory_space<vmem>>, vector<2x1024xf32>,
    return
  }
}

</mosaic_0001>

<bundles_post_ra>
// kernel: ifcnn_forward.21
= control target key start
LH: loop header
LB: loop body
LE: loop exit
PB: predicated region body
PF: predicated region fallthrough
CT: control target
= control target key end

     0   :  { %s1524_s15 = smov 0   ;;  %s1526_s16 = smov 0   ;;  %s1754_s0 = inlined_call_operand.vmem [shape: bf16[2048,256], index: 0, kind: input, shape index: {}]   ;;  %s1755_s1 = inlined_call_operand.vmem [shape: bf16[256,128], index: 1, kind: input, shape index: {}]   ;;  %s1756_s2 = inlined_call_operand.vmem [shape: f32[1,128], index: 2, kind: input, shape index: {}]   ;;  %s1757_s3 = inlined_call_operand.vmem [shape: f32[1,128], index: 3, kind: input, shape index: {}]   ;;  %s1758_s4 = inlined_call_operand.vmem [shape: f32[2048,128], index: 4, kind: output, shape index: {}]  }
   0x1   :  { %s1528_s17 = smov 0  }
   0x2 LB: > { %s33_s18 = sadd.s32 1, %s1493_s16  ;;  %p1200_p0 = scmp.ge.s32.totalorder %s1497_s17, 1  ;;  %s1497_s17 = sphi %s1528_s17, %s14_s17   ;;  %s1493_s16 = sphi %s1526_s16, %s1760_s16   ;;  %s1489_s15 = sphi %s1524_s15, %s1759_s15  }
   0x3   : > { %p35_p1 = scmp.ge.s32.totalorder %s33_s18, 8  ;;  %p224_p2 = scmp.lt.s32.totalorder %s1497_s17, 9 }
   0x5   : > { %s1762_s18 = smov (%p35_p1, %s33_s18), 0  ;;  %p225_p3 = pnand %p1200_p0, %p224_p2 }
   0x6   : > { %s1201_s21 = sshll.u32 (!%p225_p3), %s1489_s15, 5 }
   0x7   : > { %228 = sbr.rel (%p225_p3) target bundleno = 307 (0x133), region = 36  ;;  %p274_p4 = scmp.lt.s32.totalorder (!%p225_p3), %s1201_s21, 255 }
   0xc   : > { %v1411_v0 = vld [vmem:[%s1755_s1 + $0x78] sm:$0xff]   ;;  %v1413_v2 = vld [vmem:[%s1755_s1 + $0x70] sm:$0xff]   ;;  %v1415_v4 = vld [vmem:[%s1755_s1 + $0x68] sm:$0xff]   ;;  %s1764_s21 = smov (!%p274_p4, %s1201_s21), 255 }
   0xd   : > { %v1412_v1 = vld [vmem:[%s1755_s1 + $0x38] sm:$0xff]   ;;  %1259 = vmatprep.subr.bf16.mxu0 %v1411_v0  ;;  %1371 = vmatprep.subr.bf16.mxu1 %v1411_v0  ;;  %v1414_v3 = vld [vmem:[%s1755_s1 + $0x30] sm:$0xff]   ;;  %v1416_v5 = vld [vmem:[%s1755_s1 + $0x28] sm:$0xff]   ;;  %s1258_s10 = sshll.u32 %s1764_s21, 3 }
   0xe   : > { %1260 = vmatpush3.bf16.msra.mxu0 %v1412_v1  ;;  %1379 = vmatpush3.bf16.msra.mxu1 %v1412_v1  ;;  %v1417_v6 = vld [vmem:[%s1755_s1 + $0x60] sm:$0xff]   ;;  %v1419_v8 = vld [vmem:[%s1755_s1 + $0x58] sm:$0xff]   ;;  %s1577_s15 = scalar_lea.vmem %s1754_s0, %s1258_s10  ;;  %v1421_v10 = vld [vmem:[%s1755_s1 + $0x50] sm:$0xff]  }
   0xf   : > { %1261 = vmatprep.subr.bf16.mxu0 %v1413_v2  ;;  %1372 = vmatprep.subr.bf16.mxu1 %v1413_v2  ;;  %v1418_v7 = vld [vmem:[%s1755_s1 + $0x20] sm:$0xff]   ;;  %v1420_v9 = vld [vmem:[%s1755_s1 + $0x18] sm:$0xff]   ;;  %v1422_v13 = vld [vmem:[%s1755_s1 + $0x10] sm:$0xff]  }
  0x10   : > { %v1429_v11 = vld [vmem:[%s1577_s15 + $0x4] ss:$8 sps:$4 sm:$0xff]   ;;  %v1427_v18 = vld [vmem:[%s1577_s15] ss:$8 sps:$4 sm:$0xff]   ;;  %v1433_v20 = vld [vmem:[%s1577_s15 + $0x14] ss:$8 sps:$4 sm:$0xff]  }
  0x11   : > { %v1432_v12 = vld [vmem:[%s1577_s15 + $0x84] ss:$8 sps:$4 sm:$0xff]   ;;  %729 = vmatprep.mubr.bf16.mxu0 %v1429_v11  ;;  %v1430_v19 = vld [vmem:[%s1577_s15 + $0x80] ss:$8 sps:$4 sm:$0xff]   ;;  %v1435_v21 = vld [vmem:[%s1577_s15 + $0x94] ss:$8 sps:$4 sm:$0xff]  }
  0x12   : > { %1262 = vmatpush3.bf16.msra.mxu0 %v1414_v3  ;;  %1380 = vmatpush3.bf16.msra.mxu1 %v1414_v3  ;;  %v1423_v14 = vld [vmem:[%s1755_s1 + $0x48] sm:$0xff]   ;;  %v1425_v16 = vld [vmem:[%s1755_s1 + $0x40] sm:$0xff]   ;;  %v1437_v22 = vld [vmem:[%s1577_s15 + $0x10] ss:$8 sps:$4 sm:$0xff]  }
  0x13   : > { %1263 = vmatprep.subr.bf16.mxu0 %v1415_v4  ;;  %1373 = vmatprep.subr.bf16.mxu1 %v1415_v4  ;;  %v1424_v15 = vld [vmem:[%s1755_s1 + $0x8] sm:$0xff]   ;;  %v1426_v17 = vld [vmem:[%s1755_s1] sm:$0xff]   ;;  %v1438_v23 = vld [vmem:[%s1577_s15 + $0x90] ss:$8 sps:$4 sm:$0xff]  }
  0x14   : > { %793 = vmatprep.mubr.bf16.mxu1 %v1432_v12  ;;  %v1439_v24 = vld [vmem:[%s1577_s15 + $0x24] ss:$8 sps:$4 sm:$0xff]   ;;  %v1443_v26 = vld [vmem:[%s1577_s15 + $0x20] ss:$8 sps:$4 sm:$0xff]   ;;  %v1445_v28 = vld [vmem:[%s1577_s15 + $0x34] ss:$8 sps:$4 sm:$0xff]  }
  0x15   : > { %v1441_v25 = vld [vmem:[%s1577_s15 + $0xa4] ss:$8 sps:$4 sm:$0xff]   ;;  %v1444_v27 = vld [vmem:[%s1577_s15 + $0xa0] ss:$8 sps:$4 sm:$0xff]   ;;  %v1447_v29 = vld [vmem:[%s1577_s15 + $0xb4] ss:$8 sps:$4 sm:$0xff]  }
  0x16   : > { %1264 = vmatpush3.bf16.msra.mxu0 %v1416_v5  ;;  %1381 = vmatpush3.bf16.msra.mxu1 %v1416_v5  ;;  %v1449_v30 = vld [vmem:[%s1577_s15 + $0x30] ss:$8 sps:$4 sm:$0xff]   ;;  %v1451_v32 = vld [vmem:[%s1577_s15 + $0x44] ss:$8 sps:$4 sm:$0xff]   ;;  %v1455_v34 = vld [vmem:[%s1577_s15 + $0x40] ss:$8 sps:$4 sm:$0xff]  }
  0x17   : > { %1265 = vmatprep.subr.bf16.mxu0 %v1417_v6  ;;  %1374 = vmatprep.subr.bf16.mxu1 %v1417_v6  ;;  %v1450_v31 = vld [vmem:[%s1577_s15 + $0xb0] ss:$8 sps:$4 sm:$0xff]   ;;  %v1453_v33 = vld [vmem:[%s1577_s15 + $0xc4] ss:$8 sps:$4 sm:$0xff]   ;;  %v1456_v35 = vld [vmem:[%s1577_s15 + $0xc0] ss:$8 sps:$4 sm:$0xff]  }
  0x18   : > { %v1457_v36 = vld [vmem:[%s1577_s15 + $0x54] ss:$8 sps:$4 sm:$0xff]   ;;  %v1461_v38 = vld [vmem:[%s1577_s15 + $0x50] ss:$8 sps:$4 sm:$0xff]   ;;  %v1463_v40 = vld [vmem:[%s1577_s15 + $0x64] ss:$8 sps:$4 sm:$0xff]  }
  0x19   : > { %v1459_v37 = vld [vmem:[%s1577_s15 + $0xd4] ss:$8 sps:$4 sm:$0xff]   ;;  %v1462_v39 = vld [vmem:[%s1577_s15 + $0xd0] ss:$8 sps:$4 sm:$0xff]   ;;  %v1465_v41 = vld [vmem:[%s1577_s15 + $0xe4] ss:$8 sps:$4 sm:$0xff]  }
  0x1a   : > { %1266 = vmatpush3.bf16.msra.mxu0 %v1418_v7  ;;  %1382 = vmatpush3.bf16.msra.mxu1 %v1418_v7  ;;  %v1467_v42 = vld [vmem:[%s1577_s15 + $0x60] ss:$8 sps:$4 sm:$0xff]   ;;  %v1469_v44 = vld [vmem:[%s1577_s15 + $0x74] ss:$8 sps:$4 sm:$0xff]   ;;  %v1473_v46 = vld [vmem:[%s1577_s15 + $0x70] ss:$8 sps:$4 sm:$0xff]  }
  0x1b   : > { %1267 = vmatprep.subr.bf16.mxu0 %v1419_v8  ;;  %1375 = vmatprep.subr.bf16.mxu1 %v1419_v8  ;;  %v1468_v43 = vld [vmem:[%s1577_s15 + $0xe0] ss:$8 sps:$4 sm:$0xff]   ;;  %v1471_v45 = vld [vmem:[%s1577_s15 + $0xf4] ss:$8 sps:$4 sm:$0xff]   ;;  %v1474_v47 = vld [vmem:[%s1577_s15 + $0xf0] ss:$8 sps:$4 sm:$0xff]   ;;  %s1649_s15 = scalar_lea.vmem %s1758_s4, %s1258_s10 }
  0x1c   : > { %v1635_v51 = vld [vmem:[%s1756_s2] ss:$0 sm:$0xff] }
  0x1d   : > { %v1640_v55 = vld [vmem:[%s1757_s3] ss:$0 sm:$0xff] }
  0x1e   : > { %1268 = vmatpush3.bf16.msra.mxu0 %v1420_v9  ;;  %1383 = vmatpush3.bf16.msra.mxu1 %v1420_v9 }
  0x1f   : > { %1269 = vmatprep.subr.bf16.mxu0 %v1421_v10  ;;  %1376 = vmatprep.subr.bf16.mxu1 %v1421_v10 }
  0x22   : > { %1270 = vmatpush3.bf16.msra.mxu0 %v1422_v13  ;;  %1384 = vmatpush3.bf16.msra.mxu1 %v1422_v13 }
  0x23   : > { %1271 = vmatprep.subr.bf16.mxu0 %v1423_v14  ;;  %1377 = vmatprep.subr.bf16.mxu1 %v1423_v14 }
  0x26   : > { %1272 = vmatpush3.bf16.msra.mxu0 %v1424_v15  ;;  %1385 = vmatpush3.bf16.msra.mxu1 %v1424_v15 }
  0x27   : > { %1273 = vmatprep.subr.bf16.mxu0 %v1425_v16  ;;  %1378 = vmatprep.subr.bf16.mxu1 %v1425_v16 }
  0x2a   : > { %1274 = vmatpush3.bf16.msra.mxu0 %v1426_v17  ;;  %1386 = vmatpush3.bf16.msra.mxu1 %v1426_v17 }
  0x2d   : > { %730 = vmatmul.mubr.bf16.vlgmr.msra.gmra.mxu0 %v1427_v18  ;;  %794 = vmatmul.mubr.bf16.vlgmr.msra.gmra.mxu1 %v1430_v19 }
  0x2e   : > { %737 = vmatprep.mubr.bf16.mxu0 %v1433_v20  ;;  %801 = vmatprep.mubr.bf16.mxu1 %v1435_v21 }
  0x35   : > { %738 = vmatmul.mubr.bf16.gmra.mxu0 %v1437_v22  ;;  %802 = vmatmul.mubr.bf16.gmra.mxu1 %v1438_v23 }
  0x36   : > { %745 = vmatprep.mubr.bf16.mxu0 %v1439_v24  ;;  %809 = vmatprep.mubr.bf16.mxu1 %v1441_v25 }
  0x3d   : > { %746 = vmatmul.mubr.bf16.gmra.mxu0 %v1443_v26  ;;  %810 = vmatmul.mubr.bf16.gmra.mxu1 %v1444_v27 }
  0x3e   : > { %753 = vmatprep.mubr.bf16.mxu0 %v1445_v28  ;;  %817 = vmatprep.mubr.bf16.mxu1 %v1447_v29 }
  0x45   : > { %754 = vmatmul.mubr.bf16.gmra.mxu0 %v1449_v30  ;;  %818 = vmatmul.mubr.bf16.gmra.mxu1 %v1450_v31 }
  0x46   : > { %761 = vmatprep.mubr.bf16.mxu0 %v1451_v32  ;;  %825 = vmatprep.mubr.bf16.mxu1 %v1453_v33 }
  0x4d   : > { %762 = vmatmul.mubr.bf16.gmra.mxu0 %v1455_v34  ;;  %826 = vmatmul.mubr.bf16.gmra.mxu1 %v1456_v35 }
  0x4e   : > { %769 = vmatprep.mubr.bf16.mxu0 %v1457_v36  ;;  %833 = vmatprep.mubr.bf16.mxu1 %v1459_v37 }
  0x55   : > { %770 = vmatmul.mubr.bf16.gmra.mxu0 %v1461_v38  ;;  %834 = vmatmul.mubr.bf16.gmra.mxu1 %v1462_v39 }
  0x56   : > { %777 = vmatprep.mubr.bf16.mxu0 %v1463_v40  ;;  %841 = vmatprep.mubr.bf16.mxu1 %v1465_v41 }
  0x5d   : > { %778 = vmatmul.mubr.bf16.gmra.mxu0 %v1467_v42  ;;  %842 = vmatmul.mubr.bf16.gmra.mxu1 %v1468_v43 }
  0x5e   : > { %785 = vmatprep.mubr.bf16.mxu0 %v1469_v44  ;;  %849 = vmatprep.mubr.bf16.mxu1 %v1471_v45 }
  0x65   : > { %786 = vmatmul.mubr.bf16.gmra.mxu0 %v1473_v46  ;;  %850 = vmatmul.mubr.bf16.gmra.mxu1 %v1474_v47 }
  0xed   : > { %v1275_v48 = vpop.f32.mrf.mxu0  ;;  %v1323_v49 = vpop.f32.mrf.mxu1 }
  0xef   : > { %v1276_v50 = vpop.f32.mrf.mxu0  ;;  %v1324_v52 = vpop.f32.mrf.mxu1 }
  0xf0   : > { %v1277_v53 = vadd.f32 %v1276_v50, %v1275_v48  ;;  %v1325_v54 = vadd.f32 %v1324_v52, %v1323_v49 }
  0xf1   : > { %v1278_v56 = vpop.f32.mrf.mxu0  ;;  %v1326_v57 = vpop.f32.mrf.mxu1 }
  0xf2   : > { %v964_v58 = vmul.f32 %v1277_v53, %v1635_v51  ;;  %v980_v59 = vmul.f32 %v1325_v54, %v1635_v51 }
  0xf3   : > { %v1279_v60 = vpop.f32.mrf.mxu0  ;;  %v1327_v61 = vpop.f32.mrf.mxu1 }
  0xf4   : > { %v1003_v62 = vadd.f32 %v1640_v55, %v964_v58  ;;  %v1019_v63 = vadd.f32 %v1640_v55, %v980_v59  ;;  %v1280_v0 = vadd.f32 %v1279_v60, %v1278_v56  ;;  %v1328_v1 = vadd.f32 %v1327_v61, %v1326_v57 }
  0xf5   : > { %v1281_v2 = vpop.f32.mrf.mxu0  ;;  %v1329_v3 = vpop.f32.mrf.mxu1 }
  0xf6   : > { %1035 = vst [vmem:[%s1649_s15] sm:$0xff] %v1003_v62  ;;  %1051 = vst [vmem:[%s1649_s15 + $0x80] sm:$0xff] %v1019_v63  ;;  %v965_v4 = vmul.f32 %v1280_v0, %v1635_v51  ;;  %v981_v5 = vmul.f32 %v1328_v1, %v1635_v51 }
  0xf7   : > { %v1282_v6 = vpop.f32.mrf.mxu0  ;;  %v1330_v7 = vpop.f32.mrf.mxu1 }
  0xf8   : > { %v1004_v8 = vadd.f32 %v1640_v55, %v965_v4  ;;  %v1020_v9 = vadd.f32 %v1640_v55, %v981_v5  ;;  %v1283_v10 = vadd.f32 %v1282_v6, %v1281_v2  ;;  %v1331_v11 = vadd.f32 %v1330_v7, %v1329_v3 }
  0xf9   : > { %v1284_v12 = vpop.f32.mrf.mxu0  ;;  %v1332_v13 = vpop.f32.mrf.mxu1 }
  0xfa   : > { %1036 = vst [vmem:[%s1649_s15 + $0x8] sm:$0xff] %v1004_v8  ;;  %1052 = vst [vmem:[%s1649_s15 + $0x88] sm:$0xff] %v1020_v9  ;;  %v966_v14 = vmul.f32 %v1283_v10, %v1635_v51  ;;  %v982_v15 = vmul.f32 %v1331_v11, %v1635_v51 }
  0xfb   : > { %v1285_v16 = vpop.f32.mrf.mxu0  ;;  %v1333_v17 = vpop.f32.mrf.mxu1 }
  0xfc   : > { %v1005_v18 = vadd.f32 %v1640_v55, %v966_v14  ;;  %v1021_v19 = vadd.f32 %v1640_v55, %v982_v15  ;;  %v1286_v20 = vadd.f32 %v1285_v16, %v1284_v12  ;;  %v1334_v21 = vadd.f32 %v1333_v17, %v1332_v13 }
  0xfd   : > { %v1287_v22 = vpop.f32.mrf.mxu0  ;;  %v1335_v23 = vpop.f32.mrf.mxu1 }
  0xfe   : > { %1037 = vst [vmem:[%s1649_s15 + $0x10] sm:$0xff] %v1005_v18  ;;  %1053 = vst [vmem:[%s1649_s15 + $0x90] sm:$0xff] %v1021_v19  ;;  %v967_v24 = vmul.f32 %v1286_v20, %v1635_v51  ;;  %v983_v25 = vmul.f32 %v1334_v21, %v1635_v51 }
  0xff   : > { %v1288_v26 = vpop.f32.mrf.mxu0  ;;  %v1336_v27 = vpop.f32.mrf.mxu1 }
 0x100   : > { %v1006_v28 = vadd.f32 %v1640_v55, %v967_v24  ;;  %v1022_v29 = vadd.f32 %v1640_v55, %v983_v25  ;;  %v1289_v30 = vadd.f32 %v1288_v26, %v1287_v22  ;;  %v1337_v31 = vadd.f32 %v1336_v27, %v1335_v23 }
 0x101   : > { %v1290_v32 = vpop.f32.mrf.mxu0  ;;  %v1338_v33 = vpop.f32.mrf.mxu1 }
 0x102   : > { %1038 = vst [vmem:[%s1649_s15 + $0x18] sm:$0xff] %v1006_v28  ;;  %1054 = vst [vmem:[%s1649_s15 + $0x98] sm:$0xff] %v1022_v29  ;;  %v968_v34 = vmul.f32 %v1289_v30, %v1635_v51  ;;  %v984_v35 = vmul.f32 %v1337_v31, %v1635_v51 }
 0x103   : > { %v1291_v36 = vpop.f32.mrf.mxu0  ;;  %v1339_v37 = vpop.f32.mrf.mxu1 }
 0x104   : > { %v1007_v38 = vadd.f32 %v1640_v55, %v968_v34  ;;  %v1023_v39 = vadd.f32 %v1640_v55, %v984_v35  ;;  %v1292_v40 = vadd.f32 %v1291_v36, %v1290_v32  ;;  %v1340_v41 = vadd.f32 %v1339_v37, %v1338_v33 }
 0x105   : > { %v1293_v42 = vpop.f32.mrf.mxu0  ;;  %v1341_v43 = vpop.f32.mrf.mxu1 }
 0x106   : > { %1039 = vst [vmem:[%s1649_s15 + $0x20] sm:$0xff] %v1007_v38  ;;  %1055 = vst [vmem:[%s1649_s15 + $0xa0] sm:$0xff] %v1023_v39  ;;  %v969_v44 = vmul.f32 %v1292_v40, %v1635_v51  ;;  %v985_v45 = vmul.f32 %v1340_v41, %v1635_v51 }
 0x107   : > { %v1294_v46 = vpop.f32.mrf.mxu0  ;;  %v1342_v47 = vpop.f32.mrf.mxu1 }
 0x108   : > { %v1008_v48 = vadd.f32 %v1640_v55, %v969_v44  ;;  %v1024_v49 = vadd.f32 %v1640_v55, %v985_v45  ;;  %v1295_v50 = vadd.f32 %v1294_v46, %v1293_v42  ;;  %v1343_v52 = vadd.f32 %v1342_v47, %v1341_v43 }
 0x109   : > { %v1296_v53 = vpop.f32.mrf.mxu0  ;;  %v1344_v54 = vpop.f32.mrf.mxu1 }
 0x10a   : > { %1040 = vst [vmem:[%s1649_s15 + $0x28] sm:$0xff] %v1008_v48  ;;  %1056 = vst [vmem:[%s1649_s15 + $0xa8] sm:$0xff] %v1024_v49  ;;  %v970_v56 = vmul.f32 %v1295_v50, %v1635_v51  ;;  %v986_v57 = vmul.f32 %v1343_v52, %v1635_v51 }
 0x10b   : > { %v1297_v58 = vpop.f32.mrf.mxu0  ;;  %v1345_v59 = vpop.f32.mrf.mxu1 }
 0x10c   : > { %v1009_v60 = vadd.f32 %v1640_v55, %v970_v56  ;;  %v1025_v61 = vadd.f32 %v1640_v55, %v986_v57  ;;  %v1298_v62 = vadd.f32 %v1297_v58, %v1296_v53  ;;  %v1346_v63 = vadd.f32 %v1345_v59, %v1344_v54 }
 0x10d   : > { %v1299_v0 = vpop.f32.mrf.mxu0  ;;  %v1347_v1 = vpop.f32.mrf.mxu1 }
 0x10e   : > { %1041 = vst [vmem:[%s1649_s15 + $0x30] sm:$0xff] %v1009_v60  ;;  %1057 = vst [vmem:[%s1649_s15 + $0xb0] sm:$0xff] %v1025_v61  ;;  %v971_v2 = vmul.f32 %v1298_v62, %v1635_v51  ;;  %v987_v3 = vmul.f32 %v1346_v63, %v1635_v51 }
 0x10f   : > { %v1300_v4 = vpop.f32.mrf.mxu0  ;;  %v1348_v5 = vpop.f32.mrf.mxu1 }
 0x110   : > { %v1010_v6 = vadd.f32 %v1640_v55, %v971_v2  ;;  %v1026_v7 = vadd.f32 %v1640_v55, %v987_v3  ;;  %v1301_v8 = vadd.f32 %v1300_v4, %v1299_v0  ;;  %v1349_v9 = vadd.f32 %v1348_v5, %v1347_v1 }
 0x111   : > { %v1302_v10 = vpop.f32.mrf.mxu0  ;;  %v1350_v11 = vpop.f32.mrf.mxu1 }
 0x112   : > { %1042 = vst [vmem:[%s1649_s15 + $0x38] sm:$0xff] %v1010_v6  ;;  %1058 = vst [vmem:[%s1649_s15 + $0xb8] sm:$0xff] %v1026_v7  ;;  %v972_v12 = vmul.f32 %v1301_v8, %v1635_v51  ;;  %v988_v13 = vmul.f32 %v1349_v9, %v1635_v51 }
 0x113   : > { %v1303_v14 = vpop.f32.mrf.mxu0  ;;  %v1351_v15 = vpop.f32.mrf.mxu1 }
 0x114   : > { %v1011_v16 = vadd.f32 %v1640_v55, %v972_v12  ;;  %v1027_v17 = vadd.f32 %v1640_v55, %v988_v13  ;;  %v1304_v18 = vadd.f32 %v1303_v14, %v1302_v10  ;;  %v1352_v19 = vadd.f32 %v1351_v15, %v1350_v11 }
 0x115   : > { %v1305_v20 = vpop.f32.mrf.mxu0  ;;  %v1353_v21 = vpop.f32.mrf.mxu1 }
 0x116   : > { %1043 = vst [vmem:[%s1649_s15 + $0x40] sm:$0xff] %v1011_v16  ;;  %1059 = vst [vmem:[%s1649_s15 + $0xc0] sm:$0xff] %v1027_v17  ;;  %v973_v22 = vmul.f32 %v1304_v18, %v1635_v51  ;;  %v989_v23 = vmul.f32 %v1352_v19, %v1635_v51 }
 0x117   : > { %v1306_v24 = vpop.f32.mrf.mxu0  ;;  %v1354_v25 = vpop.f32.mrf.mxu1 }
 0x118   : > { %v1012_v26 = vadd.f32 %v1640_v55, %v973_v22  ;;  %v1028_v27 = vadd.f32 %v1640_v55, %v989_v23  ;;  %v1307_v28 = vadd.f32 %v1306_v24, %v1305_v20  ;;  %v1355_v29 = vadd.f32 %v1354_v25, %v1353_v21 }
 0x119   : > { %v1308_v30 = vpop.f32.mrf.mxu0  ;;  %v1356_v31 = vpop.f32.mrf.mxu1 }
 0x11a   : > { %1044 = vst [vmem:[%s1649_s15 + $0x48] sm:$0xff] %v1012_v26  ;;  %1060 = vst [vmem:[%s1649_s15 + $0xc8] sm:$0xff] %v1028_v27  ;;  %v974_v32 = vmul.f32 %v1307_v28, %v1635_v51  ;;  %v990_v33 = vmul.f32 %v1355_v29, %v1635_v51 }
 0x11b   : > { %v1309_v34 = vpop.f32.mrf.mxu0  ;;  %v1357_v35 = vpop.f32.mrf.mxu1 }
 0x11c   : > { %v1013_v36 = vadd.f32 %v1640_v55, %v974_v32  ;;  %v1029_v37 = vadd.f32 %v1640_v55, %v990_v33  ;;  %v1310_v38 = vadd.f32 %v1309_v34, %v1308_v30  ;;  %v1358_v39 = vadd.f32 %v1357_v35, %v1356_v31 }
 0x11d   : > { %v1311_v40 = vpop.f32.mrf.mxu0  ;;  %v1359_v41 = vpop.f32.mrf.mxu1 }
 0x11e   : > { %1045 = vst [vmem:[%s1649_s15 + $0x50] sm:$0xff] %v1013_v36  ;;  %1061 = vst [vmem:[%s1649_s15 + $0xd0] sm:$0xff] %v1029_v37  ;;  %v975_v42 = vmul.f32 %v1310_v38, %v1635_v51  ;;  %v991_v43 = vmul.f32 %v1358_v39, %v1635_v51 }
 0x11f   : > { %v1312_v44 = vpop.f32.mrf.mxu0  ;;  %v1360_v45 = vpop.f32.mrf.mxu1 }
 0x120   : > { %v1014_v46 = vadd.f32 %v1640_v55, %v975_v42  ;;  %v1030_v47 = vadd.f32 %v1640_v55, %v991_v43  ;;  %v1313_v48 = vadd.f32 %v1312_v44, %v1311_v40  ;;  %v1361_v49 = vadd.f32 %v1360_v45, %v1359_v41 }
 0x121   : > { %v1314_v50 = vpop.f32.mrf.mxu0  ;;  %v1362_v52 = vpop.f32.mrf.mxu1 }
 0x122   : > { %1046 = vst [vmem:[%s1649_s15 + $0x58] sm:$0xff] %v1014_v46  ;;  %1062 = vst [vmem:[%s1649_s15 + $0xd8] sm:$0xff] %v1030_v47  ;;  %v976_v53 = vmul.f32 %v1313_v48, %v1635_v51  ;;  %v992_v54 = vmul.f32 %v1361_v49, %v1635_v51 }
 0x123   : > { %v1315_v56 = vpop.f32.mrf.mxu0  ;;  %v1363_v57 = vpop.f32.mrf.mxu1 }
 0x124   : > { %v1015_v58 = vadd.f32 %v1640_v55, %v976_v53  ;;  %v1031_v59 = vadd.f32 %v1640_v55, %v992_v54  ;;  %v1316_v60 = vadd.f32 %v1315_v56, %v1314_v50  ;;  %v1364_v61 = vadd.f32 %v1363_v57, %v1362_v52 }
 0x125   : > { %v1317_v62 = vpop.f32.mrf.mxu0  ;;  %v1365_v63 = vpop.f32.mrf.mxu1 }
 0x126   : > { %1047 = vst [vmem:[%s1649_s15 + $0x60] sm:$0xff] %v1015_v58  ;;  %1063 = vst [vmem:[%s1649_s15 + $0xe0] sm:$0xff] %v1031_v59  ;;  %v977_v0 = vmul.f32 %v1316_v60, %v1635_v51  ;;  %v993_v1 = vmul.f32 %v1364_v61, %v1635_v51 }
 0x127   : > { %v1318_v2 = vpop.f32.mrf.mxu0  ;;  %v1366_v3 = vpop.f32.mrf.mxu1 }
 0x128   : > { %v1016_v4 = vadd.f32 %v1640_v55, %v977_v0  ;;  %v1032_v5 = vadd.f32 %v1640_v55, %v993_v1  ;;  %v1319_v6 = vadd.f32 %v1318_v2, %v1317_v62  ;;  %v1367_v7 = vadd.f32 %v1366_v3, %v1365_v63 }
 0x129   : > { %v1320_v8 = vpop.f32.mrf.mxu0  ;;  %v1368_v9 = vpop.f32.mrf.mxu1 }
 0x12a   : > { %1048 = vst [vmem:[%s1649_s15 + $0x68] sm:$0xff] %v1016_v4  ;;  %1064 = vst [vmem:[%s1649_s15 + $0xe8] sm:$0xff] %v1032_v5  ;;  %v978_v10 = vmul.f32 %v1319_v6, %v1635_v51  ;;  %v994_v11 = vmul.f32 %v1367_v7, %v1635_v51 }
 0x12b   : > { %v1321_v12 = vpop.f32.mrf.mxu0  ;;  %v1369_v13 = vpop.f32.mrf.mxu1 }
 0x12c   : > { %v1017_v14 = vadd.f32 %v1640_v55, %v978_v10  ;;  %v1033_v15 = vadd.f32 %v1640_v55, %v994_v11  ;;  %v1322_v16 = vadd.f32 %v1321_v12, %v1320_v8  ;;  %v1370_v17 = vadd.f32 %v1369_v13, %v1368_v9 }
 0x12e   : > { %1049 = vst [vmem:[%s1649_s15 + $0x70] sm:$0xff] %v1017_v14  ;;  %1065 = vst [vmem:[%s1649_s15 + $0xf0] sm:$0xff] %v1033_v15  ;;  %v979_v18 = vmul.f32 %v1322_v16, %v1635_v51  ;;  %v995_v19 = vmul.f32 %v1370_v17, %v1635_v51 }
 0x130   : > { %v1018_v20 = vadd.f32 %v1640_v55, %v979_v18  ;;  %v1034_v21 = vadd.f32 %v1640_v55, %v995_v19 }
 0x132   : > { %1050 = vst [vmem:[%s1649_s15 + $0x78] sm:$0xff] %v1018_v20  ;;  %1066 = vst [vmem:[%s1649_s15 + $0xf8] sm:$0xff] %v1034_v21 }
 0x133 PF: > { %s14_s17 = sadd.s32 1, %s1497_s17   ;;  %s1759_s15 = smov %s1493_s16 }
 0x134   : > { %p11_p5 = scmp.ge.s32.totalorder %s14_s17, 10   ;;  %s1760_s16 = smov %s1762_s18 }
 0x136   :  { %13 = sbr.rel (!%p11_p5) target bundleno = 2 (0x2), region = 83 }

// kernel: ifcnn_forward.23
= control target key start
LH: loop header
LB: loop body
LE: loop exit
PB: predicated region body
PF: predicated region fallthrough
CT: control target
= control target key end

     0   :  { %s2453_s15 = smov 0   ;;  %s2455_s16 = smov 0   ;;  %s2887_s0 = inlined_call_operand.vmem [shape: bf16[512,3584], index: 0, kind: input, shape index: {}]   ;;  %s2888_s1 = inlined_call_operand.vmem [shape: bf16[3584,128], index: 1, kind: input, shape index: {}]   ;;  %s2889_s2 = inlined_call_operand.vmem [shape: f32[1,128], index: 2, kind: input, shape index: {}]   ;;  %s2890_s3 = inlined_call_operand.vmem [shape: f32[1,128], index: 3, kind: input, shape index: {}]   ;;  %s2891_s4 = inlined_call_operand.vmem [shape: f32[512,128], index: 4, kind: output, shape index: {}]  }
   0x1   :  { %s2457_s17 = smov 0   ;;  %s2459_s18 = smov 0  }
   0x2   :  { %s2461_s19 = smov 0   ;;  %s2463_s20 = smov 0  }
   0x3   :  { %s2465_s21 = smov 0  }
   0x4 LB: > { %s26_s22 = sadd.s32 1, %s2417_s19  ;;  %s33_s23 = sadd.s32 1, %s2421_s20  ;;  %s2425_s21 = sphi %s2465_s21, %s14_s21   ;;  %s2421_s20 = sphi %s2463_s20, %s2897_s20   ;;  %s2417_s19 = sphi %s2461_s19, %s2896_s19   ;;  %s2413_s18 = sphi %s2459_s18, %s2895_s18   ;;  %s2409_s17 = sphi %s2457_s17, %s2894_s17   ;;  %s2405_s16 = sphi %s2455_s16, %s2893_s16   ;;  %s2401_s15 = sphi %s2453_s15, %s2892_s15  }
   0x5   : > { %p27_p0 = scmp.ge.s32.totalorder %s26_s22, 7  ;;  %p49_p1 = scmp.ne.s32.totalorder %s2405_s16, %s2401_s15 }
   0x6   : > { %p50_p2 = scmp.eq.s32.totalorder %s2425_s21, 0  ;;  %s42_s27 = sadd.s32 1, %s2405_s16 }
   0x7   : > { %s2899_s22 = smov (%p27_p0, %s26_s22), 0  ;;  %s2901_s23 = smov (!%p27_p0, %s33_s23), %s2421_s20 }
   0x8   : > { %p51_p3 = por %p50_p2, %p49_p1  ;;  %p35_p4 = scmp.ge.s32.totalorder %s2901_s23, 2 }
   0x9   : > { %s38_s24 = ssub.s32 %s2417_s19, %s2899_s22  ;;  %p1847_p6 = scmp.ge.s32.totalorder %s2425_s21, 14 }
   0xa   : > { %s2903_s23 = smov (%p35_p4, %s2901_s23), 0 }
   0xb   : > { %s37_s25 = ssub.s32 %s2421_s20, %s2903_s23  ;;  %195 = sbr.rel (%p1847_p6) target bundleno = 56 (0x38), region = 24 }
   0xc   : > { %s39_s26 = sor.u32 %s38_s24, %s37_s25 }
   0xd   : > { %p40_p5 = scmp.eq.s32.totalorder %s39_s26, 0 }
   0xf   : > { %s2504_s28 = scalar_select %p40_p5, %s2405_s16, %s42_s27  }
  0x10   : > { %198 = sbr.rel (!%p51_p3) target bundleno = 56 (0x38), region = 28  ;;  %s200_s29 = sand.u32 (%p51_p3), 1, %s2405_s16  }
  0x11   : > { %s1850_s30 = sshll.u32 (%p51_p3), %s2417_s19, 2  ;;  %s1848_s5 = sshll.u32 (%p51_p3), %s200_s29, 9 }
  0x12   : > { %s2185_s6 = smul.u32 (%p51_p3), 896, %s2421_s20  ;;  %s2518_s12 = scalar_lea.vmem (%p51_p3), [#allocation3], %s1848_s5 }
  0x14   : > { %s206_s7 = sadd.s32 (%p51_p3), %s2185_s6, %s1850_s30 }
  0x15   : > { %s1852_s8 = sshll.u32 %s206_s7, 2 }
  0x16   : > { %s2513_s11 = scalar_lea.vmem %s2887_s0, %s1852_s8 }
  0x17   : > { %v221_v0 = vld [vmem:[%s2513_s11] sm:$0xff]  ;;  %v223_v1 = vld [vmem:[%s2513_s11 + $0x8] sm:$0xff]  ;;  %v225_v2 = vld [vmem:[%s2513_s11 + $0x70] sm:$0xff] }
  0x18   : > { %222 = vst [vmem:[%s2518_s12] sm:$0xff] %v221_v0  ;;  %224 = vst [vmem:[%s2518_s12 + $0x8] sm:$0xff] %v223_v1  ;;  %v227_v3 = vld [vmem:[%s2513_s11 + $0x78] sm:$0xff]  ;;  %v229_v4 = vld [vmem:[%s2513_s11 + $0xe0] sm:$0xff] }
  0x19   : > { %226 = vst [vmem:[%s2518_s12 + $0x10] sm:$0xff] %v225_v2  ;;  %v231_v5 = vld [vmem:[%s2513_s11 + $0xe8] sm:$0xff]  ;;  %228 = vst [vmem:[%s2518_s12 + $0x18] sm:$0xff] %v227_v3  ;;  %v233_v6 = vld [vmem:[%s2513_s11 + $0x150] sm:$0xff] }
  0x1a   : > { %230 = vst [vmem:[%s2518_s12 + $0x20] sm:$0xff] %v229_v4  ;;  %232 = vst [vmem:[%s2518_s12 + $0x28] sm:$0xff] %v231_v5  ;;  %v235_v7 = vld [vmem:[%s2513_s11 + $0x158] sm:$0xff]  ;;  %v237_v8 = vld [vmem:[%s2513_s11 + $0x1c0] sm:$0xff] }
  0x1b   : > { %234 = vst [vmem:[%s2518_s12 + $0x30] sm:$0xff] %v233_v6  ;;  %236 = vst [vmem:[%s2518_s12 + $0x38] sm:$0xff] %v235_v7  ;;  %v239_v9 = vld [vmem:[%s2513_s11 + $0x1c8] sm:$0xff]  ;;  %v241_v10 = vld [vmem:[%s2513_s11 + $0x230] sm:$0xff] }
  0x1c   : > { %238 = vst [vmem:[%s2518_s12 + $0x40] sm:$0xff] %v237_v8  ;;  %v243_v11 = vld [vmem:[%s2513_s11 + $0x238] sm:$0xff]  ;;  %240 = vst [vmem:[%s2518_s12 + $0x48] sm:$0xff] %v239_v9  ;;  %v245_v12 = vld [vmem:[%s2513_s11 + $0x2a0] sm:$0xff] }
  0x1d   : > { %242 = vst [vmem:[%s2518_s12 + $0x50] sm:$0xff] %v241_v10  ;;  %244 = vst [vmem:[%s2518_s12 + $0x58] sm:$0xff] %v243_v11  ;;  %v247_v13 = vld [vmem:[%s2513_s11 + $0x2a8] sm:$0xff]  ;;  %v249_v14 = vld [vmem:[%s2513_s11 + $0x310] sm:$0xff] }
  0x1e   : > { %246 = vst [vmem:[%s2518_s12 + $0x60] sm:$0xff] %v245_v12  ;;  %248 = vst [vmem:[%s2518_s12 + $0x68] sm:$0xff] %v247_v13  ;;  %v251_v15 = vld [vmem:[%s2513_s11 + $0x318] sm:$0xff]  ;;  %v253_v16 = vld [vmem:[%s2513_s11 + $0x380] sm:$0xff] }
  0x1f   : > { %250 = vst [vmem:[%s2518_s12 + $0x70] sm:$0xff] %v249_v14  ;;  %v255_v17 = vld [vmem:[%s2513_s11 + $0x388] sm:$0xff]  ;;  %252 = vst [vmem:[%s2518_s12 + $0x78] sm:$0xff] %v251_v15  ;;  %v257_v18 = vld [vmem:[%s2513_s11 + $0x3f0] sm:$0xff] }
  0x20   : > { %254 = vst [vmem:[%s2518_s12 + $0x80] sm:$0xff] %v253_v16  ;;  %256 = vst [vmem:[%s2518_s12 + $0x88] sm:$0xff] %v255_v17  ;;  %v259_v19 = vld [vmem:[%s2513_s11 + $0x3f8] sm:$0xff]  ;;  %v261_v20 = vld [vmem:[%s2513_s11 + $0x460] sm:$0xff] }
  0x21   : > { %258 = vst [vmem:[%s2518_s12 + $0x90] sm:$0xff] %v257_v18  ;;  %260 = vst [vmem:[%s2518_s12 + $0x98] sm:$0xff] %v259_v19  ;;  %v263_v21 = vld [vmem:[%s2513_s11 + $0x468] sm:$0xff]  ;;  %v265_v22 = vld [vmem:[%s2513_s11 + $0x4d0] sm:$0xff] }
  0x22   : > { %262 = vst [vmem:[%s2518_s12 + $0xa0] sm:$0xff] %v261_v20  ;;  %v267_v23 = vld [vmem:[%s2513_s11 + $0x4d8] sm:$0xff]  ;;  %264 = vst [vmem:[%s2518_s12 + $0xa8] sm:$0xff] %v263_v21  ;;  %v269_v24 = vld [vmem:[%s2513_s11 + $0x540] sm:$0xff] }
  0x23   : > { %266 = vst [vmem:[%s2518_s12 + $0xb0] sm:$0xff] %v265_v22  ;;  %268 = vst [vmem:[%s2518_s12 + $0xb8] sm:$0xff] %v267_v23  ;;  %v271_v25 = vld [vmem:[%s2513_s11 + $0x548] sm:$0xff]  ;;  %v273_v26 = vld [vmem:[%s2513_s11 + $0x5b0] sm:$0xff] }
  0x24   : > { %270 = vst [vmem:[%s2518_s12 + $0xc0] sm:$0xff] %v269_v24  ;;  %272 = vst [vmem:[%s2518_s12 + $0xc8] sm:$0xff] %v271_v25  ;;  %v275_v27 = vld [vmem:[%s2513_s11 + $0x5b8] sm:$0xff]  ;;  %v277_v28 = vld [vmem:[%s2513_s11 + $0x620] sm:$0xff] }
  0x25   : > { %274 = vst [vmem:[%s2518_s12 + $0xd0] sm:$0xff] %v273_v26  ;;  %v279_v29 = vld [vmem:[%s2513_s11 + $0x628] sm:$0xff]  ;;  %276 = vst [vmem:[%s2518_s12 + $0xd8] sm:$0xff] %v275_v27  ;;  %v281_v30 = vld [vmem:[%s2513_s11 + $0x690] sm:$0xff] }
  0x26   : > { %278 = vst [vmem:[%s2518_s12 + $0xe0] sm:$0xff] %v277_v28  ;;  %280 = vst [vmem:[%s2518_s12 + $0xe8] sm:$0xff] %v279_v29  ;;  %v283_v31 = vld [vmem:[%s2513_s11 + $0x698] sm:$0xff]  ;;  %v285_v32 = vld [vmem:[%s2513_s11 + $0x700] sm:$0xff] }
  0x27   : > { %282 = vst [vmem:[%s2518_s12 + $0xf0] sm:$0xff] %v281_v30  ;;  %284 = vst [vmem:[%s2518_s12 + $0xf8] sm:$0xff] %v283_v31  ;;  %v287_v33 = vld [vmem:[%s2513_s11 + $0x708] sm:$0xff]  ;;  %v289_v34 = vld [vmem:[%s2513_s11 + $0x770] sm:$0xff] }
  0x28   : > { %286 = vst [vmem:[%s2518_s12 + $0x100] sm:$0xff] %v285_v32  ;;  %v291_v35 = vld [vmem:[%s2513_s11 + $0x778] sm:$0xff]  ;;  %288 = vst [vmem:[%s2518_s12 + $0x108] sm:$0xff] %v287_v33  ;;  %v293_v36 = vld [vmem:[%s2513_s11 + $0x7e0] sm:$0xff] }
  0x29   : > { %290 = vst [vmem:[%s2518_s12 + $0x110] sm:$0xff] %v289_v34  ;;  %292 = vst [vmem:[%s2518_s12 + $0x118] sm:$0xff] %v291_v35  ;;  %v295_v37 = vld [vmem:[%s2513_s11 + $0x7e8] sm:$0xff]  ;;  %v297_v38 = vld [vmem:[%s2513_s11 + $0x850] sm:$0xff] }
  0x2a   : > { %294 = vst [vmem:[%s2518_s12 + $0x120] sm:$0xff] %v293_v36  ;;  %296 = vst [vmem:[%s2518_s12 + $0x128] sm:$0xff] %v295_v37  ;;  %v299_v39 = vld [vmem:[%s2513_s11 + $0x858] sm:$0xff]  ;;  %v301_v40 = vld [vmem:[%s2513_s11 + $0x8c0] sm:$0xff] }
  0x2b   : > { %298 = vst [vmem:[%s2518_s12 + $0x130] sm:$0xff] %v297_v38  ;;  %v303_v41 = vld [vmem:[%s2513_s11 + $0x8c8] sm:$0xff]  ;;  %300 = vst [vmem:[%s2518_s12 + $0x138] sm:$0xff] %v299_v39  ;;  %v305_v42 = vld [vmem:[%s2513_s11 + $0x930] sm:$0xff] }
  0x2c   : > { %302 = vst [vmem:[%s2518_s12 + $0x140] sm:$0xff] %v301_v40  ;;  %304 = vst [vmem:[%s2518_s12 + $0x148] sm:$0xff] %v303_v41  ;;  %v307_v43 = vld [vmem:[%s2513_s11 + $0x938] sm:$0xff]  ;;  %v309_v44 = vld [vmem:[%s2513_s11 + $0x9a0] sm:$0xff] }
  0x2d   : > { %306 = vst [vmem:[%s2518_s12 + $0x150] sm:$0xff] %v305_v42  ;;  %308 = vst [vmem:[%s2518_s12 + $0x158] sm:$0xff] %v307_v43  ;;  %v311_v45 = vld [vmem:[%s2513_s11 + $0x9a8] sm:$0xff]  ;;  %v313_v46 = vld [vmem:[%s2513_s11 + $0xa10] sm:$0xff] }
  0x2e   : > { %310 = vst [vmem:[%s2518_s12 + $0x160] sm:$0xff] %v309_v44  ;;  %v315_v47 = vld [vmem:[%s2513_s11 + $0xa18] sm:$0xff]  ;;  %312 = vst [vmem:[%s2518_s12 + $0x168] sm:$0xff] %v311_v45  ;;  %v317_v48 = vld [vmem:[%s2513_s11 + $0xa80] sm:$0xff] }
  0x2f   : > { %314 = vst [vmem:[%s2518_s12 + $0x170] sm:$0xff] %v313_v46  ;;  %316 = vst [vmem:[%s2518_s12 + $0x178] sm:$0xff] %v315_v47  ;;  %v319_v49 = vld [vmem:[%s2513_s11 + $0xa88] sm:$0xff]  ;;  %v321_v50 = vld [vmem:[%s2513_s11 + $0xaf0] sm:$0xff] }
  0x30   : > { %318 = vst [vmem:[%s2518_s12 + $0x180] sm:$0xff] %v317_v48  ;;  %320 = vst [vmem:[%s2518_s12 + $0x188] sm:$0xff] %v319_v49  ;;  %v323_v51 = vld [vmem:[%s2513_s11 + $0xaf8] sm:$0xff]  ;;  %v325_v52 = vld [vmem:[%s2513_s11 + $0xb60] sm:$0xff] }
  0x31   : > { %322 = vst [vmem:[%s2518_s12 + $0x190] sm:$0xff] %v321_v50  ;;  %v327_v53 = vld [vmem:[%s2513_s11 + $0xb68] sm:$0xff]  ;;  %324 = vst [vmem:[%s2518_s12 + $0x198] sm:$0xff] %v323_v51  ;;  %v329_v54 = vld [vmem:[%s2513_s11 + $0xbd0] sm:$0xff] }
  0x32   : > { %326 = vst [vmem:[%s2518_s12 + $0x1a0] sm:$0xff] %v325_v52  ;;  %328 = vst [vmem:[%s2518_s12 + $0x1a8] sm:$0xff] %v327_v53  ;;  %v331_v55 = vld [vmem:[%s2513_s11 + $0xbd8] sm:$0xff]  ;;  %v333_v56 = vld [vmem:[%s2513_s11 + $0xc40] sm:$0xff] }
  0x33   : > { %330 = vst [vmem:[%s2518_s12 + $0x1b0] sm:$0xff] %v329_v54  ;;  %332 = vst [vmem:[%s2518_s12 + $0x1b8] sm:$0xff] %v331_v55  ;;  %v335_v57 = vld [vmem:[%s2513_s11 + $0xc48] sm:$0xff]  ;;  %v337_v58 = vld [vmem:[%s2513_s11 + $0xcb0] sm:$0xff] }
  0x34   : > { %334 = vst [vmem:[%s2518_s12 + $0x1c0] sm:$0xff] %v333_v56  ;;  %v339_v59 = vld [vmem:[%s2513_s11 + $0xcb8] sm:$0xff]  ;;  %336 = vst [vmem:[%s2518_s12 + $0x1c8] sm:$0xff] %v335_v57  ;;  %v341_v60 = vld [vmem:[%s2513_s11 + $0xd20] sm:$0xff] }
  0x35   : > { %338 = vst [vmem:[%s2518_s12 + $0x1d0] sm:$0xff] %v337_v58  ;;  %340 = vst [vmem:[%s2518_s12 + $0x1d8] sm:$0xff] %v339_v59  ;;  %v343_v61 = vld [vmem:[%s2513_s11 + $0xd28] sm:$0xff]  ;;  %v345_v62 = vld [vmem:[%s2513_s11 + $0xd90] sm:$0xff] }
  0x36   : > { %342 = vst [vmem:[%s2518_s12 + $0x1e0] sm:$0xff] %v341_v60  ;;  %344 = vst [vmem:[%s2518_s12 + $0x1e8] sm:$0xff] %v343_v61  ;;  %v347_v63 = vld [vmem:[%s2513_s11 + $0xd98] sm:$0xff] }
  0x37   : > { %346 = vst [vmem:[%s2518_s12 + $0x1f0] sm:$0xff] %v345_v62  ;;  %348 = vst [vmem:[%s2518_s12 + $0x1f8] sm:$0xff] %v347_v63 }
  0x38 PF: > { %p1853_p7 = scmp.ge.s32.totalorder %s2425_s21, 1  ;;  %p365_p8 = scmp.lt.s32.totalorder %s2425_s21, 15 }
  0x3a   : > { %p366_p9 = pnand %p1853_p7, %p365_p8 }
  0x3b   : > { %s372_s13 = sand.u32 (!%p366_p9), 1, %s2401_s15   ;;  %s1855_s14 = sshll.u32 (!%p366_p9), %s2409_s17, 6 }
  0x3c   : > { %369 = sbr.rel (%p366_p9) target bundleno = 482 (0x1e2), region = 55  ;;  %s1854_s24 = sshll.u32 (!%p366_p9), %s372_s13, 9 }
  0x3d   : > { %p417_p10 = scmp.lt.s32.totalorder (!%p366_p9), %s1855_s14, 447  ;;  %s1857_s25 = sshll.u32 (!%p366_p9), %s2413_s18, 5 }
  0x3e   : > { %p432_p11 = scmp.lt.s32.totalorder (!%p366_p9), %s1857_s25, 63  ;;  %s2660_s15 = scalar_lea.vmem (!%p366_p9), [#allocation3], %s1854_s24 }
  0x3f   : > { %p1859_p12 = scmp.ne.s32.totalorder (!%p366_p9), %s2409_s17, 0 }
  0x41   : > { %s2905_s14 = smov (!%p417_p10, %s1855_s14), 447  ;;  %s2907_s25 = smov (!%p432_p11, %s1857_s25), 63 }
  0x42   : > { %s1856_s26 = sshll.u32 %s2905_s14, 2  ;;  %s1858_s5 = sshll.u32 %s2907_s25, 3 }
  0x43   : > { %s2653_s30 = scalar_lea.vmem %s2888_s1, %s1856_s26  ;;  %s2658_s8 = scalar_lea.vmem %s2891_s4, %s1858_s5 }
  0x44   : > { %444 = sbr.rel (%p1859_p12) target bundleno = 90 (0x5a), region = 63 }
  0x49   : > { %v2427_v0 = vmov 0.0  }
  0x4a   : > { %445 = vst [vmem:[#allocation2 + $0xb0] sm:$0xff] %v2427_v0  ;;  %446 = vst [vmem:[#allocation2] sm:$0xff] %v2427_v0 }
  0x4b   : > { %447 = vst [vmem:[#allocation2 + $0xd8] sm:$0xff] %v2427_v0  ;;  %448 = vst [vmem:[#allocation2 + $0x18] sm:$0xff] %v2427_v0 }
  0x4c   : > { %449 = vst [vmem:[#allocation2 + $0x50] sm:$0xff] %v2427_v0  ;;  %450 = vst [vmem:[#allocation2 + $0x68] sm:$0xff] %v2427_v0 }
  0x4d   : > { %451 = vst [vmem:[#allocation2 + $0x30] sm:$0xff] %v2427_v0  ;;  %452 = vst [vmem:[#allocation2 + $0x48] sm:$0xff] %v2427_v0 }
  0x4e   : > { %453 = vst [vmem:[#allocation2 + $0x80] sm:$0xff] %v2427_v0  ;;  %454 = vst [vmem:[#allocation2 + $0x88] sm:$0xff] %v2427_v0 }
  0x4f   : > { %455 = vst [vmem:[#allocation2 + $0xe8] sm:$0xff] %v2427_v0  ;;  %456 = vst [vmem:[#allocation2 + $0xb8] sm:$0xff] %v2427_v0 }
  0x50   : > { %457 = vst [vmem:[#allocation2 + $0x60] sm:$0xff] %v2427_v0  ;;  %458 = vst [vmem:[#allocation2 + $0xf0] sm:$0xff] %v2427_v0 }
  0x51   : > { %459 = vst [vmem:[#allocation2 + $0x8] sm:$0xff] %v2427_v0  ;;  %460 = vst [vmem:[#allocation2 + $0x78] sm:$0xff] %v2427_v0 }
  0x52   : > { %461 = vst [vmem:[#allocation2 + $0x38] sm:$0xff] %v2427_v0  ;;  %462 = vst [vmem:[#allocation2 + $0x58] sm:$0xff] %v2427_v0 }
  0x53   : > { %463 = vst [vmem:[#allocation2 + $0x40] sm:$0xff] %v2427_v0  ;;  %464 = vst [vmem:[#allocation2 + $0xc8] sm:$0xff] %v2427_v0 }
  0x54   : > { %465 = vst [vmem:[#allocation2 + $0xe0] sm:$0xff] %v2427_v0  ;;  %466 = vst [vmem:[#allocation2 + $0x90] sm:$0xff] %v2427_v0 }
  0x55   : > { %467 = vst [vmem:[#allocation2 + $0x70] sm:$0xff] %v2427_v0  ;;  %468 = vst [vmem:[#allocation2 + $0xc0] sm:$0xff] %v2427_v0 }
  0x56   : > { %469 = vst [vmem:[#allocation2 + $0xa8] sm:$0xff] %v2427_v0  ;;  %470 = vst [vmem:[#allocation2 + $0xd0] sm:$0xff] %v2427_v0 }
  0x57   : > { %471 = vst [vmem:[#allocation2 + $0x10] sm:$0xff] %v2427_v0  ;;  %472 = vst [vmem:[#allocation2 + $0x28] sm:$0xff] %v2427_v0 }
  0x58   : > { %473 = vst [vmem:[#allocation2 + $0xa0] sm:$0xff] %v2427_v0  ;;  %474 = vst [vmem:[#allocation2 + $0xf8] sm:$0xff] %v2427_v0 }
  0x59   : > { %475 = vst [vmem:[#allocation2 + $0x20] sm:$0xff] %v2427_v0  ;;  %476 = vst [vmem:[#allocation2 + $0x98] sm:$0xff] %v2427_v0 }
  0x5a PF: > { %v2243_v1 = vld [vmem:[%s2653_s30 + $0x78] sm:$0xff]   ;;  %v2247_v5 = vld [vmem:[%s2653_s30 + $0x70] sm:$0xff]   ;;  %v2251_v9 = vld [vmem:[%s2653_s30 + $0x68] sm:$0xff]   ;;  %p1956_p13 = scmp.ne.s32.totalorder %s2409_s17, 6 }
  0x5b   : > { %v2244_v2 = vld [vmem:[%s2653_s30 + $0xf8] sm:$0xff]   ;;  %1961 = vmatprep.subr.bf16.mxu0 %v2243_v1  ;;  %v2248_v6 = vld [vmem:[%s2653_s30 + $0xf0] sm:$0xff]   ;;  %v2252_v10 = vld [vmem:[%s2653_s30 + $0xe8] sm:$0xff]  }
  0x5c   : > { %v2245_v3 = vld [vmem:[%s2653_s30 + $0x38] sm:$0xff]   ;;  %2073 = vmatprep.subr.bf16.mxu1 %v2244_v2  ;;  %v2249_v7 = vld [vmem:[%s2653_s30 + $0x30] sm:$0xff]   ;;  %v2253_v11 = vld [vmem:[%s2653_s30 + $0x28] sm:$0xff]  }
  0x5d   : > { %v2246_v4 = vld [vmem:[%s2653_s30 + $0xb8] sm:$0xff]   ;;  %1962 = vmatpush3.bf16.msra.mxu0 %v2245_v3  ;;  %v2250_v8 = vld [vmem:[%s2653_s30 + $0xb0] sm:$0xff]   ;;  %v2254_v12 = vld [vmem:[%s2653_s30 + $0xa8] sm:$0xff]  }
  0x5e   : > { %2074 = vmatpush3.bf16.msra.mxu1 %v2246_v4  ;;  %1963 = vmatprep.subr.bf16.mxu0 %v2247_v5  ;;  %v2255_v13 = vld [vmem:[%s2653_s30 + $0x60] sm:$0xff]   ;;  %v2259_v17 = vld [vmem:[%s2653_s30 + $0x58] sm:$0xff]   ;;  %v2263_v21 = vld [vmem:[%s2653_s30 + $0x50] sm:$0xff]  }
  0x5f   : > { %2075 = vmatprep.subr.bf16.mxu1 %v2248_v6  ;;  %v2256_v14 = vld [vmem:[%s2653_s30 + $0xe0] sm:$0xff]   ;;  %v2260_v18 = vld [vmem:[%s2653_s30 + $0xd8] sm:$0xff]   ;;  %v2264_v22 = vld [vmem:[%s2653_s30 + $0xd0] sm:$0xff]  }
  0x60   : > { %v2257_v15 = vld [vmem:[%s2653_s30 + $0x20] sm:$0xff]   ;;  %v2261_v19 = vld [vmem:[%s2653_s30 + $0x18] sm:$0xff]   ;;  %v2265_v23 = vld [vmem:[%s2653_s30 + $0x10] sm:$0xff]  }
  0x61   : > { %1964 = vmatpush3.bf16.msra.mxu0 %v2249_v7  ;;  %v2258_v16 = vld [vmem:[%s2653_s30 + $0xa0] sm:$0xff]   ;;  %v2262_v20 = vld [vmem:[%s2653_s30 + $0x98] sm:$0xff]   ;;  %v2266_v24 = vld [vmem:[%s2653_s30 + $0x90] sm:$0xff]  }
  0x62   : > { %2076 = vmatpush3.bf16.msra.mxu1 %v2250_v8  ;;  %1965 = vmatprep.subr.bf16.mxu0 %v2251_v9  ;;  %v2267_v25 = vld [vmem:[%s2653_s30 + $0x48] sm:$0xff]   ;;  %v2271_v29 = vld [vmem:[%s2653_s30 + $0x40] sm:$0xff]  }
  0x63   : > { %2077 = vmatprep.subr.bf16.mxu1 %v2252_v10  ;;  %v2268_v26 = vld [vmem:[%s2653_s30 + $0xc8] sm:$0xff]   ;;  %v2272_v30 = vld [vmem:[%s2653_s30 + $0xc0] sm:$0xff]  }
  0x64   : > { %v2269_v27 = vld [vmem:[%s2653_s30 + $0x8] sm:$0xff]   ;;  %v2273_v31 = vld [vmem:[%s2653_s30] sm:$0xff]  }
  0x65   : > { %1966 = vmatpush3.bf16.msra.mxu0 %v2253_v11  ;;  %v2270_v28 = vld [vmem:[%s2653_s30 + $0x88] sm:$0xff]   ;;  %v2274_v32 = vld [vmem:[%s2653_s30 + $0x80] sm:$0xff]  }
  0x66   : > { %2078 = vmatpush3.bf16.msra.mxu1 %v2254_v12  ;;  %1967 = vmatprep.subr.bf16.mxu0 %v2255_v13  ;;  %v2275_v33 = vld [vmem:[%s2660_s15] ss:$16 sps:$4 sm:$0xff]   ;;  %v2277_v34 = vld [vmem:[%s2660_s15 + $0x4] ss:$16 sps:$4 sm:$0xff]   ;;  %v2278_v35 = vld [vmem:[%s2660_s15 + $0x8] ss:$16 sps:$4 sm:$0xff]  }
  0x67   : > { %2079 = vmatprep.subr.bf16.mxu1 %v2256_v14  ;;  %v2280_v36 = vld [vmem:[%s2660_s15 + $0xc] ss:$16 sps:$4 sm:$0xff]   ;;  %1181 = vmatprep.mubr.bf16.mxu0 %v2277_v34  ;;  %v2281_v37 = vld [vmem:[%s2660_s15 + $0x24] ss:$16 sps:$4 sm:$0xff]   ;;  %v2285_v39 = vld [vmem:[%s2660_s15 + $0x20] ss:$16 sps:$4 sm:$0xff]  }
  0x68   : > { %1342 = vmatprep.mubr.bf16.mxu1 %v2280_v36  ;;  %v2283_v38 = vld [vmem:[%s2660_s15 + $0x2c] ss:$16 sps:$4 sm:$0xff]   ;;  %v2286_v40 = vld [vmem:[%s2660_s15 + $0x28] ss:$16 sps:$4 sm:$0xff]   ;;  %v2287_v41 = vld [vmem:[%s2660_s15 + $0x44] ss:$16 sps:$4 sm:$0xff]  }
  0x69   : > { %1968 = vmatpush3.bf16.msra.mxu0 %v2257_v15  ;;  %v2289_v42 = vld [vmem:[%s2660_s15 + $0x4c] ss:$16 sps:$4 sm:$0xff]   ;;  %v2291_v43 = vld [vmem:[%s2660_s15 + $0x40] ss:$16 sps:$4 sm:$0xff]   ;;  %v2292_v44 = vld [vmem:[%s2660_s15 + $0x48] ss:$16 sps:$4 sm:$0xff]  }
  0x6a   : > { %2080 = vmatpush3.bf16.msra.mxu1 %v2258_v16  ;;  %1969 = vmatprep.subr.bf16.mxu0 %v2259_v17  ;;  %v2293_v45 = vld [vmem:[%s2660_s15 + $0x64] ss:$16 sps:$4 sm:$0xff]   ;;  %v2295_v46 = vld [vmem:[%s2660_s15 + $0x6c] ss:$16 sps:$4 sm:$0xff]   ;;  %v2297_v47 = vld [vmem:[%s2660_s15 + $0x60] ss:$16 sps:$4 sm:$0xff]  }
  0x6b   : > { %2081 = vmatprep.subr.bf16.mxu1 %v2260_v18  ;;  %v2298_v48 = vld [vmem:[%s2660_s15 + $0x68] ss:$16 sps:$4 sm:$0xff]   ;;  %v2299_v49 = vld [vmem:[%s2660_s15 + $0x84] ss:$16 sps:$4 sm:$0xff]   ;;  %v2301_v50 = vld [vmem:[%s2660_s15 + $0x8c] ss:$16 sps:$4 sm:$0xff]  }
  0x6c   : > { %v2303_v51 = vld [vmem:[%s2660_s15 + $0x80] ss:$16 sps:$4 sm:$0xff]   ;;  %v2304_v52 = vld [vmem:[%s2660_s15 + $0x88] ss:$16 sps:$4 sm:$0xff]   ;;  %v2305_v53 = vld [vmem:[%s2660_s15 + $0xa4] ss:$16 sps:$4 sm:$0xff]  }
  0x6d   : > { %1970 = vmatpush3.bf16.msra.mxu0 %v2261_v19  ;;  %v2307_v54 = vld [vmem:[%s2660_s15 + $0xac] ss:$16 sps:$4 sm:$0xff]   ;;  %v2309_v55 = vld [vmem:[%s2660_s15 + $0xa0] ss:$16 sps:$4 sm:$0xff]   ;;  %v2310_v56 = vld [vmem:[%s2660_s15 + $0xa8] ss:$16 sps:$4 sm:$0xff]  }
  0x6e   : > { %2082 = vmatpush3.bf16.msra.mxu1 %v2262_v20  ;;  %1971 = vmatprep.subr.bf16.mxu0 %v2263_v21  ;;  %v2311_v57 = vld [vmem:[%s2660_s15 + $0xc4] ss:$16 sps:$4 sm:$0xff]   ;;  %v2313_v58 = vld [vmem:[%s2660_s15 + $0xcc] ss:$16 sps:$4 sm:$0xff]   ;;  %v2315_v59 = vld [vmem:[%s2660_s15 + $0xc0] ss:$16 sps:$4 sm:$0xff]  }
  0x6f   : > { %2083 = vmatprep.subr.bf16.mxu1 %v2264_v22  ;;  %v2316_v60 = vld [vmem:[%s2660_s15 + $0xc8] ss:$16 sps:$4 sm:$0xff]   ;;  %v2317_v61 = vld [vmem:[%s2660_s15 + $0xe4] ss:$16 sps:$4 sm:$0xff]   ;;  %v2319_v62 = vld [vmem:[%s2660_s15 + $0xec] ss:$16 sps:$4 sm:$0xff]  }
  0x70   : > { %v2321_v63 = vld [vmem:[%s2660_s15 + $0xe0] ss:$16 sps:$4 sm:$0xff]   ;;  %v2322_v0 = vld [vmem:[%s2660_s15 + $0xe8] ss:$16 sps:$4 sm:$0xff]   ;;  %v2323_v1 = vld [vmem:[%s2660_s15 + $0x104] ss:$16 sps:$4 sm:$0xff]  }
  0x71   : > { %1972 = vmatpush3.bf16.msra.mxu0 %v2265_v23  ;;  %v2325_v2 = vld [vmem:[%s2660_s15 + $0x10c] ss:$16 sps:$4 sm:$0xff]   ;;  %v2327_v3 = vld [vmem:[%s2660_s15 + $0x100] ss:$16 sps:$4 sm:$0xff]   ;;  %v2328_v4 = vld [vmem:[%s2660_s15 + $0x108] ss:$16 sps:$4 sm:$0xff]  }
  0x72   : > { %2084 = vmatpush3.bf16.msra.mxu1 %v2266_v24  ;;  %1973 = vmatprep.subr.bf16.mxu0 %v2267_v25  ;;  %v2329_v5 = vld [vmem:[%s2660_s15 + $0x124] ss:$16 sps:$4 sm:$0xff]   ;;  %v2331_v6 = vld [vmem:[%s2660_s15 + $0x12c] ss:$16 sps:$4 sm:$0xff]   ;;  %v2333_v7 = vld [vmem:[%s2660_s15 + $0x120] ss:$16 sps:$4 sm:$0xff]  }
  0x73   : > { %2085 = vmatprep.subr.bf16.mxu1 %v2268_v26  ;;  %v2334_v8 = vld [vmem:[%s2660_s15 + $0x128] ss:$16 sps:$4 sm:$0xff]   ;;  %v2335_v9 = vld [vmem:[%s2660_s15 + $0x144] ss:$16 sps:$4 sm:$0xff]   ;;  %v2337_v10 = vld [vmem:[%s2660_s15 + $0x14c] ss:$16 sps:$4 sm:$0xff]  }
  0x74   : > { %v2339_v11 = vld [vmem:[%s2660_s15 + $0x140] ss:$16 sps:$4 sm:$0xff]   ;;  %v2340_v12 = vld [vmem:[%s2660_s15 + $0x148] ss:$16 sps:$4 sm:$0xff]   ;;  %v2341_v13 = vld [vmem:[%s2660_s15 + $0x164] ss:$16 sps:$4 sm:$0xff]  }
  0x75   : > { %1974 = vmatpush3.bf16.msra.mxu0 %v2269_v27  ;;  %v2343_v14 = vld [vmem:[%s2660_s15 + $0x16c] ss:$16 sps:$4 sm:$0xff]   ;;  %v2345_v15 = vld [vmem:[%s2660_s15 + $0x160] ss:$16 sps:$4 sm:$0xff]   ;;  %v2346_v16 = vld [vmem:[%s2660_s15 + $0x168] ss:$16 sps:$4 sm:$0xff]  }
  0x76   : > { %2086 = vmatpush3.bf16.msra.mxu1 %v2270_v28  ;;  %1975 = vmatprep.subr.bf16.mxu0 %v2271_v29  ;;  %v2347_v17 = vld [vmem:[%s2660_s15 + $0x184] ss:$16 sps:$4 sm:$0xff]   ;;  %v2349_v18 = vld [vmem:[%s2660_s15 + $0x18c] ss:$16 sps:$4 sm:$0xff]   ;;  %v2351_v19 = vld [vmem:[%s2660_s15 + $0x180] ss:$16 sps:$4 sm:$0xff]  }
  0x77   : > { %2087 = vmatprep.subr.bf16.mxu1 %v2272_v30  ;;  %v2352_v20 = vld [vmem:[%s2660_s15 + $0x188] ss:$16 sps:$4 sm:$0xff]   ;;  %v2353_v21 = vld [vmem:[%s2660_s15 + $0x1a4] ss:$16 sps:$4 sm:$0xff]   ;;  %v2355_v22 = vld [vmem:[%s2660_s15 + $0x1ac] ss:$16 sps:$4 sm:$0xff]  }
  0x78   : > { %v2357_v23 = vld [vmem:[%s2660_s15 + $0x1a0] ss:$16 sps:$4 sm:$0xff]   ;;  %v2358_v24 = vld [vmem:[%s2660_s15 + $0x1a8] ss:$16 sps:$4 sm:$0xff]   ;;  %v2359_v25 = vld [vmem:[%s2660_s15 + $0x1c4] ss:$16 sps:$4 sm:$0xff]  }
  0x79   : > { %1976 = vmatpush3.bf16.msra.mxu0 %v2273_v31  ;;  %v2361_v26 = vld [vmem:[%s2660_s15 + $0x1cc] ss:$16 sps:$4 sm:$0xff]   ;;  %v2363_v27 = vld [vmem:[%s2660_s15 + $0x1c0] ss:$16 sps:$4 sm:$0xff]   ;;  %v2364_v28 = vld [vmem:[%s2660_s15 + $0x1c8] ss:$16 sps:$4 sm:$0xff]  }
  0x7a   : > { %2088 = vmatpush3.bf16.msra.mxu1 %v2274_v32  ;;  %v2365_v29 = vld [vmem:[%s2660_s15 + $0x1e4] ss:$16 sps:$4 sm:$0xff]   ;;  %v2367_v30 = vld [vmem:[%s2660_s15 + $0x1ec] ss:$16 sps:$4 sm:$0xff]   ;;  %v2369_v31 = vld [vmem:[%s2660_s15 + $0x1e0] ss:$16 sps:$4 sm:$0xff]  }
  0x7b   : > { %v2370_v32 = vld [vmem:[%s2660_s15 + $0x1e8] ss:$16 sps:$4 sm:$0xff]  }
  0x7c   : > { %1182 = vmatmul.mubr.bf16.vlgmr.msra.gmra.mxu0 %v2275_v33 }
  0x7d   : > { %1343 = vmatmul.mubr.bf16.vlgmr.msra.gmra.mxu1 %v2278_v35  ;;  %1189 = vmatprep.mubr.bf16.mxu0 %v2281_v37 }
  0x7e   : > { %1350 = vmatprep.mubr.bf16.mxu1 %v2283_v38 }
  0x84   : > { %1190 = vmatmul.mubr.bf16.gmra.mxu0 %v2285_v39 }
  0x85   : > { %1351 = vmatmul.mubr.bf16.gmra.mxu1 %v2286_v40  ;;  %1197 = vmatprep.mubr.bf16.mxu0 %v2287_v41  ;;  %v477_v40 = vld [vmem:[#allocation2 + $0xb0] sm:$0xff] }
  0x86   : > { %1358 = vmatprep.mubr.bf16.mxu1 %v2289_v42 }
  0x8c   : > { %1198 = vmatmul.mubr.bf16.gmra.mxu0 %v2291_v43 }
  0x8d   : > { %1359 = vmatmul.mubr.bf16.gmra.mxu1 %v2292_v44  ;;  %1205 = vmatprep.mubr.bf16.mxu0 %v2293_v45 }
  0x8e   : > { %1366 = vmatprep.mubr.bf16.mxu1 %v2295_v46 }
  0x94   : > { %1206 = vmatmul.mubr.bf16.gmra.mxu0 %v2297_v47 }
  0x95   : > { %1367 = vmatmul.mubr.bf16.gmra.mxu1 %v2298_v48  ;;  %1213 = vmatprep.mubr.bf16.mxu0 %v2299_v49  ;;  %v478_v49 = vld [vmem:[#allocation2] sm:$0xff] }
  0x96   : > { %1374 = vmatprep.mubr.bf16.mxu1 %v2301_v50 }
  0x9c   : > { %1214 = vmatmul.mubr.bf16.gmra.mxu0 %v2303_v51 }
  0x9d   : > { %1375 = vmatmul.mubr.bf16.gmra.mxu1 %v2304_v52  ;;  %1221 = vmatprep.mubr.bf16.mxu0 %v2305_v53 }
  0x9e   : > { %1382 = vmatprep.mubr.bf16.mxu1 %v2307_v54 }
  0xa4   : > { %1222 = vmatmul.mubr.bf16.gmra.mxu0 %v2309_v55 }
  0xa5   : > { %1383 = vmatmul.mubr.bf16.gmra.mxu1 %v2310_v56  ;;  %1229 = vmatprep.mubr.bf16.mxu0 %v2311_v57 }
  0xa6   : > { %1390 = vmatprep.mubr.bf16.mxu1 %v2313_v58  ;;  %v479_v58 = vld [vmem:[#allocation2 + $0xd8] sm:$0xff] }
  0xac   : > { %1230 = vmatmul.mubr.bf16.gmra.mxu0 %v2315_v59 }
  0xad   : > { %1391 = vmatmul.mubr.bf16.gmra.mxu1 %v2316_v60  ;;  %1237 = vmatprep.mubr.bf16.mxu0 %v2317_v61 }
  0xae   : > { %1398 = vmatprep.mubr.bf16.mxu1 %v2319_v62 }
  0xb4   : > { %1238 = vmatmul.mubr.bf16.gmra.mxu0 %v2321_v63 }
  0xb5   : > { %1399 = vmatmul.mubr.bf16.gmra.mxu1 %v2322_v0  ;;  %1245 = vmatprep.mubr.bf16.mxu0 %v2323_v1 }
  0xb6   : > { %1406 = vmatprep.mubr.bf16.mxu1 %v2325_v2 }
  0xbc   : > { %1246 = vmatmul.mubr.bf16.gmra.mxu0 %v2327_v3  ;;  %v480_v3 = vld [vmem:[#allocation2 + $0x18] sm:$0xff] }
  0xbd   : > { %1407 = vmatmul.mubr.bf16.gmra.mxu1 %v2328_v4  ;;  %1253 = vmatprep.mubr.bf16.mxu0 %v2329_v5 }
  0xbe   : > { %1414 = vmatprep.mubr.bf16.mxu1 %v2331_v6 }
  0xc4   : > { %1254 = vmatmul.mubr.bf16.gmra.mxu0 %v2333_v7 }
  0xc5   : > { %1415 = vmatmul.mubr.bf16.gmra.mxu1 %v2334_v8  ;;  %1261 = vmatprep.mubr.bf16.mxu0 %v2335_v9 }
  0xc6   : > { %1422 = vmatprep.mubr.bf16.mxu1 %v2337_v10 }
  0xcc   : > { %1262 = vmatmul.mubr.bf16.gmra.mxu0 %v2339_v11 }
  0xcd   : > { %1423 = vmatmul.mubr.bf16.gmra.mxu1 %v2340_v12  ;;  %1269 = vmatprep.mubr.bf16.mxu0 %v2341_v13  ;;  %v481_v12 = vld [vmem:[#allocation2 + $0x50] sm:$0xff] }
  0xce   : > { %1430 = vmatprep.mubr.bf16.mxu1 %v2343_v14 }
  0xd4   : > { %1270 = vmatmul.mubr.bf16.gmra.mxu0 %v2345_v15 }
  0xd5   : > { %1431 = vmatmul.mubr.bf16.gmra.mxu1 %v2346_v16  ;;  %1277 = vmatprep.mubr.bf16.mxu0 %v2347_v17 }
  0xd6   : > { %1438 = vmatprep.mubr.bf16.mxu1 %v2349_v18 }
  0xdc   : > { %1278 = vmatmul.mubr.bf16.gmra.mxu0 %v2351_v19 }
  0xdd   : > { %1439 = vmatmul.mubr.bf16.gmra.mxu1 %v2352_v20  ;;  %1285 = vmatprep.mubr.bf16.mxu0 %v2353_v21  ;;  %v482_v21 = vld [vmem:[#allocation2 + $0x68] sm:$0xff] }
  0xde   : > { %1446 = vmatprep.mubr.bf16.mxu1 %v2355_v22 }
  0xe4   : > { %1286 = vmatmul.mubr.bf16.gmra.mxu0 %v2357_v23 }
  0xe5   : > { %1447 = vmatmul.mubr.bf16.gmra.mxu1 %v2358_v24  ;;  %1293 = vmatprep.mubr.bf16.mxu0 %v2359_v25 }
  0xe6   : > { %1454 = vmatprep.mubr.bf16.mxu1 %v2361_v26 }
  0xec   : > { %1294 = vmatmul.mubr.bf16.gmra.mxu0 %v2363_v27 }
  0xed   : > { %1455 = vmatmul.mubr.bf16.gmra.mxu1 %v2364_v28  ;;  %1301 = vmatprep.mubr.bf16.mxu0 %v2365_v29 }
  0xee   : > { %1462 = vmatprep.mubr.bf16.mxu1 %v2367_v30  ;;  %v483_v30 = vld [vmem:[#allocation2 + $0x30] sm:$0xff] }
  0xf4   : > { %1302 = vmatmul.mubr.bf16.gmra.mxu0 %v2369_v31 }
  0xf5   : > { %1463 = vmatmul.mubr.bf16.gmra.mxu1 %v2370_v32 }
 0x13c   : > { %v1977_v33 = vpop.f32.mrf.mxu0 }
 0x13d   : > { %v2089_v34 = vpop.f32.mrf.mxu1 }
 0x13e   : > { %v1978_v35 = vpop.f32.mrf.mxu0 }
 0x13f   : > { %v1979_v36 = vadd.f32 %v1978_v35, %v1977_v33  ;;  %v2090_v37 = vpop.f32.mrf.mxu1 }
 0x140   : > { %v2091_v38 = vadd.f32 %v2090_v37, %v2089_v34  ;;  %v1980_v39 = vpop.f32.mrf.mxu0 }
 0x141   : > { %v2092_v41 = vpop.f32.mrf.mxu1 }
 0x142   : > { %v1345_v42 = vadd.f32 %v2091_v38, %v1979_v36  ;;  %v1981_v43 = vpop.f32.mrf.mxu0 }
 0x143   : > { %v1982_v44 = vadd.f32 %v1981_v43, %v1980_v39  ;;  %v2093_v45 = vpop.f32.mrf.mxu1  ;;  %v484_v39 = vld [vmem:[#allocation2 + $0x48] sm:$0xff] }
 0x144   : > { %v1471_v46 = vadd.f32 %v1345_v42, %v477_v40  ;;  %v2094_v47 = vadd.f32 %v2093_v45, %v2092_v41  ;;  %v1983_v48 = vpop.f32.mrf.mxu0 }
 0x145   : > { %v2095_v50 = vpop.f32.mrf.mxu1 }
 0x146   : > { %1503 = vst [vmem:[#allocation2 + $0xb0] sm:$0xff] %v1471_v46  ;;  %v1348_v51 = vadd.f32 %v2094_v47, %v1982_v44  ;;  %v1984_v52 = vpop.f32.mrf.mxu0 }
 0x147   : > { %v1985_v53 = vadd.f32 %v1984_v52, %v1983_v48  ;;  %v2096_v54 = vpop.f32.mrf.mxu1  ;;  %v485_v48 = vld [vmem:[#allocation2 + $0x80] sm:$0xff] }
 0x148   : > { %v1472_v55 = vadd.f32 %v1348_v51, %v478_v49  ;;  %v2097_v56 = vadd.f32 %v2096_v54, %v2095_v50  ;;  %v1986_v57 = vpop.f32.mrf.mxu0 }
 0x149   : > { %v2098_v59 = vpop.f32.mrf.mxu1 }
 0x14a   : > { %1504 = vst [vmem:[#allocation2] sm:$0xff] %v1472_v55  ;;  %v1353_v60 = vadd.f32 %v2097_v56, %v1985_v53  ;;  %v1987_v61 = vpop.f32.mrf.mxu0 }
 0x14b   : > { %v1988_v62 = vadd.f32 %v1987_v61, %v1986_v57  ;;  %v2099_v63 = vpop.f32.mrf.mxu1  ;;  %v486_v57 = vld [vmem:[#allocation2 + $0x88] sm:$0xff] }
 0x14c   : > { %v1473_v0 = vadd.f32 %v1353_v60, %v479_v58  ;;  %v2100_v1 = vadd.f32 %v2099_v63, %v2098_v59  ;;  %v1989_v2 = vpop.f32.mrf.mxu0 }
 0x14d   : > { %v2101_v4 = vpop.f32.mrf.mxu1 }
 0x14e   : > { %1505 = vst [vmem:[#allocation2 + $0xd8] sm:$0xff] %v1473_v0  ;;  %v1356_v5 = vadd.f32 %v2100_v1, %v1988_v62  ;;  %v1990_v6 = vpop.f32.mrf.mxu0 }
 0x14f   : > { %v1991_v7 = vadd.f32 %v1990_v6, %v1989_v2  ;;  %v2102_v8 = vpop.f32.mrf.mxu1  ;;  %v487_v2 = vld [vmem:[#allocation2 + $0xe8] sm:$0xff] }
 0x150   : > { %v1474_v9 = vadd.f32 %v1356_v5, %v480_v3  ;;  %v2103_v10 = vadd.f32 %v2102_v8, %v2101_v4  ;;  %v1992_v11 = vpop.f32.mrf.mxu0 }
 0x151   : > { %v2104_v13 = vpop.f32.mrf.mxu1 }
 0x152   : > { %1506 = vst [vmem:[#allocation2 + $0x18] sm:$0xff] %v1474_v9  ;;  %v1361_v14 = vadd.f32 %v2103_v10, %v1991_v7  ;;  %v1993_v15 = vpop.f32.mrf.mxu0 }
 0x153   : > { %v1994_v16 = vadd.f32 %v1993_v15, %v1992_v11  ;;  %v2105_v17 = vpop.f32.mrf.mxu1  ;;  %v488_v11 = vld [vmem:[#allocation2 + $0xb8] sm:$0xff] }
 0x154   : > { %v1475_v18 = vadd.f32 %v1361_v14, %v481_v12  ;;  %v2106_v19 = vadd.f32 %v2105_v17, %v2104_v13  ;;  %v1995_v20 = vpop.f32.mrf.mxu0 }
 0x155   : > { %v2107_v22 = vpop.f32.mrf.mxu1 }
 0x156   : > { %1507 = vst [vmem:[#allocation2 + $0x50] sm:$0xff] %v1475_v18  ;;  %v1364_v23 = vadd.f32 %v2106_v19, %v1994_v16  ;;  %v1996_v24 = vpop.f32.mrf.mxu0 }
 0x157   : > { %v1997_v25 = vadd.f32 %v1996_v24, %v1995_v20  ;;  %v2108_v26 = vpop.f32.mrf.mxu1  ;;  %v489_v20 = vld [vmem:[#allocation2 + $0x60] sm:$0xff] }
 0x158   : > { %v1476_v27 = vadd.f32 %v1364_v23, %v482_v21  ;;  %v2109_v28 = vadd.f32 %v2108_v26, %v2107_v22  ;;  %v1998_v29 = vpop.f32.mrf.mxu0 }
 0x159   : > { %v2110_v31 = vpop.f32.mrf.mxu1 }
 0x15a   : > { %1508 = vst [vmem:[#allocation2 + $0x68] sm:$0xff] %v1476_v27  ;;  %v1369_v32 = vadd.f32 %v2109_v28, %v1997_v25  ;;  %v1999_v33 = vpop.f32.mrf.mxu0 }
 0x15b   : > { %v2000_v34 = vadd.f32 %v1999_v33, %v1998_v29  ;;  %v2111_v35 = vpop.f32.mrf.mxu1  ;;  %v490_v29 = vld [vmem:[#allocation2 + $0xf0] sm:$0xff] }
 0x15c   : > { %v1477_v36 = vadd.f32 %v1369_v32, %v483_v30  ;;  %v2112_v37 = vadd.f32 %v2111_v35, %v2110_v31  ;;  %v2001_v38 = vpop.f32.mrf.mxu0 }
 0x15d   : > { %v2113_v40 = vpop.f32.mrf.mxu1 }
 0x15e   : > { %1509 = vst [vmem:[#allocation2 + $0x30] sm:$0xff] %v1477_v36  ;;  %v1372_v41 = vadd.f32 %v2112_v37, %v2000_v34  ;;  %v2002_v42 = vpop.f32.mrf.mxu0 }
 0x15f   : > { %v2003_v43 = vadd.f32 %v2002_v42, %v2001_v38  ;;  %v2114_v44 = vpop.f32.mrf.mxu1  ;;  %v491_v38 = vld [vmem:[#allocation2 + $0x8] sm:$0xff] }
 0x160   : > { %v1478_v45 = vadd.f32 %v1372_v41, %v484_v39  ;;  %v2115_v46 = vadd.f32 %v2114_v44, %v2113_v40  ;;  %v2004_v47 = vpop.f32.mrf.mxu0 }
 0x161   : > { %v2116_v49 = vpop.f32.mrf.mxu1 }
 0x162   : > { %1510 = vst [vmem:[#allocation2 + $0x48] sm:$0xff] %v1478_v45  ;;  %v1377_v50 = vadd.f32 %v2115_v46, %v2003_v43  ;;  %v2005_v51 = vpop.f32.mrf.mxu0 }
 0x163   : > { %v2006_v52 = vadd.f32 %v2005_v51, %v2004_v47  ;;  %v2117_v53 = vpop.f32.mrf.mxu1  ;;  %v492_v47 = vld [vmem:[#allocation2 + $0x78] sm:$0xff] }
 0x164   : > { %v1479_v54 = vadd.f32 %v1377_v50, %v485_v48  ;;  %v2118_v55 = vadd.f32 %v2117_v53, %v2116_v49  ;;  %v2007_v56 = vpop.f32.mrf.mxu0 }
 0x165   : > { %v2119_v58 = vpop.f32.mrf.mxu1 }
 0x166   : > { %1511 = vst [vmem:[#allocation2 + $0x80] sm:$0xff] %v1479_v54  ;;  %v1380_v59 = vadd.f32 %v2118_v55, %v2006_v52  ;;  %v2008_v60 = vpop.f32.mrf.mxu0 }
 0x167   : > { %v2009_v61 = vadd.f32 %v2008_v60, %v2007_v56  ;;  %v2120_v62 = vpop.f32.mrf.mxu1  ;;  %v493_v56 = vld [vmem:[#allocation2 + $0x38] sm:$0xff] }
 0x168   : > { %v1480_v63 = vadd.f32 %v1380_v59, %v486_v57  ;;  %v2121_v0 = vadd.f32 %v2120_v62, %v2119_v58  ;;  %v2010_v1 = vpop.f32.mrf.mxu0 }
 0x169   : > { %v2122_v3 = vpop.f32.mrf.mxu1 }
 0x16a   : > { %1512 = vst [vmem:[#allocation2 + $0x88] sm:$0xff] %v1480_v63  ;;  %v1385_v4 = vadd.f32 %v2121_v0, %v2009_v61  ;;  %v2011_v5 = vpop.f32.mrf.mxu0 }
 0x16b   : > { %v2012_v6 = vadd.f32 %v2011_v5, %v2010_v1  ;;  %v2123_v7 = vpop.f32.mrf.mxu1  ;;  %v494_v1 = vld [vmem:[#allocation2 + $0x58] sm:$0xff] }
 0x16c   : > { %v1481_v8 = vadd.f32 %v1385_v4, %v487_v2  ;;  %v2124_v9 = vadd.f32 %v2123_v7, %v2122_v3  ;;  %v2013_v10 = vpop.f32.mrf.mxu0 }
 0x16d   : > { %v2125_v12 = vpop.f32.mrf.mxu1 }
 0x16e   : > { %1513 = vst [vmem:[#allocation2 + $0xe8] sm:$0xff] %v1481_v8  ;;  %v1388_v13 = vadd.f32 %v2124_v9, %v2012_v6  ;;  %v2014_v14 = vpop.f32.mrf.mxu0 }
 0x16f   : > { %v2015_v15 = vadd.f32 %v2014_v14, %v2013_v10  ;;  %v2126_v16 = vpop.f32.mrf.mxu1  ;;  %v495_v10 = vld [vmem:[#allocation2 + $0x40] sm:$0xff] }
 0x170   : > { %v1482_v17 = vadd.f32 %v1388_v13, %v488_v11  ;;  %v2127_v18 = vadd.f32 %v2126_v16, %v2125_v12  ;;  %v2016_v19 = vpop.f32.mrf.mxu0 }
 0x171   : > { %v2128_v21 = vpop.f32.mrf.mxu1 }
 0x172   : > { %1514 = vst [vmem:[#allocation2 + $0xb8] sm:$0xff] %v1482_v17  ;;  %v1393_v22 = vadd.f32 %v2127_v18, %v2015_v15  ;;  %v2017_v23 = vpop.f32.mrf.mxu0 }
 0x173   : > { %v2018_v24 = vadd.f32 %v2017_v23, %v2016_v19  ;;  %v2129_v25 = vpop.f32.mrf.mxu1  ;;  %v496_v19 = vld [vmem:[#allocation2 + $0xc8] sm:$0xff] }
 0x174   : > { %v1483_v26 = vadd.f32 %v1393_v22, %v489_v20  ;;  %v2130_v27 = vadd.f32 %v2129_v25, %v2128_v21  ;;  %v2019_v28 = vpop.f32.mrf.mxu0 }
 0x175   : > { %v2131_v30 = vpop.f32.mrf.mxu1 }
 0x176   : > { %1515 = vst [vmem:[#allocation2 + $0x60] sm:$0xff] %v1483_v26  ;;  %v1396_v31 = vadd.f32 %v2130_v27, %v2018_v24  ;;  %v2020_v32 = vpop.f32.mrf.mxu0 }
 0x177   : > { %v2021_v33 = vadd.f32 %v2020_v32, %v2019_v28  ;;  %v2132_v34 = vpop.f32.mrf.mxu1  ;;  %v497_v28 = vld [vmem:[#allocation2 + $0xe0] sm:$0xff] }
 0x178   : > { %v1484_v35 = vadd.f32 %v1396_v31, %v490_v29  ;;  %v2133_v36 = vadd.f32 %v2132_v34, %v2131_v30  ;;  %v2022_v37 = vpop.f32.mrf.mxu0 }
 0x179   : > { %v2134_v39 = vpop.f32.mrf.mxu1 }
 0x17a   : > { %1516 = vst [vmem:[#allocation2 + $0xf0] sm:$0xff] %v1484_v35  ;;  %v1401_v40 = vadd.f32 %v2133_v36, %v2021_v33  ;;  %v2023_v41 = vpop.f32.mrf.mxu0 }
 0x17b   : > { %v2024_v42 = vadd.f32 %v2023_v41, %v2022_v37  ;;  %v2135_v43 = vpop.f32.mrf.mxu1  ;;  %v498_v37 = vld [vmem:[#allocation2 + $0x90] sm:$0xff] }
 0x17c   : > { %v1485_v44 = vadd.f32 %v1401_v40, %v491_v38  ;;  %v2136_v45 = vadd.f32 %v2135_v43, %v2134_v39  ;;  %v2025_v46 = vpop.f32.mrf.mxu0 }
 0x17d   : > { %v2137_v48 = vpop.f32.mrf.mxu1 }
 0x17e   : > { %1517 = vst [vmem:[#allocation2 + $0x8] sm:$0xff] %v1485_v44  ;;  %v1404_v49 = vadd.f32 %v2136_v45, %v2024_v42  ;;  %v2026_v50 = vpop.f32.mrf.mxu0 }
 0x17f   : > { %v2027_v51 = vadd.f32 %v2026_v50, %v2025_v46  ;;  %v2138_v52 = vpop.f32.mrf.mxu1  ;;  %v499_v46 = vld [vmem:[#allocation2 + $0x70] sm:$0xff] }
 0x180   : > { %v1486_v53 = vadd.f32 %v1404_v49, %v492_v47  ;;  %v2139_v54 = vadd.f32 %v2138_v52, %v2137_v48  ;;  %v2028_v55 = vpop.f32.mrf.mxu0 }
 0x181   : > { %v2140_v57 = vpop.f32.mrf.mxu1 }
 0x182   : > { %1518 = vst [vmem:[#allocation2 + $0x78] sm:$0xff] %v1486_v53  ;;  %v1409_v58 = vadd.f32 %v2139_v54, %v2027_v51  ;;  %v2029_v59 = vpop.f32.mrf.mxu0 }
 0x183   : > { %v2030_v60 = vadd.f32 %v2029_v59, %v2028_v55  ;;  %v2141_v61 = vpop.f32.mrf.mxu1  ;;  %v500_v55 = vld [vmem:[#allocation2 + $0xc0] sm:$0xff] }
 0x184   : > { %v1487_v62 = vadd.f32 %v1409_v58, %v493_v56  ;;  %v2142_v63 = vadd.f32 %v2141_v61, %v2140_v57  ;;  %v2031_v0 = vpop.f32.mrf.mxu0 }
 0x185   : > { %v2143_v2 = vpop.f32.mrf.mxu1 }
 0x186   : > { %1519 = vst [vmem:[#allocation2 + $0x38] sm:$0xff] %v1487_v62  ;;  %v1412_v3 = vadd.f32 %v2142_v63, %v2030_v60  ;;  %v2032_v4 = vpop.f32.mrf.mxu0 }
 0x187   : > { %v2033_v5 = vadd.f32 %v2032_v4, %v2031_v0  ;;  %v2144_v6 = vpop.f32.mrf.mxu1  ;;  %v501_v0 = vld [vmem:[#allocation2 + $0xa8] sm:$0xff] }
 0x188   : > { %v1488_v7 = vadd.f32 %v1412_v3, %v494_v1  ;;  %v2145_v8 = vadd.f32 %v2144_v6, %v2143_v2  ;;  %v2034_v9 = vpop.f32.mrf.mxu0 }
 0x189   : > { %v2146_v11 = vpop.f32.mrf.mxu1 }
 0x18a   : > { %1520 = vst [vmem:[#allocation2 + $0x58] sm:$0xff] %v1488_v7  ;;  %v1417_v12 = vadd.f32 %v2145_v8, %v2033_v5  ;;  %v2035_v13 = vpop.f32.mrf.mxu0 }
 0x18b   : > { %v2036_v14 = vadd.f32 %v2035_v13, %v2034_v9  ;;  %v2147_v15 = vpop.f32.mrf.mxu1  ;;  %v502_v9 = vld [vmem:[#allocation2 + $0xd0] sm:$0xff] }
 0x18c   : > { %v1489_v16 = vadd.f32 %v1417_v12, %v495_v10  ;;  %v2148_v17 = vadd.f32 %v2147_v15, %v2146_v11  ;;  %v2037_v18 = vpop.f32.mrf.mxu0 }
 0x18d   : > { %v2149_v20 = vpop.f32.mrf.mxu1 }
 0x18e   : > { %1521 = vst [vmem:[#allocation2 + $0x40] sm:$0xff] %v1489_v16  ;;  %v1420_v21 = vadd.f32 %v2148_v17, %v2036_v14  ;;  %v2038_v22 = vpop.f32.mrf.mxu0 }
 0x18f   : > { %v2039_v23 = vadd.f32 %v2038_v22, %v2037_v18  ;;  %v2150_v24 = vpop.f32.mrf.mxu1  ;;  %v503_v18 = vld [vmem:[#allocation2 + $0x10] sm:$0xff] }
 0x190   : > { %v1490_v25 = vadd.f32 %v1420_v21, %v496_v19  ;;  %v2151_v26 = vadd.f32 %v2150_v24, %v2149_v20  ;;  %v2040_v27 = vpop.f32.mrf.mxu0 }
 0x191   : > { %v2152_v29 = vpop.f32.mrf.mxu1 }
 0x192   : > { %1522 = vst [vmem:[#allocation2 + $0xc8] sm:$0xff] %v1490_v25  ;;  %v1425_v30 = vadd.f32 %v2151_v26, %v2039_v23  ;;  %v2041_v31 = vpop.f32.mrf.mxu0 }
 0x193   : > { %v2042_v32 = vadd.f32 %v2041_v31, %v2040_v27  ;;  %v2153_v33 = vpop.f32.mrf.mxu1  ;;  %v504_v27 = vld [vmem:[#allocation2 + $0x28] sm:$0xff] }
 0x194   : > { %v1491_v34 = vadd.f32 %v1425_v30, %v497_v28  ;;  %v2154_v35 = vadd.f32 %v2153_v33, %v2152_v29  ;;  %v2043_v36 = vpop.f32.mrf.mxu0 }
 0x195   : > { %v2155_v38 = vpop.f32.mrf.mxu1 }
 0x196   : > { %1523 = vst [vmem:[#allocation2 + $0xe0] sm:$0xff] %v1491_v34  ;;  %v1428_v39 = vadd.f32 %v2154_v35, %v2042_v32  ;;  %v2044_v40 = vpop.f32.mrf.mxu0 }
 0x197   : > { %v2045_v41 = vadd.f32 %v2044_v40, %v2043_v36  ;;  %v2156_v42 = vpop.f32.mrf.mxu1  ;;  %v505_v36 = vld [vmem:[#allocation2 + $0xa0] sm:$0xff] }
 0x198   : > { %v1492_v43 = vadd.f32 %v1428_v39, %v498_v37  ;;  %v2157_v44 = vadd.f32 %v2156_v42, %v2155_v38  ;;  %v2046_v45 = vpop.f32.mrf.mxu0 }
 0x199   : > { %v2158_v47 = vpop.f32.mrf.mxu1 }
 0x19a   : > { %1524 = vst [vmem:[#allocation2 + $0x90] sm:$0xff] %v1492_v43  ;;  %v1433_v48 = vadd.f32 %v2157_v44, %v2045_v41  ;;  %v2047_v49 = vpop.f32.mrf.mxu0 }
 0x19b   : > { %v2048_v50 = vadd.f32 %v2047_v49, %v2046_v45  ;;  %v2159_v51 = vpop.f32.mrf.mxu1  ;;  %v506_v45 = vld [vmem:[#allocation2 + $0xf8] sm:$0xff] }
 0x19c   : > { %v1493_v52 = vadd.f32 %v1433_v48, %v499_v46  ;;  %v2160_v53 = vadd.f32 %v2159_v51, %v2158_v47  ;;  %v2049_v54 = vpop.f32.mrf.mxu0 }
 0x19d   : > { %v2161_v56 = vpop.f32.mrf.mxu1 }
 0x19e   : > { %1525 = vst [vmem:[#allocation2 + $0x70] sm:$0xff] %v1493_v52  ;;  %v1436_v57 = vadd.f32 %v2160_v53, %v2048_v50  ;;  %v2050_v58 = vpop.f32.mrf.mxu0 }
 0x19f   : > { %v2051_v59 = vadd.f32 %v2050_v58, %v2049_v54  ;;  %v2162_v60 = vpop.f32.mrf.mxu1  ;;  %v507_v54 = vld [vmem:[#allocation2 + $0x20] sm:$0xff] }
 0x1a0   : > { %v1494_v61 = vadd.f32 %v1436_v57, %v500_v55  ;;  %v2163_v62 = vadd.f32 %v2162_v60, %v2161_v56  ;;  %v2052_v63 = vpop.f32.mrf.mxu0 }
 0x1a1   : > { %v2164_v1 = vpop.f32.mrf.mxu1 }
 0x1a2   : > { %1526 = vst [vmem:[#allocation2 + $0xc0] sm:$0xff] %v1494_v61  ;;  %v1441_v2 = vadd.f32 %v2163_v62, %v2051_v59  ;;  %v2053_v3 = vpop.f32.mrf.mxu0  ;;  %v508_v62 = vld [vmem:[#allocation2 + $0x98] sm:$0xff] }
 0x1a3   : > { %v2054_v4 = vadd.f32 %v2053_v3, %v2052_v63  ;;  %v2165_v5 = vpop.f32.mrf.mxu1 }
 0x1a4   : > { %v1495_v6 = vadd.f32 %v1441_v2, %v501_v0  ;;  %v2166_v7 = vadd.f32 %v2165_v5, %v2164_v1  ;;  %v2055_v8 = vpop.f32.mrf.mxu0 }
 0x1a5   : > { %v2167_v10 = vpop.f32.mrf.mxu1 }
 0x1a6   : > { %1527 = vst [vmem:[#allocation2 + $0xa8] sm:$0xff] %v1495_v6  ;;  %v1444_v11 = vadd.f32 %v2166_v7, %v2054_v4  ;;  %v2056_v12 = vpop.f32.mrf.mxu0 }
 0x1a7   : > { %v2057_v13 = vadd.f32 %v2056_v12, %v2055_v8  ;;  %v2168_v14 = vpop.f32.mrf.mxu1 }
 0x1a8   : > { %v1496_v15 = vadd.f32 %v1444_v11, %v502_v9  ;;  %v2169_v16 = vadd.f32 %v2168_v14, %v2167_v10  ;;  %v2058_v17 = vpop.f32.mrf.mxu0 }
 0x1a9   : > { %v2170_v19 = vpop.f32.mrf.mxu1 }
 0x1aa   : > { %1528 = vst [vmem:[#allocation2 + $0xd0] sm:$0xff] %v1496_v15  ;;  %v1449_v20 = vadd.f32 %v2169_v16, %v2057_v13  ;;  %v2059_v21 = vpop.f32.mrf.mxu0 }
 0x1ab   : > { %v2060_v22 = vadd.f32 %v2059_v21, %v2058_v17  ;;  %v2171_v23 = vpop.f32.mrf.mxu1 }
 0x1ac   : > { %v1497_v24 = vadd.f32 %v1449_v20, %v503_v18  ;;  %v2172_v25 = vadd.f32 %v2171_v23, %v2170_v19  ;;  %v2061_v26 = vpop.f32.mrf.mxu0 }
 0x1ad   : > { %v2173_v28 = vpop.f32.mrf.mxu1 }
 0x1ae   : > { %1529 = vst [vmem:[#allocation2 + $0x10] sm:$0xff] %v1497_v24  ;;  %v1452_v29 = vadd.f32 %v2172_v25, %v2060_v22  ;;  %v2062_v30 = vpop.f32.mrf.mxu0 }
 0x1af   : > { %v2063_v31 = vadd.f32 %v2062_v30, %v2061_v26  ;;  %v2174_v32 = vpop.f32.mrf.mxu1 }
 0x1b0   : > { %v1498_v33 = vadd.f32 %v1452_v29, %v504_v27  ;;  %v2175_v34 = vadd.f32 %v2174_v32, %v2173_v28  ;;  %v2064_v35 = vpop.f32.mrf.mxu0 }
 0x1b1   : > { %v2176_v37 = vpop.f32.mrf.mxu1 }
 0x1b2   : > { %1530 = vst [vmem:[#allocation2 + $0x28] sm:$0xff] %v1498_v33  ;;  %v1457_v38 = vadd.f32 %v2175_v34, %v2063_v31  ;;  %v2065_v39 = vpop.f32.mrf.mxu0 }
 0x1b3   : > { %v2066_v40 = vadd.f32 %v2065_v39, %v2064_v35  ;;  %v2177_v41 = vpop.f32.mrf.mxu1 }
 0x1b4   : > { %v1499_v42 = vadd.f32 %v1457_v38, %v505_v36  ;;  %v2178_v43 = vadd.f32 %v2177_v41, %v2176_v37  ;;  %v2067_v44 = vpop.f32.mrf.mxu0 }
 0x1b5   : > { %v2179_v46 = vpop.f32.mrf.mxu1 }
 0x1b6   : > { %1531 = vst [vmem:[#allocation2 + $0xa0] sm:$0xff] %v1499_v42  ;;  %v1460_v47 = vadd.f32 %v2178_v43, %v2066_v40  ;;  %v2068_v48 = vpop.f32.mrf.mxu0 }
 0x1b7   : > { %v2069_v49 = vadd.f32 %v2068_v48, %v2067_v44  ;;  %v2180_v50 = vpop.f32.mrf.mxu1 }
 0x1b8   : > { %v1500_v51 = vadd.f32 %v1460_v47, %v506_v45  ;;  %v2181_v52 = vadd.f32 %v2180_v50, %v2179_v46  ;;  %v2070_v53 = vpop.f32.mrf.mxu0 }
 0x1b9   : > { %v2182_v55 = vpop.f32.mrf.mxu1 }
 0x1ba   : > { %1532 = vst [vmem:[#allocation2 + $0xf8] sm:$0xff] %v1500_v51  ;;  %v1465_v56 = vadd.f32 %v2181_v52, %v2069_v49  ;;  %v2071_v57 = vpop.f32.mrf.mxu0 }
 0x1bb   : > { %v2072_v58 = vadd.f32 %v2071_v57, %v2070_v53  ;;  %v2183_v59 = vpop.f32.mrf.mxu1 }
 0x1bc   : > { %v1501_v60 = vadd.f32 %v1465_v56, %v507_v54  ;;  %v2184_v61 = vadd.f32 %v2183_v59, %v2182_v55 }
 0x1be   : > { %1533 = vst [vmem:[#allocation2 + $0x20] sm:$0xff] %v1501_v60  ;;  %v1468_v63 = vadd.f32 %v2184_v61, %v2072_v58  ;;  %1538 = sbr.rel (%p1956_p13) target bundleno = 482 (0x1e2), region = 67 }
 0x1c0   : > { %v1502_v0 = vadd.f32 %v1468_v63, %v508_v62 }
 0x1c2   : > { %1534 = vst [vmem:[#allocation2 + $0x98] sm:$0xff] %v1502_v0 }
 0x1c3   : > { %v1539_v1 = vld [vmem:[#allocation2 + $0xb0] sm:$0xff]  ;;  %v2763_v2 = vld [vmem:[%s2889_s2] ss:$0 sm:$0xff]  ;;  %v1541_v6 = vld [vmem:[#allocation2 + $0xd8] sm:$0xff] }
 0x1c4   : > { %v2768_v3 = vld [vmem:[%s2890_s3] ss:$0 sm:$0xff]  ;;  %v1578_v4 = vmul.f32 %v2763_v2, %v1539_v1  ;;  %v1542_v7 = vld [vmem:[#allocation2 + $0x18] sm:$0xff]  ;;  %v1580_v9 = vmul.f32 %v2763_v2, %v1541_v6  ;;  %v1543_v11 = vld [vmem:[#allocation2 + $0x50] sm:$0xff] }
 0x1c5   : > { %v1540_v5 = vld [vmem:[#allocation2] sm:$0xff]  ;;  %v1581_v10 = vmul.f32 %v2763_v2, %v1542_v7  ;;  %v1544_v12 = vld [vmem:[#allocation2 + $0x68] sm:$0xff]  ;;  %v1545_v13 = vld [vmem:[#allocation2 + $0x30] sm:$0xff]  ;;  %v1582_v15 = vmul.f32 %v2763_v2, %v1543_v11 }
 0x1c6   : > { %v1579_v8 = vmul.f32 %v2763_v2, %v1540_v5  ;;  %v1617_v14 = vadd.f32 %v2768_v3, %v1578_v4  ;;  %v1583_v16 = vmul.f32 %v2763_v2, %v1544_v12  ;;  %v1584_v17 = vmul.f32 %v2763_v2, %v1545_v13  ;;  %v1546_v18 = vld [vmem:[#allocation2 + $0x48] sm:$0xff]  ;;  %v1547_v23 = vld [vmem:[#allocation2 + $0x80] sm:$0xff]  ;;  %v1550_v30 = vld [vmem:[#allocation2 + $0xb8] sm:$0xff] }
 0x1c7   : > { %v1619_v20 = vadd.f32 %v2768_v3, %v1580_v9  ;;  %v1620_v21 = vadd.f32 %v2768_v3, %v1581_v10  ;;  %v1585_v22 = vmul.f32 %v2763_v2, %v1546_v18  ;;  %v1621_v25 = vadd.f32 %v2768_v3, %v1582_v15  ;;  %v1548_v28 = vld [vmem:[#allocation2 + $0x88] sm:$0xff]  ;;  %v1551_v35 = vld [vmem:[#allocation2 + $0x60] sm:$0xff]  ;;  %v1552_v36 = vld [vmem:[#allocation2 + $0xf0] sm:$0xff] }
 0x1c8   : > { %v1618_v19 = vadd.f32 %v2768_v3, %v1579_v8  ;;  %v1649_v24 = vmax.f32 %v1617_v14, 0.0  ;;  %v1622_v26 = vadd.f32 %v2768_v3, %v1583_v16  ;;  %v1623_v27 = vadd.f32 %v2768_v3, %v1584_v17  ;;  %v1549_v29 = vld [vmem:[#allocation2 + $0xe8] sm:$0xff]  ;;  %v1554_v42 = vld [vmem:[#allocation2 + $0x78] sm:$0xff]  ;;  %v1557_v61 = vld [vmem:[#allocation2 + $0x40] sm:$0xff] }
 0x1c9   : > { %v1651_v32 = vmax.f32 %v1619_v20, 0.0  ;;  %v1652_v33 = vmax.f32 %v1620_v21, 0.0  ;;  %v1624_v34 = vadd.f32 %v2768_v3, %v1585_v22  ;;  %v1553_v37 = vld [vmem:[#allocation2 + $0x8] sm:$0xff]  ;;  %v1653_v38 = vmax.f32 %v1621_v25, 0.0  ;;  %v1555_v55 = vld [vmem:[#allocation2 + $0x38] sm:$0xff]  ;;  %v1559_v5 = vld [vmem:[#allocation2 + $0xe0] sm:$0xff] }
 0x1ca   : > { %v1650_v31 = vmax.f32 %v1618_v19, 0.0  ;;  %1681 = vst [vmem:[%s2658_s8] sm:$0xff] %v1649_v24  ;;  %v1654_v39 = vmax.f32 %v1622_v26, 0.0  ;;  %v1655_v40 = vmax.f32 %v1623_v27, 0.0  ;;  %v1586_v41 = vmul.f32 %v2763_v2, %v1547_v23  ;;  %v1556_v60 = vld [vmem:[#allocation2 + $0x58] sm:$0xff]  ;;  %v1558_v62 = vld [vmem:[#allocation2 + $0xc8] sm:$0xff]  ;;  %v1560_v6 = vld [vmem:[#allocation2 + $0x90] sm:$0xff] }
 0x1cb   : > { %1683 = vst [vmem:[%s2658_s8 + $0x10] sm:$0xff] %v1651_v32  ;;  %1684 = vst [vmem:[%s2658_s8 + $0x18] sm:$0xff] %v1652_v33  ;;  %v1656_v43 = vmax.f32 %v1624_v34, 0.0  ;;  %v1587_v44 = vmul.f32 %v2763_v2, %v1548_v28  ;;  %v1588_v45 = vmul.f32 %v2763_v2, %v1549_v29  ;;  %v1589_v46 = vmul.f32 %v2763_v2, %v1550_v30  ;;  %v1561_v7 = vld [vmem:[#allocation2 + $0x70] sm:$0xff]  ;;  %v1562_v12 = vld [vmem:[#allocation2 + $0xc0] sm:$0xff] }
 0x1cc   : > { %1682 = vst [vmem:[%s2658_s8 + $0x8] sm:$0xff] %v1650_v31  ;;  %1685 = vst [vmem:[%s2658_s8 + $0x20] sm:$0xff] %v1653_v38  ;;  %v1625_v47 = vadd.f32 %v2768_v3, %v1586_v41  ;;  %v1590_v48 = vmul.f32 %v2763_v2, %v1551_v35  ;;  %v1591_v49 = vmul.f32 %v2763_v2, %v1552_v36  ;;  %v1563_v25 = vld [vmem:[#allocation2 + $0xa8] sm:$0xff]  ;;  %v1564_v30 = vld [vmem:[#allocation2 + $0xd0] sm:$0xff] }
 0x1cd   : > { %1686 = vst [vmem:[%s2658_s8 + $0x28] sm:$0xff] %v1654_v39  ;;  %1687 = vst [vmem:[%s2658_s8 + $0x30] sm:$0xff] %v1655_v40  ;;  %v1592_v50 = vmul.f32 %v2763_v2, %v1553_v37  ;;  %v1626_v51 = vadd.f32 %v2768_v3, %v1587_v44  ;;  %v1627_v52 = vadd.f32 %v2768_v3, %v1588_v45  ;;  %v1565_v31 = vld [vmem:[#allocation2 + $0x10] sm:$0xff]  ;;  %v1566_v32 = vld [vmem:[#allocation2 + $0x28] sm:$0xff] }
 0x1ce   : > { %1688 = vst [vmem:[%s2658_s8 + $0x38] sm:$0xff] %v1656_v43  ;;  %v1628_v53 = vadd.f32 %v2768_v3, %v1589_v46  ;;  %v1593_v54 = vmul.f32 %v2763_v2, %v1554_v42  ;;  %v1657_v56 = vmax.f32 %v1625_v47, 0.0  ;;  %v1629_v57 = vadd.f32 %v2768_v3, %v1590_v48  ;;  %v1567_v37 = vld [vmem:[#allocation2 + $0xa0] sm:$0xff]  ;;  %v1568_v38 = vld [vmem:[#allocation2 + $0xf8] sm:$0xff] }
 0x1cf   : > { %v1630_v58 = vadd.f32 %v2768_v3, %v1591_v49  ;;  %v1631_v59 = vadd.f32 %v2768_v3, %v1592_v50  ;;  %v1658_v63 = vmax.f32 %v1626_v51, 0.0  ;;  %v1659_v0 = vmax.f32 %v1627_v52, 0.0  ;;  %v1569_v39 = vld [vmem:[#allocation2 + $0x20] sm:$0xff]  ;;  %v1570_v44 = vld [vmem:[#allocation2 + $0x98] sm:$0xff] }
 0x1d0   : > { %v1660_v1 = vmax.f32 %v1628_v53, 0.0  ;;  %v1632_v4 = vadd.f32 %v2768_v3, %v1593_v54  ;;  %1689 = vst [vmem:[%s2658_s8 + $0x40] sm:$0xff] %v1657_v56  ;;  %v1661_v8 = vmax.f32 %v1629_v57, 0.0  ;;  %v1594_v11 = vmul.f32 %v2763_v2, %v1555_v55 }
 0x1d1   : > { %v1662_v9 = vmax.f32 %v1630_v58, 0.0  ;;  %v1663_v10 = vmax.f32 %v1631_v59, 0.0  ;;  %1690 = vst [vmem:[%s2658_s8 + $0x48] sm:$0xff] %v1658_v63  ;;  %1691 = vst [vmem:[%s2658_s8 + $0x50] sm:$0xff] %v1659_v0  ;;  %v1595_v14 = vmul.f32 %v2763_v2, %v1556_v60  ;;  %v1596_v15 = vmul.f32 %v2763_v2, %v1557_v61 }
 0x1d2   : > { %1692 = vst [vmem:[%s2658_s8 + $0x58] sm:$0xff] %v1660_v1  ;;  %v1664_v13 = vmax.f32 %v1632_v4, 0.0  ;;  %v1597_v16 = vmul.f32 %v2763_v2, %v1558_v62  ;;  %1693 = vst [vmem:[%s2658_s8 + $0x60] sm:$0xff] %v1661_v8  ;;  %v1633_v17 = vadd.f32 %v2768_v3, %v1594_v11  ;;  %v1598_v18 = vmul.f32 %v2763_v2, %v1559_v5 }
 0x1d3   : > { %1694 = vst [vmem:[%s2658_s8 + $0x68] sm:$0xff] %v1662_v9  ;;  %1695 = vst [vmem:[%s2658_s8 + $0x70] sm:$0xff] %v1663_v10  ;;  %v1599_v19 = vmul.f32 %v2763_v2, %v1560_v6  ;;  %v1600_v20 = vmul.f32 %v2763_v2, %v1561_v7  ;;  %v1634_v21 = vadd.f32 %v2768_v3, %v1595_v14 }
 0x1d4   : > { %1696 = vst [vmem:[%s2658_s8 + $0x78] sm:$0xff] %v1664_v13  ;;  %v1635_v22 = vadd.f32 %v2768_v3, %v1596_v15  ;;  %v1636_v23 = vadd.f32 %v2768_v3, %v1597_v16  ;;  %v1601_v24 = vmul.f32 %v2763_v2, %v1562_v12  ;;  %v1665_v26 = vmax.f32 %v1633_v17, 0.0 }
 0x1d5   : > { %v1637_v27 = vadd.f32 %v2768_v3, %v1598_v18  ;;  %v1638_v28 = vadd.f32 %v2768_v3, %v1599_v19  ;;  %v1639_v29 = vadd.f32 %v2768_v3, %v1600_v20  ;;  %v1666_v33 = vmax.f32 %v1634_v21, 0.0 }
 0x1d6   : > { %v1667_v34 = vmax.f32 %v1635_v22, 0.0  ;;  %v1668_v35 = vmax.f32 %v1636_v23, 0.0  ;;  %v1640_v36 = vadd.f32 %v2768_v3, %v1601_v24  ;;  %1697 = vst [vmem:[%s2658_s8 + $0x80] sm:$0xff] %v1665_v26  ;;  %v1602_v43 = vmul.f32 %v2763_v2, %v1563_v25 }
 0x1d7   : > { %v1669_v40 = vmax.f32 %v1637_v27, 0.0  ;;  %v1670_v41 = vmax.f32 %v1638_v28, 0.0  ;;  %v1671_v42 = vmax.f32 %v1639_v29, 0.0  ;;  %1698 = vst [vmem:[%s2658_s8 + $0x88] sm:$0xff] %v1666_v33  ;;  %v1603_v46 = vmul.f32 %v2763_v2, %v1564_v30 }
 0x1d8   : > { %1699 = vst [vmem:[%s2658_s8 + $0x90] sm:$0xff] %v1667_v34  ;;  %1700 = vst [vmem:[%s2658_s8 + $0x98] sm:$0xff] %v1668_v35  ;;  %v1672_v45 = vmax.f32 %v1640_v36, 0.0  ;;  %v1604_v47 = vmul.f32 %v2763_v2, %v1565_v31  ;;  %v1605_v48 = vmul.f32 %v2763_v2, %v1566_v32  ;;  %v1641_v49 = vadd.f32 %v2768_v3, %v1602_v43 }
 0x1d9   : > { %1701 = vst [vmem:[%s2658_s8 + $0xa0] sm:$0xff] %v1669_v40  ;;  %1702 = vst [vmem:[%s2658_s8 + $0xa8] sm:$0xff] %v1670_v41  ;;  %v1606_v50 = vmul.f32 %v2763_v2, %v1567_v37  ;;  %v1607_v51 = vmul.f32 %v2763_v2, %v1568_v38  ;;  %v1608_v52 = vmul.f32 %v2763_v2, %v1569_v39 }
 0x1da   : > { %1703 = vst [vmem:[%s2658_s8 + $0xb0] sm:$0xff] %v1671_v42  ;;  %1704 = vst [vmem:[%s2658_s8 + $0xb8] sm:$0xff] %v1672_v45  ;;  %v1642_v53 = vadd.f32 %v2768_v3, %v1603_v46  ;;  %v1643_v54 = vadd.f32 %v2768_v3, %v1604_v47  ;;  %v1644_v55 = vadd.f32 %v2768_v3, %v1605_v48  ;;  %v1673_v57 = vmax.f32 %v1641_v49, 0.0 }
 0x1db   : > { %v1609_v56 = vmul.f32 %v2763_v2, %v1570_v44  ;;  %v1645_v58 = vadd.f32 %v2768_v3, %v1606_v50  ;;  %v1646_v59 = vadd.f32 %v2768_v3, %v1607_v51  ;;  %v1647_v60 = vadd.f32 %v2768_v3, %v1608_v52 }
 0x1dc   : > { %v1674_v61 = vmax.f32 %v1642_v53, 0.0  ;;  %v1675_v62 = vmax.f32 %v1643_v54, 0.0  ;;  %v1676_v63 = vmax.f32 %v1644_v55, 0.0  ;;  %1705 = vst [vmem:[%s2658_s8 + $0xc0] sm:$0xff] %v1673_v57 }
 0x1dd   : > { %v1648_v0 = vadd.f32 %v2768_v3, %v1609_v56  ;;  %v1677_v1 = vmax.f32 %v1645_v58, 0.0  ;;  %v1678_v4 = vmax.f32 %v1646_v59, 0.0  ;;  %v1679_v2 = vmax.f32 %v1647_v60, 0.0 }
 0x1de   : > { %1706 = vst [vmem:[%s2658_s8 + $0xc8] sm:$0xff] %v1674_v61  ;;  %1707 = vst [vmem:[%s2658_s8 + $0xd0] sm:$0xff] %v1675_v62 }
 0x1df   : > { %1708 = vst [vmem:[%s2658_s8 + $0xd8] sm:$0xff] %v1676_v63  ;;  %v1680_v5 = vmax.f32 %v1648_v0, 0.0  ;;  %1709 = vst [vmem:[%s2658_s8 + $0xe0] sm:$0xff] %v1677_v1 }
 0x1e0   : > { %1710 = vst [vmem:[%s2658_s8 + $0xe8] sm:$0xff] %v1678_v4  ;;  %1711 = vst [vmem:[%s2658_s8 + $0xf0] sm:$0xff] %v1679_v2 }
 0x1e1   : > { %1712 = vst [vmem:[%s2658_s8 + $0xf8] sm:$0xff] %v1680_v5 }
 0x1e2 PF: > { %s14_s21 = sadd.s32 1, %s2425_s21   ;;  %s2892_s15 = smov %s2405_s16 }
 0x1e3   : > { %p11_p0 = scmp.ge.s32.totalorder %s14_s21, 16   ;;  %s2893_s16 = smov %s2504_s28 }
 0x1e4   : > { %s2894_s17 = smov %s2417_s19  ;;  %s2895_s18 = smov %s2421_s20 }
 0x1e5   : > { %s2896_s19 = smov %s2899_s22  ;;  %s2897_s20 = smov %s2903_s23 }
 0x1e6   :  { %13 = sbr.rel (!%p11_p0) target bundleno = 4 (0x4), region = 111 }

// kernel: ifcnn_forward.25
= control target key start
LH: loop header
LB: loop body
LE: loop exit
PB: predicated region body
PF: predicated region fallthrough
CT: control target
= control target key end

     0   :  { %s995_s1 = inlined_call_operand.vmem [shape: bf16[640,128], index: 1, kind: input, shape index: {}]   ;;  %s996_s0 = inlined_call_operand.vmem [shape: bf16[32,640], index: 0, kind: input, shape index: {}]   ;;  %s997_s2 = inlined_call_operand.vmem [shape: f32[1,128], index: 2, kind: input, shape index: {}]   ;;  %s998_s3 = inlined_call_operand.vmem [shape: f32[1,128], index: 3, kind: input, shape index: {}]   ;;  %s999_s4 = inlined_call_operand.vmem [shape: f32[32,128], index: 4, kind: output, shape index: {}]  }
   0x1   :  { %v748_v0 = vld [vmem:[%s995_s1 + $0x78] sm:$0xff]   ;;  %v752_v4 = vld [vmem:[%s995_s1 + $0x70] sm:$0xff]   ;;  %v756_v8 = vld [vmem:[%s995_s1 + $0x68] sm:$0xff]  }
   0x2   :  { %v749_v1 = vld [vmem:[%s995_s1 + $0xf8] sm:$0xff]   ;;  %662 = vmatprep.subr.bf16.mxu0 %v748_v0  ;;  %v753_v5 = vld [vmem:[%s995_s1 + $0xf0] sm:$0xff]   ;;  %v757_v9 = vld [vmem:[%s995_s1 + $0xe8] sm:$0xff]  }
   0x3   :  { %v750_v2 = vld [vmem:[%s995_s1 + $0x38] sm:$0xff]   ;;  %690 = vmatprep.subr.bf16.mxu1 %v749_v1  ;;  %v754_v6 = vld [vmem:[%s995_s1 + $0x30] sm:$0xff]   ;;  %v758_v10 = vld [vmem:[%s995_s1 + $0x28] sm:$0xff]  }
   0x4   :  { %v751_v3 = vld [vmem:[%s995_s1 + $0xb8] sm:$0xff]   ;;  %663 = vmatpush3.bf16.msra.mxu0 %v750_v2  ;;  %v755_v7 = vld [vmem:[%s995_s1 + $0xb0] sm:$0xff]   ;;  %v759_v11 = vld [vmem:[%s995_s1 + $0xa8] sm:$0xff]  }
   0x5   :  { %691 = vmatpush3.bf16.msra.mxu1 %v751_v3  ;;  %664 = vmatprep.subr.bf16.mxu0 %v752_v4  ;;  %v760_v12 = vld [vmem:[%s995_s1 + $0x60] sm:$0xff]   ;;  %v764_v16 = vld [vmem:[%s995_s1 + $0x58] sm:$0xff]   ;;  %v768_v20 = vld [vmem:[%s995_s1 + $0x50] sm:$0xff]  }
   0x6   :  { %692 = vmatprep.subr.bf16.mxu1 %v753_v5  ;;  %v761_v13 = vld [vmem:[%s995_s1 + $0xe0] sm:$0xff]   ;;  %v765_v17 = vld [vmem:[%s995_s1 + $0xd8] sm:$0xff]   ;;  %v769_v21 = vld [vmem:[%s995_s1 + $0xd0] sm:$0xff]  }
   0x7   :  { %v762_v14 = vld [vmem:[%s995_s1 + $0x20] sm:$0xff]   ;;  %v766_v18 = vld [vmem:[%s995_s1 + $0x18] sm:$0xff]   ;;  %v770_v22 = vld [vmem:[%s995_s1 + $0x10] sm:$0xff]  }
   0x8   :  { %665 = vmatpush3.bf16.msra.mxu0 %v754_v6  ;;  %v763_v15 = vld [vmem:[%s995_s1 + $0xa0] sm:$0xff]   ;;  %v767_v19 = vld [vmem:[%s995_s1 + $0x98] sm:$0xff]   ;;  %v771_v23 = vld [vmem:[%s995_s1 + $0x90] sm:$0xff]  }
   0x9   :  { %693 = vmatpush3.bf16.msra.mxu1 %v755_v7  ;;  %666 = vmatprep.subr.bf16.mxu0 %v756_v8  ;;  %v772_v24 = vld [vmem:[%s995_s1 + $0x48] sm:$0xff]   ;;  %v776_v28 = vld [vmem:[%s995_s1 + $0x40] sm:$0xff]   ;;  %v786_v36 = vld [vmem:[%s995_s1 + $0x138] sm:$0xff]  }
   0xa   :  { %694 = vmatprep.subr.bf16.mxu1 %v757_v9  ;;  %v773_v25 = vld [vmem:[%s995_s1 + $0xc8] sm:$0xff]   ;;  %v777_v29 = vld [vmem:[%s995_s1 + $0xc0] sm:$0xff]   ;;  %v787_v37 = vld [vmem:[%s995_s1 + $0x130] sm:$0xff]  }
   0xb   :  { %v774_v26 = vld [vmem:[%s995_s1 + $0x8] sm:$0xff]   ;;  %v778_v30 = vld [vmem:[%s995_s1] sm:$0xff]   ;;  %v790_v45 = vld [vmem:[%s995_s1 + $0x118] sm:$0xff]  }
   0xc   :  { %667 = vmatpush3.bf16.msra.mxu0 %v758_v10  ;;  %v775_v27 = vld [vmem:[%s995_s1 + $0x88] sm:$0xff]   ;;  %v779_v31 = vld [vmem:[%s995_s1 + $0x80] sm:$0xff]   ;;  %v797_v46 = vld [vmem:[%s995_s1 + $0x110] sm:$0xff]  }
   0xd   :  { %695 = vmatpush3.bf16.msra.mxu1 %v759_v11  ;;  %668 = vmatprep.subr.bf16.mxu0 %v760_v12  ;;  %v780_v32 = vld [vmem:[%s996_s0] ss:$20 sps:$4 sm:$0xff]   ;;  %v782_v33 = vld [vmem:[%s996_s0 + $0x4] ss:$20 sps:$4 sm:$0xff]   ;;  %v783_v34 = vld [vmem:[%s996_s0 + $0x8] ss:$20 sps:$4 sm:$0xff]  }
   0xe   :  { %696 = vmatprep.subr.bf16.mxu1 %v761_v13  ;;  %v785_v35 = vld [vmem:[%s996_s0 + $0xc] ss:$20 sps:$4 sm:$0xff]   ;;  %446 = vmatprep.mubr.bf16.mxu0 %v782_v33  ;;  %v793_v40 = vld [vmem:[%s996_s0 + $0x34] ss:$20 sps:$4 sm:$0xff]   ;;  %v796_v42 = vld [vmem:[%s996_s0 + $0x30] ss:$20 sps:$4 sm:$0xff]  }
   0xf   :  { %495 = vmatprep.mubr.bf16.mxu1 %v785_v35  ;;  %v788_v38 = vld [vmem:[%s995_s1 + $0x128] sm:$0xff]   ;;  %v789_v43 = vld [vmem:[%s995_s1 + $0x120] sm:$0xff]  }
  0x10   :  { %669 = vmatpush3.bf16.msra.mxu0 %v762_v14  ;;  %v791_v39 = vld [vmem:[%s996_s0 + $0x2c] ss:$20 sps:$4 sm:$0xff]   ;;  %v795_v41 = vld [vmem:[%s996_s0 + $0x28] ss:$20 sps:$4 sm:$0xff]   ;;  %v800_v44 = vld [vmem:[%s996_s0 + $0x10] ss:$20 sps:$4 sm:$0xff]  }
  0x11   :  { %697 = vmatpush3.bf16.msra.mxu1 %v763_v15  ;;  %670 = vmatprep.subr.bf16.mxu0 %v764_v16  ;;  %v798_v47 = vld [vmem:[%s995_s1 + $0x108] sm:$0xff]   ;;  %v799_v48 = vld [vmem:[%s995_s1 + $0x100] sm:$0xff]  }
  0x12   :  { %698 = vmatprep.subr.bf16.mxu1 %v765_v17  ;;  %v801_v49 = vld [vmem:[%s996_s0 + $0x38] ss:$20 sps:$4 sm:$0xff]   ;;  %v660_v10 = vld [vmem:[%s997_s2] ss:$0 sm:$0xff] }
  0x13   :  { %v661_v15 = vld [vmem:[%s998_s3] ss:$0 sm:$0xff] }
  0x14   :  { %671 = vmatpush3.bf16.msra.mxu0 %v766_v18 }
  0x15   :  { %699 = vmatpush3.bf16.msra.mxu1 %v767_v19  ;;  %672 = vmatprep.subr.bf16.mxu0 %v768_v20 }
  0x16   :  { %700 = vmatprep.subr.bf16.mxu1 %v769_v21 }
  0x18   :  { %673 = vmatpush3.bf16.msra.mxu0 %v770_v22 }
  0x19   :  { %701 = vmatpush3.bf16.msra.mxu1 %v771_v23  ;;  %674 = vmatprep.subr.bf16.mxu0 %v772_v24 }
  0x1a   :  { %702 = vmatprep.subr.bf16.mxu1 %v773_v25 }
  0x1c   :  { %675 = vmatpush3.bf16.msra.mxu0 %v774_v26 }
  0x1d   :  { %703 = vmatpush3.bf16.msra.mxu1 %v775_v27  ;;  %676 = vmatprep.subr.bf16.mxu0 %v776_v28 }
  0x1e   :  { %704 = vmatprep.subr.bf16.mxu1 %v777_v29 }
  0x20   :  { %677 = vmatpush3.bf16.msra.mxu0 %v778_v30 }
  0x21   :  { %705 = vmatpush3.bf16.msra.mxu1 %v779_v31  ;;  %728 = vmatprep.subr.bf16.mxu0 %v786_v36 }
  0x23   :  { %447 = vmatmul.mubr.bf16.vlgmr.msra.gmra.mxu0 %v780_v32 }
  0x24   :  { %496 = vmatmul.mubr.bf16.vlgmr.msra.gmra.mxu1 %v783_v34  ;;  %729 = vmatpush3.bf16.msra.mxu0 %v786_v36 }
  0x25   :  { %730 = vmatprep.subr.bf16.mxu0 %v787_v37  ;;  %454 = vmatprep.mubr.bf16.mxu0 %v791_v39 }
  0x26   :  { %503 = vmatprep.mubr.bf16.mxu1 %v793_v40 }
  0x28   :  { %731 = vmatpush3.bf16.msra.mxu0 %v787_v37 }
  0x29   :  { %732 = vmatprep.subr.bf16.mxu0 %v788_v38 }
  0x2b   :  { %455 = vmatmul.mubr.bf16.gmra.mxu0 %v795_v41 }
  0x2c   :  { %504 = vmatmul.mubr.bf16.gmra.mxu1 %v796_v42  ;;  %733 = vmatpush3.bf16.msra.mxu0 %v788_v38 }
  0x2d   :  { %734 = vmatprep.subr.bf16.mxu0 %v789_v43  ;;  %744 = vmatprep.mubr.bf16.mxu0 %v800_v44 }
  0x30   :  { %735 = vmatpush3.bf16.msra.mxu0 %v789_v43 }
  0x31   :  { %736 = vmatprep.subr.bf16.mxu0 %v790_v45 }
  0x34   :  { %737 = vmatpush3.bf16.msra.mxu0 %v790_v45 }
  0x35   :  { %738 = vmatprep.subr.bf16.mxu0 %v797_v46 }
  0x38   :  { %739 = vmatpush3.bf16.msra.mxu0 %v797_v46 }
  0x39   :  { %740 = vmatprep.subr.bf16.mxu0 %v798_v47 }
  0x3c   :  { %741 = vmatpush3.bf16.msra.mxu0 %v798_v47 }
  0x3d   :  { %742 = vmatprep.subr.bf16.mxu0 %v799_v48 }
  0x40   :  { %743 = vmatpush3.bf16.msra.mxu0 %v799_v48 }
  0x43   :  { %745 = vmatmul.mubr.bf16.vlgmr.msra.gmra.mxu0 %v801_v49 }
  0xe3   :  { %v678_v50 = vpop.f32.mrf.mxu0 }
  0xe4   :  { %v706_v51 = vpop.f32.mrf.mxu1 }
  0xe5   :  { %v679_v52 = vpop.f32.mrf.mxu0 }
  0xe6   :  { %v707_v53 = vpop.f32.mrf.mxu1  ;;  %v680_v4 = vadd.f32 %v679_v52, %v678_v50 }
  0xe7   :  { %v681_v54 = vpop.f32.mrf.mxu0  ;;  %v708_v5 = vadd.f32 %v707_v53, %v706_v51 }
  0xe8   :  { %v709_v55 = vpop.f32.mrf.mxu1 }
  0xe9   :  { %v682_v56 = vpop.f32.mrf.mxu0  ;;  %v498_v14 = vadd.f32 %v708_v5, %v680_v4 }
  0xea   :  { %v710_v57 = vpop.f32.mrf.mxu1  ;;  %v683_v11 = vadd.f32 %v682_v56, %v681_v54 }
  0xeb   :  { %v684_v58 = vpop.f32.mrf.mxu0  ;;  %v711_v12 = vadd.f32 %v710_v57, %v709_v55 }
  0xec   :  { %v712_v59 = vpop.f32.mrf.mxu1 }
  0xed   :  { %v685_v60 = vpop.f32.mrf.mxu0  ;;  %v501_v24 = vadd.f32 %v711_v12, %v683_v11 }
  0xee   :  { %v713_v61 = vpop.f32.mrf.mxu1  ;;  %v686_v0 = vadd.f32 %v685_v60, %v684_v58 }
  0xef   :  { %v687_v62 = vpop.f32.mrf.mxu0  ;;  %v714_v1 = vadd.f32 %v713_v61, %v712_v59 }
  0xf0   :  { %v715_v63 = vpop.f32.mrf.mxu1 }
  0xf1   :  { %v688_v2 = vpop.f32.mrf.mxu0  ;;  %v506_v8 = vadd.f32 %v714_v1, %v686_v0 }
  0xf2   :  { %v716_v3 = vpop.f32.mrf.mxu1  ;;  %v689_v6 = vadd.f32 %v688_v2, %v687_v62 }
  0xf3   :  { %v717_v7 = vadd.f32 %v716_v3, %v715_v63 }
  0xf5   :  { %v509_v19 = vadd.f32 %v717_v7, %v689_v6 }
 0x103   :  { %v746_v9 = vpop.f32.mrf.mxu0 }
 0x104   :  { %v555_v13 = vadd.f32 %v746_v9, %v506_v8 }
 0x105   :  { %v546_v16 = vpop.f32.mrf.mxu0 }
 0x106   :  { %v585_v17 = vmul.f32 %v660_v10, %v555_v13  ;;  %v547_v18 = vadd.f32 %v546_v16, %v498_v14 }
 0x107   :  { %v747_v20 = vpop.f32.mrf.mxu0 }
 0x108   :  { %v596_v21 = vadd.f32 %v661_v15, %v585_v17  ;;  %v583_v22 = vmul.f32 %v660_v10, %v547_v18  ;;  %v558_v23 = vadd.f32 %v747_v20, %v509_v19 }
 0x109   :  { %v549_v25 = vpop.f32.mrf.mxu0 }
 0x10a   :  { %v600_v26 = vmax.f32 %v596_v21, 0.0  ;;  %v594_v27 = vadd.f32 %v661_v15, %v583_v22  ;;  %v586_v28 = vmul.f32 %v660_v10, %v558_v23  ;;  %v550_v29 = vadd.f32 %v549_v25, %v501_v24 }
 0x10c   :  { %604 = vst [vmem:[%s999_s4 + $0x10] sm:$0xff] %v600_v26  ;;  %v598_v30 = vmax.f32 %v594_v27, 0.0  ;;  %v597_v31 = vadd.f32 %v661_v15, %v586_v28  ;;  %v584_v32 = vmul.f32 %v660_v10, %v550_v29 }
 0x10e   :  { %602 = vst [vmem:[%s999_s4] sm:$0xff] %v598_v30  ;;  %v601_v33 = vmax.f32 %v597_v31, 0.0  ;;  %v595_v34 = vadd.f32 %v661_v15, %v584_v32 }
 0x110   :  { %605 = vst [vmem:[%s999_s4 + $0x18] sm:$0xff] %v601_v33  ;;  %v599_v35 = vmax.f32 %v595_v34, 0.0 }
 0x112   :  { %603 = vst [vmem:[%s999_s4 + $0x8] sm:$0xff] %v599_v35 }

// kernel: ifcnn_forward.27
= control target key start
LH: loop header
LB: loop body
LE: loop exit
PB: predicated region body
PF: predicated region fallthrough
CT: control target
= control target key end

     0   :  { %s333_s1 = inlined_call_operand.vmem [shape: bf16[128,128], index: 1, kind: input, shape index: {}]   ;;  %s334_s0 = inlined_call_operand.vmem [shape: bf16[32,128], index: 0, kind: input, shape index: {}]   ;;  %s335_s2 = inlined_call_operand.vmem [shape: f32[1,128], index: 2, kind: input, shape index: {}]   ;;  %s336_s3 = inlined_call_operand.vmem [shape: f32[1,128], index: 3, kind: input, shape index: {}]   ;;  %s337_s4 = inlined_call_operand.vmem [shape: f32[32,128], index: 4, kind: output, shape index: {}]  }
   0x1   :  { %v250_v0 = vld [vmem:[%s333_s1 + $0x38] sm:$0xff]   ;;  %v251_v1 = vld [vmem:[%s333_s1 + $0x30] sm:$0xff]   ;;  %v252_v2 = vld [vmem:[%s333_s1 + $0x28] sm:$0xff]  }
   0x2   :  { %230 = vmatprep.subr.bf16.mxu0 %v250_v0  ;;  %v253_v3 = vld [vmem:[%s333_s1 + $0x20] sm:$0xff]   ;;  %v254_v5 = vld [vmem:[%s333_s1 + $0x18] sm:$0xff]   ;;  %v255_v6 = vld [vmem:[%s333_s1 + $0x10] sm:$0xff]  }
   0x3   :  { %231 = vmatpush3.bf16.msra.mxu0 %v250_v0  ;;  %v258_v4 = vld [vmem:[%s334_s0] sm:$0xff]   ;;  %v256_v7 = vld [vmem:[%s333_s1 + $0x8] sm:$0xff]  }
   0x4   :  { %232 = vmatprep.subr.bf16.mxu0 %v251_v1  ;;  %246 = vmatprep.mubr.bf16.mxu0 %v258_v4  ;;  %v257_v8 = vld [vmem:[%s333_s1] sm:$0xff]   ;;  %v259_v9 = vld [vmem:[%s334_s0 + $0x8] sm:$0xff]  }
   0x5   :  { %v218_v10 = vld [vmem:[%s335_s2] ss:$0 sm:$0xff] }
   0x6   :  { %v219_v12 = vld [vmem:[%s336_s3] ss:$0 sm:$0xff] }
   0x7   :  { %233 = vmatpush3.bf16.msra.mxu0 %v251_v1 }
   0x8   :  { %234 = vmatprep.subr.bf16.mxu0 %v252_v2 }
   0xb   :  { %235 = vmatpush3.bf16.msra.mxu0 %v252_v2 }
   0xc   :  { %236 = vmatprep.subr.bf16.mxu0 %v253_v3 }
   0xf   :  { %237 = vmatpush3.bf16.msra.mxu0 %v253_v3 }
  0x10   :  { %238 = vmatprep.subr.bf16.mxu0 %v254_v5 }
  0x13   :  { %239 = vmatpush3.bf16.msra.mxu0 %v254_v5 }
  0x14   :  { %240 = vmatprep.subr.bf16.mxu0 %v255_v6 }
  0x17   :  { %241 = vmatpush3.bf16.msra.mxu0 %v255_v6 }
  0x18   :  { %242 = vmatprep.subr.bf16.mxu0 %v256_v7 }
  0x1b   :  { %243 = vmatpush3.bf16.msra.mxu0 %v256_v7 }
  0x1c   :  { %244 = vmatprep.subr.bf16.mxu0 %v257_v8 }
  0x1f   :  { %245 = vmatpush3.bf16.msra.mxu0 %v257_v8 }
  0x22   :  { %247 = vmatmul.mubr.bf16.vlgmr.msra.gmra.mxu0 %v259_v9 }
  0xe2   :  { %v248_v11 = vpop.f32.mrf.mxu0 }
  0xe3   :  { %v183_v13 = vmul.f32 %v248_v11, %v218_v10 }
  0xe4   :  { %v144_v14 = vpop.f32.mrf.mxu0 }
  0xe5   :  { %v194_v15 = vadd.f32 %v219_v12, %v183_v13  ;;  %v181_v16 = vmul.f32 %v218_v10, %v144_v14 }
  0xe6   :  { %v249_v17 = vpop.f32.mrf.mxu0 }
  0xe7   :  { %v198_v18 = vmax.f32 %v194_v15, 0.0  ;;  %v192_v19 = vadd.f32 %v219_v12, %v181_v16  ;;  %v184_v20 = vmul.f32 %v249_v17, %v218_v10 }
  0xe8   :  { %v147_v21 = vpop.f32.mrf.mxu0 }
  0xe9   :  { %202 = vst [vmem:[%s337_s4 + $0x10] sm:$0xff] %v198_v18  ;;  %v196_v22 = vmax.f32 %v192_v19, 0.0  ;;  %v195_v23 = vadd.f32 %v219_v12, %v184_v20  ;;  %v182_v24 = vmul.f32 %v218_v10, %v147_v21 }
  0xeb   :  { %200 = vst [vmem:[%s337_s4] sm:$0xff] %v196_v22  ;;  %v199_v25 = vmax.f32 %v195_v23, 0.0  ;;  %v193_v26 = vadd.f32 %v219_v12, %v182_v24 }
  0xed   :  { %203 = vst [vmem:[%s337_s4 + $0x18] sm:$0xff] %v199_v25  ;;  %v197_v27 = vmax.f32 %v193_v26, 0.0 }
  0xef   :  { %201 = vst [vmem:[%s337_s4 + $0x8] sm:$0xff] %v197_v27 }

// kernel: ifcnn_forward.29
= control target key start
LH: loop header
LB: loop body
LE: loop exit
PB: predicated region body
PF: predicated region fallthrough
CT: control target
= control target key end

     0   :  { %s1434_s15 = smov 0   ;;  %s1436_s16 = smov 0   ;;  %s1717_s0 = inlined_call_operand.vmem [shape: bf16[8,256], index: 0, kind: input, shape index: {}]   ;;  %s1718_s1 = inlined_call_operand.vmem [shape: bf16[256,4096], index: 1, kind: input, shape index: {}]   ;;  %s1719_s2 = inlined_call_operand.vmem [shape: f32[1,4096], index: 2, kind: input, shape index: {}]   ;;  %s1720_s3 = inlined_call_operand.vmem [shape: f32[1,4096], index: 3, kind: input, shape index: {}]   ;;  %s1721_s4 = inlined_call_operand.vmem [shape: f32[8,4096], index: 4, kind: output, shape index: {}]  }
   0x1   :  { %s1438_s17 = smov 0   ;;  %s1440_s18 = smov 0  }
   0x2   :  { %s1442_s19 = smov 0  }
   0x3 LB: > { %s29_s20 = sadd.s32 1, %s1403_s18  ;;  %p77_p1 = scmp.ne.s32.totalorder %s1395_s16, %s1391_s15  ;;  %s1407_s19 = sphi %s1442_s19, %s14_s19   ;;  %s1403_s18 = sphi %s1440_s18, %s1725_s18   ;;  %s1399_s17 = sphi %s1438_s17, %s1724_s17   ;;  %s1395_s16 = sphi %s1436_s16, %s1723_s16   ;;  %s1391_s15 = sphi %s1434_s15, %s1722_s15  }
   0x4   : > { %p31_p0 = scmp.ge.s32.totalorder %s29_s20, 8  ;;  %p78_p2 = scmp.eq.s32.totalorder %s1407_s19, 0 }
   0x5   : > { %s70_s22 = sadd.s32 1, %s1395_s16  ;;  %p1152_p5 = scmp.ge.s32.totalorder %s1407_s19, 8 }
   0x6   : > { %s1727_s20 = smov (%p31_p0, %s29_s20), 0  ;;  %p79_p3 = por %p78_p2, %p77_p1 }
   0x7   : > { %s66_s21 = ssub.s32 %s1403_s18, %s1727_s20  ;;  %196 = sbr.rel (%p1152_p5) target bundleno = 48 (0x30), region = 20 }
   0x8   : > { %p68_p4 = scmp.eq.s32.totalorder %s66_s21, 0 }
   0xa   : > { %s1469_s23 = scalar_select %p68_p4, %s1395_s16, %s70_s22  }
   0xc   : > { %199 = sbr.rel (!%p79_p3) target bundleno = 48 (0x30), region = 24  ;;  %s201_s24 = sand.u32 (%p79_p3), 1, %s1395_s16  }
   0xd   : > { %s1230_s25 = sshll.u32 (%p79_p3), %s1403_s18, 4  ;;  %s1153_s26 = sshll.u32 (%p79_p3), %s201_s24, 9 }
   0xe   : > { %s1477_s29 = scalar_lea.vmem (%p79_p3), %s1718_s1, %s1230_s25  ;;  %s1482_s30 = scalar_lea.vmem (%p79_p3), [#allocation3], %s1153_s26 }
   0xf   : > { %v222_v0 = vld [vmem:[%s1477_s29] sm:$0xff] (%p79_p3)  ;;  %v224_v1 = vld [vmem:[%s1477_s29 + $0x8] sm:$0xff] (%p79_p3) }
  0x10   : > { %v226_v2 = vld [vmem:[%s1477_s29 + $0x80] sm:$0xff] (%p79_p3)  ;;  %223 = vst [vmem:[%s1482_s30] sm:$0xff] (%p79_p3), %v222_v0  ;;  %225 = vst [vmem:[%s1482_s30 + $0x8] sm:$0xff] (%p79_p3), %v224_v1  ;;  %v228_v3 = vld [vmem:[%s1477_s29 + $0x88] sm:$0xff] (%p79_p3) }
  0x11   : > { %227 = vst [vmem:[%s1482_s30 + $0x10] sm:$0xff] %v226_v2  ;;  %v230_v4 = vld [vmem:[%s1477_s29 + $0x100] sm:$0xff]  ;;  %v232_v5 = vld [vmem:[%s1477_s29 + $0x108] sm:$0xff]  ;;  %229 = vst [vmem:[%s1482_s30 + $0x18] sm:$0xff] %v228_v3 }
  0x12   : > { %231 = vst [vmem:[%s1482_s30 + $0x20] sm:$0xff] %v230_v4  ;;  %233 = vst [vmem:[%s1482_s30 + $0x28] sm:$0xff] %v232_v5  ;;  %v234_v6 = vld [vmem:[%s1477_s29 + $0x180] sm:$0xff]  ;;  %v236_v7 = vld [vmem:[%s1477_s29 + $0x188] sm:$0xff] }
  0x13   : > { %v238_v8 = vld [vmem:[%s1477_s29 + $0x200] sm:$0xff]  ;;  %235 = vst [vmem:[%s1482_s30 + $0x30] sm:$0xff] %v234_v6  ;;  %237 = vst [vmem:[%s1482_s30 + $0x38] sm:$0xff] %v236_v7  ;;  %v240_v9 = vld [vmem:[%s1477_s29 + $0x208] sm:$0xff] }
  0x14   : > { %239 = vst [vmem:[%s1482_s30 + $0x40] sm:$0xff] %v238_v8  ;;  %v242_v10 = vld [vmem:[%s1477_s29 + $0x280] sm:$0xff]  ;;  %v244_v11 = vld [vmem:[%s1477_s29 + $0x288] sm:$0xff]  ;;  %241 = vst [vmem:[%s1482_s30 + $0x48] sm:$0xff] %v240_v9 }
  0x15   : > { %243 = vst [vmem:[%s1482_s30 + $0x50] sm:$0xff] %v242_v10  ;;  %245 = vst [vmem:[%s1482_s30 + $0x58] sm:$0xff] %v244_v11  ;;  %v246_v12 = vld [vmem:[%s1477_s29 + $0x300] sm:$0xff]  ;;  %v248_v13 = vld [vmem:[%s1477_s29 + $0x308] sm:$0xff] }
  0x16   : > { %v250_v14 = vld [vmem:[%s1477_s29 + $0x380] sm:$0xff]  ;;  %247 = vst [vmem:[%s1482_s30 + $0x60] sm:$0xff] %v246_v12  ;;  %249 = vst [vmem:[%s1482_s30 + $0x68] sm:$0xff] %v248_v13  ;;  %v252_v15 = vld [vmem:[%s1477_s29 + $0x388] sm:$0xff] }
  0x17   : > { %251 = vst [vmem:[%s1482_s30 + $0x70] sm:$0xff] %v250_v14  ;;  %v254_v16 = vld [vmem:[%s1477_s29 + $0x400] sm:$0xff]  ;;  %v256_v17 = vld [vmem:[%s1477_s29 + $0x408] sm:$0xff]  ;;  %253 = vst [vmem:[%s1482_s30 + $0x78] sm:$0xff] %v252_v15 }
  0x18   : > { %255 = vst [vmem:[%s1482_s30 + $0x80] sm:$0xff] %v254_v16  ;;  %257 = vst [vmem:[%s1482_s30 + $0x88] sm:$0xff] %v256_v17  ;;  %v258_v18 = vld [vmem:[%s1477_s29 + $0x480] sm:$0xff]  ;;  %v260_v19 = vld [vmem:[%s1477_s29 + $0x488] sm:$0xff] }
  0x19   : > { %v262_v20 = vld [vmem:[%s1477_s29 + $0x500] sm:$0xff]  ;;  %259 = vst [vmem:[%s1482_s30 + $0x90] sm:$0xff] %v258_v18  ;;  %261 = vst [vmem:[%s1482_s30 + $0x98] sm:$0xff] %v260_v19  ;;  %v264_v21 = vld [vmem:[%s1477_s29 + $0x508] sm:$0xff] }
  0x1a   : > { %263 = vst [vmem:[%s1482_s30 + $0xa0] sm:$0xff] %v262_v20  ;;  %v266_v22 = vld [vmem:[%s1477_s29 + $0x580] sm:$0xff]  ;;  %v268_v23 = vld [vmem:[%s1477_s29 + $0x588] sm:$0xff]  ;;  %265 = vst [vmem:[%s1482_s30 + $0xa8] sm:$0xff] %v264_v21 }
  0x1b   : > { %267 = vst [vmem:[%s1482_s30 + $0xb0] sm:$0xff] %v266_v22  ;;  %269 = vst [vmem:[%s1482_s30 + $0xb8] sm:$0xff] %v268_v23  ;;  %v270_v24 = vld [vmem:[%s1477_s29 + $0x600] sm:$0xff]  ;;  %v272_v25 = vld [vmem:[%s1477_s29 + $0x608] sm:$0xff] }
  0x1c   : > { %v274_v26 = vld [vmem:[%s1477_s29 + $0x680] sm:$0xff]  ;;  %271 = vst [vmem:[%s1482_s30 + $0xc0] sm:$0xff] %v270_v24  ;;  %273 = vst [vmem:[%s1482_s30 + $0xc8] sm:$0xff] %v272_v25  ;;  %v276_v27 = vld [vmem:[%s1477_s29 + $0x688] sm:$0xff] }
  0x1d   : > { %275 = vst [vmem:[%s1482_s30 + $0xd0] sm:$0xff] %v274_v26  ;;  %v278_v28 = vld [vmem:[%s1477_s29 + $0x700] sm:$0xff]  ;;  %v280_v29 = vld [vmem:[%s1477_s29 + $0x708] sm:$0xff]  ;;  %277 = vst [vmem:[%s1482_s30 + $0xd8] sm:$0xff] %v276_v27 }
  0x1e   : > { %279 = vst [vmem:[%s1482_s30 + $0xe0] sm:$0xff] %v278_v28  ;;  %281 = vst [vmem:[%s1482_s30 + $0xe8] sm:$0xff] %v280_v29  ;;  %v282_v30 = vld [vmem:[%s1477_s29 + $0x780] sm:$0xff]  ;;  %v284_v31 = vld [vmem:[%s1477_s29 + $0x788] sm:$0xff] }
  0x1f   : > { %v286_v32 = vld [vmem:[%s1477_s29 + $0x800] sm:$0xff]  ;;  %283 = vst [vmem:[%s1482_s30 + $0xf0] sm:$0xff] %v282_v30  ;;  %285 = vst [vmem:[%s1482_s30 + $0xf8] sm:$0xff] %v284_v31  ;;  %v288_v33 = vld [vmem:[%s1477_s29 + $0x808] sm:$0xff] }
  0x20   : > { %287 = vst [vmem:[%s1482_s30 + $0x100] sm:$0xff] %v286_v32  ;;  %v290_v34 = vld [vmem:[%s1477_s29 + $0x880] sm:$0xff]  ;;  %v292_v35 = vld [vmem:[%s1477_s29 + $0x888] sm:$0xff]  ;;  %289 = vst [vmem:[%s1482_s30 + $0x108] sm:$0xff] %v288_v33 }
  0x21   : > { %291 = vst [vmem:[%s1482_s30 + $0x110] sm:$0xff] %v290_v34  ;;  %293 = vst [vmem:[%s1482_s30 + $0x118] sm:$0xff] %v292_v35  ;;  %v294_v36 = vld [vmem:[%s1477_s29 + $0x900] sm:$0xff]  ;;  %v296_v37 = vld [vmem:[%s1477_s29 + $0x908] sm:$0xff] }
  0x22   : > { %v298_v38 = vld [vmem:[%s1477_s29 + $0x980] sm:$0xff]  ;;  %295 = vst [vmem:[%s1482_s30 + $0x120] sm:$0xff] %v294_v36  ;;  %297 = vst [vmem:[%s1482_s30 + $0x128] sm:$0xff] %v296_v37  ;;  %v300_v39 = vld [vmem:[%s1477_s29 + $0x988] sm:$0xff] }
  0x23   : > { %299 = vst [vmem:[%s1482_s30 + $0x130] sm:$0xff] %v298_v38  ;;  %v302_v40 = vld [vmem:[%s1477_s29 + $0xa00] sm:$0xff]  ;;  %v304_v41 = vld [vmem:[%s1477_s29 + $0xa08] sm:$0xff]  ;;  %301 = vst [vmem:[%s1482_s30 + $0x138] sm:$0xff] %v300_v39 }
  0x24   : > { %303 = vst [vmem:[%s1482_s30 + $0x140] sm:$0xff] %v302_v40  ;;  %305 = vst [vmem:[%s1482_s30 + $0x148] sm:$0xff] %v304_v41  ;;  %v306_v42 = vld [vmem:[%s1477_s29 + $0xa80] sm:$0xff]  ;;  %v308_v43 = vld [vmem:[%s1477_s29 + $0xa88] sm:$0xff] }
  0x25   : > { %v310_v44 = vld [vmem:[%s1477_s29 + $0xb00] sm:$0xff]  ;;  %307 = vst [vmem:[%s1482_s30 + $0x150] sm:$0xff] %v306_v42  ;;  %309 = vst [vmem:[%s1482_s30 + $0x158] sm:$0xff] %v308_v43  ;;  %v312_v45 = vld [vmem:[%s1477_s29 + $0xb08] sm:$0xff] }
  0x26   : > { %311 = vst [vmem:[%s1482_s30 + $0x160] sm:$0xff] %v310_v44  ;;  %v314_v46 = vld [vmem:[%s1477_s29 + $0xb80] sm:$0xff]  ;;  %v316_v47 = vld [vmem:[%s1477_s29 + $0xb88] sm:$0xff]  ;;  %313 = vst [vmem:[%s1482_s30 + $0x168] sm:$0xff] %v312_v45 }
  0x27   : > { %315 = vst [vmem:[%s1482_s30 + $0x170] sm:$0xff] %v314_v46  ;;  %317 = vst [vmem:[%s1482_s30 + $0x178] sm:$0xff] %v316_v47  ;;  %v318_v48 = vld [vmem:[%s1477_s29 + $0xc00] sm:$0xff]  ;;  %v320_v49 = vld [vmem:[%s1477_s29 + $0xc08] sm:$0xff] }
  0x28   : > { %v322_v50 = vld [vmem:[%s1477_s29 + $0xc80] sm:$0xff]  ;;  %319 = vst [vmem:[%s1482_s30 + $0x180] sm:$0xff] %v318_v48  ;;  %321 = vst [vmem:[%s1482_s30 + $0x188] sm:$0xff] %v320_v49  ;;  %v324_v51 = vld [vmem:[%s1477_s29 + $0xc88] sm:$0xff] }
  0x29   : > { %323 = vst [vmem:[%s1482_s30 + $0x190] sm:$0xff] %v322_v50  ;;  %v326_v52 = vld [vmem:[%s1477_s29 + $0xd00] sm:$0xff]  ;;  %v328_v53 = vld [vmem:[%s1477_s29 + $0xd08] sm:$0xff]  ;;  %325 = vst [vmem:[%s1482_s30 + $0x198] sm:$0xff] %v324_v51 }
  0x2a   : > { %327 = vst [vmem:[%s1482_s30 + $0x1a0] sm:$0xff] %v326_v52  ;;  %329 = vst [vmem:[%s1482_s30 + $0x1a8] sm:$0xff] %v328_v53  ;;  %v330_v54 = vld [vmem:[%s1477_s29 + $0xd80] sm:$0xff]  ;;  %v332_v55 = vld [vmem:[%s1477_s29 + $0xd88] sm:$0xff] }
  0x2b   : > { %v334_v56 = vld [vmem:[%s1477_s29 + $0xe00] sm:$0xff]  ;;  %331 = vst [vmem:[%s1482_s30 + $0x1b0] sm:$0xff] %v330_v54  ;;  %333 = vst [vmem:[%s1482_s30 + $0x1b8] sm:$0xff] %v332_v55  ;;  %v336_v57 = vld [vmem:[%s1477_s29 + $0xe08] sm:$0xff] }
  0x2c   : > { %335 = vst [vmem:[%s1482_s30 + $0x1c0] sm:$0xff] %v334_v56  ;;  %v338_v58 = vld [vmem:[%s1477_s29 + $0xe80] sm:$0xff]  ;;  %v340_v59 = vld [vmem:[%s1477_s29 + $0xe88] sm:$0xff]  ;;  %337 = vst [vmem:[%s1482_s30 + $0x1c8] sm:$0xff] %v336_v57 }
  0x2d   : > { %339 = vst [vmem:[%s1482_s30 + $0x1d0] sm:$0xff] %v338_v58  ;;  %341 = vst [vmem:[%s1482_s30 + $0x1d8] sm:$0xff] %v340_v59  ;;  %v342_v60 = vld [vmem:[%s1477_s29 + $0xf00] sm:$0xff]  ;;  %v344_v61 = vld [vmem:[%s1477_s29 + $0xf08] sm:$0xff] }
  0x2e   : > { %v346_v62 = vld [vmem:[%s1477_s29 + $0xf80] sm:$0xff]  ;;  %343 = vst [vmem:[%s1482_s30 + $0x1e0] sm:$0xff] %v342_v60  ;;  %345 = vst [vmem:[%s1482_s30 + $0x1e8] sm:$0xff] %v344_v61  ;;  %v348_v63 = vld [vmem:[%s1477_s29 + $0xf88] sm:$0xff] }
  0x2f   : > { %347 = vst [vmem:[%s1482_s30 + $0x1f0] sm:$0xff] %v346_v62  ;;  %349 = vst [vmem:[%s1482_s30 + $0x1f8] sm:$0xff] %v348_v63 }
  0x30 PF: > { %p1156_p6 = scmp.ge.s32.totalorder %s1407_s19, 1  ;;  %p370_p7 = scmp.lt.s32.totalorder %s1407_s19, 9 }
  0x32   : > { %p371_p8 = pnand %p1156_p6, %p370_p7 }
  0x33   : > { %s377_s5 = sand.u32 (!%p371_p8), 1, %s1391_s15   ;;  %s1158_s10 = sshll.u32 (!%p371_p8), %s1399_s17, 2 }
  0x34   : > { %374 = sbr.rel (%p371_p8) target bundleno = 326 (0x146), region = 55  ;;  %s1157_s8 = sshll.u32 (!%p371_p8), %s377_s5, 9 }
  0x35   : > { %s1619_s9 = scalar_lea.vmem (!%p371_p8), [#allocation3], %s1157_s8  ;;  %p436_p9 = scmp.lt.s32.totalorder (!%p371_p8), %s1158_s10, 31 }
  0x39   : > { %v1615_v0 = vld [vmem:[%s1717_s0] sm:$0xff]  ;;  %v1273_v3 = vld [vmem:[%s1619_s9 + $0xec] ss:$16 sps:$4 sm:$0xff]   ;;  %v1276_v5 = vld [vmem:[%s1619_s9 + $0xe8] ss:$16 sps:$4 sm:$0xff]   ;;  %s1729_s10 = smov (!%p436_p9, %s1158_s10), 31 }
  0x3a   : > { %v1163_v1 = vcombine.high %v1615_v0, %v1615_v0  ;;  %v1271_v2 = vld [vmem:[%s1619_s9 + $0xe4] ss:$16 sps:$4 sm:$0xff]   ;;  %v1275_v4 = vld [vmem:[%s1619_s9 + $0xe0] ss:$16 sps:$4 sm:$0xff]   ;;  %900 = vmatprep.subr.bf16.mxu1 %v1273_v3  ;;  %v1279_v7 = vld [vmem:[%s1619_s9 + $0xcc] ss:$16 sps:$4 sm:$0xff]   ;;  %v1162_v3 = vcombine.low %v1615_v0, %v1615_v0  ;;  %s438_s13 = scalar_lea.vmem %s1719_s2, %s1729_s10  ;;  %s443_s21 = scalar_lea.vmem %s1720_s3, %s1729_s10 }
  0x3b   : > { %859 = vmatprep.subr.bf16.mxu0 %v1271_v2  ;;  %v1277_v6 = vld [vmem:[%s1619_s9 + $0xc4] ss:$16 sps:$4 sm:$0xff]   ;;  %901 = vmatpush1.bf16.msra.mxu1 %v1276_v5  ;;  %v1281_v8 = vld [vmem:[%s1619_s9 + $0xc0] ss:$16 sps:$4 sm:$0xff]   ;;  %v1282_v9 = vld [vmem:[%s1619_s9 + $0xc8] ss:$16 sps:$4 sm:$0xff]  }
  0x3c   : > { %891 = vmatprep.mubr.bf16.mxu0 %v1163_v1  ;;  %932 = vmatprep.mubr.bf16.mxu1 %v1163_v1  ;;  %v1283_v10 = vld [vmem:[%s1619_s9 + $0xa4] ss:$16 sps:$4 sm:$0xff]   ;;  %v1285_v11 = vld [vmem:[%s1619_s9 + $0xac] ss:$16 sps:$4 sm:$0xff]   ;;  %v1287_v12 = vld [vmem:[%s1619_s9 + $0xa0] ss:$16 sps:$4 sm:$0xff]  }
  0x3d   : > { %860 = vmatpush1.bf16.msra.mxu0 %v1275_v4  ;;  %902 = vmatprep.subr.bf16.mxu1 %v1279_v7  ;;  %v1288_v13 = vld [vmem:[%s1619_s9 + $0xa8] ss:$16 sps:$4 sm:$0xff]   ;;  %v1289_v14 = vld [vmem:[%s1619_s9 + $0x84] ss:$16 sps:$4 sm:$0xff]   ;;  %v1291_v15 = vld [vmem:[%s1619_s9 + $0x8c] ss:$16 sps:$4 sm:$0xff]   ;;  %v958_v4 = vlaneseq }
  0x3e   : > { %861 = vmatprep.subr.bf16.mxu0 %v1277_v6  ;;  %v1293_v16 = vld [vmem:[%s1619_s9 + $0x80] ss:$16 sps:$4 sm:$0xff]   ;;  %v1294_v17 = vld [vmem:[%s1619_s9 + $0x88] ss:$16 sps:$4 sm:$0xff]   ;;  %v1295_v18 = vld [vmem:[%s1619_s9 + $0x64] ss:$16 sps:$4 sm:$0xff]  }
  0x3f   : > { %903 = vmatpush1.bf16.msra.mxu1 %v1282_v9  ;;  %v1297_v19 = vld [vmem:[%s1619_s9 + $0x6c] ss:$16 sps:$4 sm:$0xff]   ;;  %v1299_v20 = vld [vmem:[%s1619_s9 + $0x60] ss:$16 sps:$4 sm:$0xff]   ;;  %v1300_v21 = vld [vmem:[%s1619_s9 + $0x68] ss:$16 sps:$4 sm:$0xff]  }
  0x40   : > { %904 = vmatprep.subr.bf16.mxu1 %v1285_v11  ;;  %v1301_v22 = vld [vmem:[%s1619_s9 + $0x44] ss:$16 sps:$4 sm:$0xff]   ;;  %v1303_v23 = vld [vmem:[%s1619_s9 + $0x4c] ss:$16 sps:$4 sm:$0xff]   ;;  %v1305_v24 = vld [vmem:[%s1619_s9 + $0x40] ss:$16 sps:$4 sm:$0xff]  }
  0x41   : > { %862 = vmatpush1.bf16.msra.mxu0 %v1281_v8  ;;  %v1306_v25 = vld [vmem:[%s1619_s9 + $0x48] ss:$16 sps:$4 sm:$0xff]   ;;  %v1307_v26 = vld [vmem:[%s1619_s9 + $0x24] ss:$16 sps:$4 sm:$0xff]   ;;  %v1309_v27 = vld [vmem:[%s1619_s9 + $0x2c] ss:$16 sps:$4 sm:$0xff]  }
  0x42   : > { %863 = vmatprep.subr.bf16.mxu0 %v1283_v10  ;;  %v1311_v28 = vld [vmem:[%s1619_s9 + $0x20] ss:$16 sps:$4 sm:$0xff]   ;;  %v1312_v29 = vld [vmem:[%s1619_s9 + $0x28] ss:$16 sps:$4 sm:$0xff]   ;;  %v1313_v30 = vld [vmem:[%s1619_s9 + $0x4] ss:$16 sps:$4 sm:$0xff]  }
  0x43   : > { %905 = vmatpush1.bf16.msra.mxu1 %v1288_v13  ;;  %v1315_v31 = vld [vmem:[%s1619_s9 + $0xc] ss:$16 sps:$4 sm:$0xff]   ;;  %v1317_v32 = vld [vmem:[%s1619_s9] ss:$16 sps:$4 sm:$0xff]   ;;  %v1318_v33 = vld [vmem:[%s1619_s9 + $0x8] ss:$16 sps:$4 sm:$0xff]  }
  0x44   : > { %906 = vmatprep.subr.bf16.mxu1 %v1291_v15  ;;  %v1319_v34 = vld [vmem:[%s1619_s9 + $0x1e4] ss:$16 sps:$4 sm:$0xff]   ;;  %v1321_v35 = vld [vmem:[%s1619_s9 + $0x1ec] ss:$16 sps:$4 sm:$0xff]   ;;  %v1323_v36 = vld [vmem:[%s1619_s9 + $0x1e0] ss:$16 sps:$4 sm:$0xff]  }
  0x45   : > { %864 = vmatpush1.bf16.msra.mxu0 %v1287_v12  ;;  %v1324_v37 = vld [vmem:[%s1619_s9 + $0x1e8] ss:$16 sps:$4 sm:$0xff]   ;;  %v1325_v38 = vld [vmem:[%s1619_s9 + $0x1c4] ss:$16 sps:$4 sm:$0xff]   ;;  %v1327_v39 = vld [vmem:[%s1619_s9 + $0x1cc] ss:$16 sps:$4 sm:$0xff]  }
  0x46   : > { %865 = vmatprep.subr.bf16.mxu0 %v1289_v14  ;;  %v1329_v40 = vld [vmem:[%s1619_s9 + $0x1c0] ss:$16 sps:$4 sm:$0xff]   ;;  %v1330_v41 = vld [vmem:[%s1619_s9 + $0x1c8] ss:$16 sps:$4 sm:$0xff]   ;;  %v1331_v42 = vld [vmem:[%s1619_s9 + $0x1a4] ss:$16 sps:$4 sm:$0xff]  }
  0x47   : > { %907 = vmatpush1.bf16.msra.mxu1 %v1294_v17  ;;  %v1333_v43 = vld [vmem:[%s1619_s9 + $0x1ac] ss:$16 sps:$4 sm:$0xff]   ;;  %v1335_v44 = vld [vmem:[%s1619_s9 + $0x1a0] ss:$16 sps:$4 sm:$0xff]   ;;  %v1336_v45 = vld [vmem:[%s1619_s9 + $0x1a8] ss:$16 sps:$4 sm:$0xff]  }
  0x48   : > { %908 = vmatprep.subr.bf16.mxu1 %v1297_v19  ;;  %v1337_v46 = vld [vmem:[%s1619_s9 + $0x184] ss:$16 sps:$4 sm:$0xff]   ;;  %v1339_v47 = vld [vmem:[%s1619_s9 + $0x18c] ss:$16 sps:$4 sm:$0xff]   ;;  %v1341_v48 = vld [vmem:[%s1619_s9 + $0x180] ss:$16 sps:$4 sm:$0xff]  }
  0x49   : > { %866 = vmatpush1.bf16.msra.mxu0 %v1293_v16  ;;  %v1342_v49 = vld [vmem:[%s1619_s9 + $0x188] ss:$16 sps:$4 sm:$0xff]   ;;  %v1343_v50 = vld [vmem:[%s1619_s9 + $0x164] ss:$16 sps:$4 sm:$0xff]   ;;  %v1345_v51 = vld [vmem:[%s1619_s9 + $0x16c] ss:$16 sps:$4 sm:$0xff]  }
  0x4a   : > { %867 = vmatprep.subr.bf16.mxu0 %v1295_v18  ;;  %v1347_v52 = vld [vmem:[%s1619_s9 + $0x160] ss:$16 sps:$4 sm:$0xff]   ;;  %v1348_v53 = vld [vmem:[%s1619_s9 + $0x168] ss:$16 sps:$4 sm:$0xff]   ;;  %v1349_v54 = vld [vmem:[%s1619_s9 + $0x144] ss:$16 sps:$4 sm:$0xff]  }
  0x4b   : > { %909 = vmatpush1.bf16.msra.mxu1 %v1300_v21  ;;  %v1351_v55 = vld [vmem:[%s1619_s9 + $0x14c] ss:$16 sps:$4 sm:$0xff]   ;;  %v1353_v56 = vld [vmem:[%s1619_s9 + $0x140] ss:$16 sps:$4 sm:$0xff]   ;;  %v1354_v57 = vld [vmem:[%s1619_s9 + $0x148] ss:$16 sps:$4 sm:$0xff]  }
  0x4c   : > { %910 = vmatprep.subr.bf16.mxu1 %v1303_v23  ;;  %v1355_v58 = vld [vmem:[%s1619_s9 + $0x124] ss:$16 sps:$4 sm:$0xff]   ;;  %v1357_v59 = vld [vmem:[%s1619_s9 + $0x12c] ss:$16 sps:$4 sm:$0xff]   ;;  %v1359_v60 = vld [vmem:[%s1619_s9 + $0x120] ss:$16 sps:$4 sm:$0xff]  }
  0x4d   : > { %868 = vmatpush1.bf16.msra.mxu0 %v1299_v20  ;;  %v1360_v61 = vld [vmem:[%s1619_s9 + $0x128] ss:$16 sps:$4 sm:$0xff]   ;;  %v1361_v62 = vld [vmem:[%s1619_s9 + $0x104] ss:$16 sps:$4 sm:$0xff]   ;;  %v1363_v63 = vld [vmem:[%s1619_s9 + $0x10c] ss:$16 sps:$4 sm:$0xff]  }
  0x4e   : > { %869 = vmatprep.subr.bf16.mxu0 %v1301_v22  ;;  %v1365_v1 = vld [vmem:[%s1619_s9 + $0x100] ss:$16 sps:$4 sm:$0xff]   ;;  %v1366_v2 = vld [vmem:[%s1619_s9 + $0x108] ss:$16 sps:$4 sm:$0xff]   ;;  %v959_v5 = vshrl.u32 %v958_v4, 7  ;;  %s1161_s17 = sshll.u32 %s1729_s10, 3 }
  0x4f   : > { %911 = vmatpush1.bf16.msra.mxu1 %v1306_v25  ;;  %v956_v7 = vld [vmem:[%s438_s13] sm:$0xf]  ;;  %s453_s25 = scalar_lea.vmem %s1721_s4, %s1161_s17 }
  0x50   : > { %912 = vmatprep.subr.bf16.mxu1 %v1309_v27  ;;  %v960_v0 = vsub.s32 0, %v959_v5  ;;  %v968_v6 = vsub.s32 2, %v959_v5  ;;  %v964_v8 = vsub.s32 1, %v959_v5  ;;  %v972_v9 = vsub.s32 3, %v959_v5  ;;  %v982_v10 = vld [vmem:[%s443_s21] sm:$0xf] }
  0x51   : > { %870 = vmatpush1.bf16.msra.mxu0 %v1305_v24 }
  0x52   : > { %871 = vmatprep.subr.bf16.mxu0 %v1307_v26  ;;  %v961_v11 = vrot.slane %v956_v7, %v960_v0  ;;  %v969_v12 = vrot.slane %v956_v7, %v968_v6  ;;  %v987_v13 = vrot.slane %v982_v10, %v960_v0  ;;  %v995_v14 = vrot.slane %v982_v10, %v968_v6 }
  0x53   : > { %913 = vmatpush1.bf16.msra.mxu1 %v1312_v29  ;;  %v965_v15 = vrot.slane %v956_v7, %v964_v8  ;;  %v973_v16 = vrot.slane %v956_v7, %v972_v9  ;;  %v991_v21 = vrot.slane %v982_v10, %v964_v8  ;;  %v999_v22 = vrot.slane %v982_v10, %v972_v9 }
  0x54   : > { %914 = vmatprep.subr.bf16.mxu1 %v1315_v31 }
  0x55   : > { %872 = vmatpush1.bf16.msra.mxu0 %v1311_v28 }
  0x56   : > { %873 = vmatprep.subr.bf16.mxu0 %v1313_v30 }
  0x57   : > { %915 = vmatpush1.bf16.msra.mxu1 %v1318_v33 }
  0x58   : > { %916 = vmatprep.subr.bf16.mxu1 %v1321_v35 }
  0x59   : > { %874 = vmatpush1.bf16.msra.mxu0 %v1317_v32 }
  0x5a   : > { %875 = vmatprep.subr.bf16.mxu0 %v1319_v34 }
  0x5b   : > { %917 = vmatpush2.bf16.msra.mxu1 %v1324_v37 }
  0x5c   : > { %918 = vmatprep.subr.bf16.mxu1 %v1327_v39 }
  0x5d   : > { %876 = vmatpush2.bf16.msra.mxu0 %v1323_v36 }
  0x5e   : > { %877 = vmatprep.subr.bf16.mxu0 %v1325_v38 }
  0x5f   : > { %919 = vmatpush2.bf16.msra.mxu1 %v1330_v41 }
  0x60   : > { %920 = vmatprep.subr.bf16.mxu1 %v1333_v43 }
  0x61   : > { %878 = vmatpush2.bf16.msra.mxu0 %v1329_v40 }
  0x62   : > { %879 = vmatprep.subr.bf16.mxu0 %v1331_v42 }
  0x63   : > { %921 = vmatpush2.bf16.msra.mxu1 %v1336_v45 }
  0x64   : > { %922 = vmatprep.subr.bf16.mxu1 %v1339_v47 }
  0x65   : > { %880 = vmatpush2.bf16.msra.mxu0 %v1335_v44 }
  0x66   : > { %881 = vmatprep.subr.bf16.mxu0 %v1337_v46 }
  0x67   : > { %923 = vmatpush2.bf16.msra.mxu1 %v1342_v49 }
  0x68   : > { %924 = vmatprep.subr.bf16.mxu1 %v1345_v51 }
  0x69   : > { %882 = vmatpush2.bf16.msra.mxu0 %v1341_v48 }
  0x6a   : > { %883 = vmatprep.subr.bf16.mxu0 %v1343_v50 }
  0x6b   : > { %925 = vmatpush2.bf16.msra.mxu1 %v1348_v53 }
  0x6c   : > { %926 = vmatprep.subr.bf16.mxu1 %v1351_v55 }
  0x6d   : > { %884 = vmatpush2.bf16.msra.mxu0 %v1347_v52 }
  0x6e   : > { %885 = vmatprep.subr.bf16.mxu0 %v1349_v54 }
  0x6f   : > { %927 = vmatpush2.bf16.msra.mxu1 %v1354_v57 }
  0x70   : > { %928 = vmatprep.subr.bf16.mxu1 %v1357_v59 }
  0x71   : > { %886 = vmatpush2.bf16.msra.mxu0 %v1353_v56 }
  0x72   : > { %887 = vmatprep.subr.bf16.mxu0 %v1355_v58 }
  0x73   : > { %929 = vmatpush2.bf16.msra.mxu1 %v1360_v61 }
  0x74   : > { %930 = vmatprep.subr.bf16.mxu1 %v1363_v63 }
  0x75   : > { %888 = vmatpush2.bf16.msra.mxu0 %v1359_v60 }
  0x76   : > { %889 = vmatprep.subr.bf16.mxu0 %v1361_v62 }
  0x77   : > { %931 = vmatpush2.bf16.msra.mxu1 %v1366_v2 }
  0x79   : > { %890 = vmatpush2.bf16.msra.mxu0 %v1365_v1 }
  0x7a   : > { %933 = vmatmul.mubr.bf16.vlgmr.msra.gmra.mxu1 %v1162_v3 }
  0x7c   : > { %892 = vmatmul.mubr.bf16.vlgmr.msra.gmra.mxu0 %v1162_v3 }
 0x13a   : > { %v934_v18 = vpop.f32.mrf.mxu1 }
 0x13b   : > { %v980_v20 = vmul.f32 %v969_v12, %v934_v18 }
 0x13c   : > { %v893_v17 = vpop.f32.mrf.mxu0  ;;  %v936_v24 = vpop.f32.mrf.mxu1 }
 0x13d   : > { %v978_v19 = vmul.f32 %v961_v11, %v893_v17  ;;  %v1006_v26 = vadd.f32 %v995_v14, %v980_v20  ;;  %v981_v28 = vmul.f32 %v973_v16, %v936_v24 }
 0x13e   : > { %v895_v23 = vpop.f32.mrf.mxu0  ;;  %v938_v30 = vpop.f32.mrf.mxu1 }
 0x13f   : > { %v1004_v25 = vadd.f32 %v987_v13, %v978_v19  ;;  %v979_v27 = vmul.f32 %v965_v15, %v895_v23  ;;  %v1010_v32 = vmax.f32 %v1006_v26, 0.0  ;;  %v1007_v34 = vadd.f32 %v999_v22, %v981_v28 }
 0x140   : > { %v897_v29 = vpop.f32.mrf.mxu0  ;;  %v939_v36 = vpop.f32.mrf.mxu1 }
 0x141   : > { %v1008_v31 = vmax.f32 %v1004_v25, 0.0  ;;  %v1005_v33 = vadd.f32 %v991_v21, %v979_v27  ;;  %1014 = vst [vmem:[%s453_s25 + $0x10] sm:$0xff] %v1010_v32  ;;  %v1011_v38 = vmax.f32 %v1007_v34, 0.0 }
 0x142   : > { %v898_v35 = vpop.f32.mrf.mxu0 }
 0x143   : > { %1012 = vst [vmem:[%s453_s25] sm:$0xff] %v1008_v31  ;;  %v1009_v37 = vmax.f32 %v1005_v33, 0.0  ;;  %1015 = vst [vmem:[%s453_s25 + $0x18] sm:$0xff] %v1011_v38 }
 0x145   : > { %1013 = vst [vmem:[%s453_s25 + $0x8] sm:$0xff] %v1009_v37 }
 0x146 PF: > { %s14_s19 = sadd.s32 1, %s1407_s19   ;;  %s1722_s15 = smov %s1395_s16 }
 0x147   : > { %p11_p10 = scmp.ge.s32.totalorder %s14_s19, 10   ;;  %s1723_s16 = smov %s1469_s23 }
 0x148   : > { %s1724_s17 = smov %s1403_s18  ;;  %s1725_s18 = smov %s1727_s20 }
 0x149   :  { %13 = sbr.rel (!%p11_p10) target bundleno = 3 (0x3), region = 111 }

// kernel: ifcnn_forward.33
= control target key start
LH: loop header
LB: loop body
LE: loop exit
PB: predicated region body
PF: predicated region fallthrough
CT: control target
= control target key end

     0   :  { %s88_s0 = inlined_call_operand.vmem [shape: f32[2,1024], index: 0, kind: input, shape index: {}]   ;;  %s89_s1 = inlined_call_operand.vmem [shape: f32[2,1024], index: 1, kind: input, shape index: {}]   ;;  %s90_s2 = inlined_call_operand.hbm [shape: f32[2,1024], index: 2, kind: output, shape index: {}]  }
   0x1   :  { %v12_v0 = vld [vmem:[%s88_s0] sm:$0xff]  ;;  %v13_v2 = vld [vmem:[%s88_s0 + $0x8] sm:$0xff] }
   0x2   :  { %v14_v1 = vld [vmem:[%s89_s1] sm:$0xff]  ;;  %v15_v4 = vld [vmem:[%s89_s1 + $0x8] sm:$0xff] }
   0x3   :  { %v16_v3 = vmax.f32 %v12_v0, %v14_v1 }
   0x4   :  { %7 = vsyncpa [#allocation3], 0  ;;  %s57_s17 = smov [#allocation2]   ;;  %v17_v5 = vmax.f32 %v13_v2, %v15_v4 }
   0x5   :  { %s26_s18 = sshll.u32 %s57_s17, 4  ;;  %18 = vst [vmem:[#allocation2] sm:$0xff] %v16_v3  ;;  %s27_s18 = int_to_ptr.vmem [resolvable:$true] %s26_s18 }
   0x6   :  { %19 = vst [vmem:[#allocation2 + $0x8] sm:$0xff] %v17_v5  ;;  %s35_s19 = scalar_lea.vmem %s27_s18, 256  ;;  %p40_p1 = scmp.lt.s32.totalorder %s27_s18, %s27_s18 }
   0x7   :  { %p36_p0 = scmp.ne.s32.totalorder %s27_s18, %s35_s19  ;;  %p41_p2 = scmp.lt.s32.totalorder %s35_s19, %s35_s19 }
   0x9   :  { %p42_p3 = por %p41_p2, %p40_p1 }
   0xb   :  { %p43_p4 = pnand %p42_p3, %p36_p0 }
   0xd   :  { %46 = shalt.err (!%p43_p4)
}
   0xe   :  { %29 = dma.vmem_to_hbm [thread:$0]  %s27_s18, 256, %s90_s2, [#allocation3]  }
   0xf   :  { %55 = dma.done.wait [#allocation3], 256  }
  0x10   :  { %56 = vsyncadd [#allocation3], 4294967040 }
  0x11   :  { %33 = vsyncpa [#allocation3], 1 }

// kernel: ifcnn_forward.30
= control target key start
LH: loop header
LB: loop body
LE: loop exit
PB: predicated region body
PF: predicated region fallthrough
CT: control target
= control target key end

     0   :  { %s2240_s15 = smov 0   ;;  %s2242_s16 = smov 0   ;;  %s2767_s0 = inlined_call_operand.vmem [shape: bf16[8,4096], index: 0, kind: input, shape index: {}]   ;;  %s2768_s1 = inlined_call_operand.vmem [shape: bf16[4096,1024], index: 1, kind: input, shape index: {}]   ;;  %s2769_s2 = inlined_call_operand.vmem [shape: f32[1,1024], index: 2, kind: input, shape index: {}]   ;;  %s2770_s3 = inlined_call_operand.vmem [shape: f32[1,1024], index: 3, kind: input, shape index: {}]   ;;  %s2771_s4 = inlined_call_operand.vmem [shape: f32[8,1024], index: 4, kind: output, shape index: {}]  }
   0x1   :  { %s2244_s17 = smov 0   ;;  %s2246_s18 = smov 0  }
   0x2   :  { %s2248_s19 = smov 0   ;;  %s2250_s20 = smov 0  }
   0x3   :  { %s2252_s21 = smov 0  }
   0x4 LB: > { %s26_s22 = sadd.s32 1, %s2204_s19  ;;  %s29_s23 = sadd.s32 1, %s2208_s20  ;;  %s2212_s21 = sphi %s2252_s21, %s14_s21   ;;  %s2208_s20 = sphi %s2250_s20, %s2777_s20   ;;  %s2204_s19 = sphi %s2248_s19, %s2776_s19   ;;  %s2200_s18 = sphi %s2246_s18, %s2775_s18   ;;  %s2196_s17 = sphi %s2244_s17, %s2774_s17   ;;  %s2192_s16 = sphi %s2242_s16, %s2773_s16   ;;  %s2188_s15 = sphi %s2240_s15, %s2772_s15  }
   0x5   : > { %p27_p0 = scmp.ge.s32.totalorder %s26_s22, 8  ;;  %p77_p1 = scmp.ne.s32.totalorder %s2192_s16, %s2188_s15 }
   0x6   : > { %p78_p2 = scmp.eq.s32.totalorder %s2212_s21, 0  ;;  %s70_s27 = sadd.s32 1, %s2192_s16 }
   0x7   : > { %s2779_s22 = smov (%p27_p0, %s26_s22), 0  ;;  %s2781_s23 = smov (!%p27_p0, %s29_s23), %s2208_s20 }
   0x8   : > { %p79_p3 = por %p78_p2, %p77_p1  ;;  %p31_p4 = scmp.ge.s32.totalorder %s2781_s23, 2 }
   0x9   : > { %s65_s24 = ssub.s32 %s2204_s19, %s2779_s22  ;;  %p1754_p6 = scmp.ge.s32.totalorder %s2212_s21, 16 }
   0xa   : > { %s2783_s23 = smov (%p31_p4, %s2781_s23), 0 }
   0xb   : > { %s66_s25 = ssub.s32 %s2208_s20, %s2783_s23  ;;  %183 = sbr.rel (%p1754_p6) target bundleno = 87 (0x57), region = 16 }
   0xc   : > { %s67_s26 = sor.u32 %s66_s25, %s65_s24 }
   0xd   : > { %p68_p5 = scmp.eq.s32.totalorder %s67_s26, 0 }
   0xf   : > { %s2291_s28 = scalar_select %p68_p5, %s2192_s16, %s70_s27  }
  0x10   : > { %199 = sbr.rel (!%p79_p3) target bundleno = 87 (0x57), region = 24  ;;  %s201_s29 = sand.u32 (%p79_p3), 1, %s2192_s16  }
  0x11   : > { %s1757_s30 = sshll.u32 (%p79_p3), %s2208_s20, 2  ;;  %s1755_s5 = sshll.u32 (%p79_p3), %s201_s29, 10 }
  0x12   : > { %s1904_s6 = sshll.u32 (%p79_p3), %s2204_s19, 9  ;;  %s2305_s12 = scalar_lea.vmem (%p79_p3), [#allocation3], %s1755_s5 }
  0x13   : > { %s207_s7 = sadd.s32 (%p79_p3), %s1904_s6, %s1757_s30 }
  0x14   : > { %s1759_s8 = sshll.u32 (%p79_p3), %s207_s7, 2 }
  0x15   : > { %s2300_s11 = scalar_lea.vmem %s2768_s1, %s1759_s8 }
  0x16   : > { %v222_v0 = vld [vmem:[%s2300_s11] sm:$0xff]  ;;  %v224_v1 = vld [vmem:[%s2300_s11 + $0x8] sm:$0xff] }
  0x17   : > { %v226_v2 = vld [vmem:[%s2300_s11 + $0x20] sm:$0xff]  ;;  %223 = vst [vmem:[%s2305_s12] sm:$0xff] %v222_v0  ;;  %225 = vst [vmem:[%s2305_s12 + $0x8] sm:$0xff] %v224_v1  ;;  %v228_v3 = vld [vmem:[%s2300_s11 + $0x28] sm:$0xff] }
  0x18   : > { %227 = vst [vmem:[%s2305_s12 + $0x10] sm:$0xff] %v226_v2  ;;  %v230_v4 = vld [vmem:[%s2300_s11 + $0x40] sm:$0xff]  ;;  %v232_v5 = vld [vmem:[%s2300_s11 + $0x48] sm:$0xff]  ;;  %229 = vst [vmem:[%s2305_s12 + $0x18] sm:$0xff] %v228_v3 }
  0x19   : > { %231 = vst [vmem:[%s2305_s12 + $0x20] sm:$0xff] %v230_v4  ;;  %233 = vst [vmem:[%s2305_s12 + $0x28] sm:$0xff] %v232_v5  ;;  %v234_v6 = vld [vmem:[%s2300_s11 + $0x60] sm:$0xff]  ;;  %v236_v7 = vld [vmem:[%s2300_s11 + $0x68] sm:$0xff] }
  0x1a   : > { %v238_v8 = vld [vmem:[%s2300_s11 + $0x80] sm:$0xff]  ;;  %235 = vst [vmem:[%s2305_s12 + $0x30] sm:$0xff] %v234_v6  ;;  %237 = vst [vmem:[%s2305_s12 + $0x38] sm:$0xff] %v236_v7  ;;  %v240_v9 = vld [vmem:[%s2300_s11 + $0x88] sm:$0xff] }
  0x1b   : > { %239 = vst [vmem:[%s2305_s12 + $0x40] sm:$0xff] %v238_v8  ;;  %v242_v10 = vld [vmem:[%s2300_s11 + $0xa0] sm:$0xff]  ;;  %v244_v11 = vld [vmem:[%s2300_s11 + $0xa8] sm:$0xff]  ;;  %241 = vst [vmem:[%s2305_s12 + $0x48] sm:$0xff] %v240_v9 }
  0x1c   : > { %243 = vst [vmem:[%s2305_s12 + $0x50] sm:$0xff] %v242_v10  ;;  %245 = vst [vmem:[%s2305_s12 + $0x58] sm:$0xff] %v244_v11  ;;  %v246_v12 = vld [vmem:[%s2300_s11 + $0xc0] sm:$0xff]  ;;  %v248_v13 = vld [vmem:[%s2300_s11 + $0xc8] sm:$0xff] }
  0x1d   : > { %v250_v14 = vld [vmem:[%s2300_s11 + $0xe0] sm:$0xff]  ;;  %247 = vst [vmem:[%s2305_s12 + $0x60] sm:$0xff] %v246_v12  ;;  %249 = vst [vmem:[%s2305_s12 + $0x68] sm:$0xff] %v248_v13  ;;  %v252_v15 = vld [vmem:[%s2300_s11 + $0xe8] sm:$0xff] }
  0x1e   : > { %251 = vst [vmem:[%s2305_s12 + $0x70] sm:$0xff] %v250_v14  ;;  %v254_v16 = vld [vmem:[%s2300_s11 + $0x100] sm:$0xff]  ;;  %v256_v17 = vld [vmem:[%s2300_s11 + $0x108] sm:$0xff]  ;;  %253 = vst [vmem:[%s2305_s12 + $0x78] sm:$0xff] %v252_v15 }
  0x1f   : > { %255 = vst [vmem:[%s2305_s12 + $0x80] sm:$0xff] %v254_v16  ;;  %257 = vst [vmem:[%s2305_s12 + $0x88] sm:$0xff] %v256_v17  ;;  %v258_v18 = vld [vmem:[%s2300_s11 + $0x120] sm:$0xff]  ;;  %v260_v19 = vld [vmem:[%s2300_s11 + $0x128] sm:$0xff] }
  0x20   : > { %v262_v20 = vld [vmem:[%s2300_s11 + $0x140] sm:$0xff]  ;;  %259 = vst [vmem:[%s2305_s12 + $0x90] sm:$0xff] %v258_v18  ;;  %261 = vst [vmem:[%s2305_s12 + $0x98] sm:$0xff] %v260_v19  ;;  %v264_v21 = vld [vmem:[%s2300_s11 + $0x148] sm:$0xff] }
  0x21   : > { %263 = vst [vmem:[%s2305_s12 + $0xa0] sm:$0xff] %v262_v20  ;;  %v266_v22 = vld [vmem:[%s2300_s11 + $0x160] sm:$0xff]  ;;  %v268_v23 = vld [vmem:[%s2300_s11 + $0x168] sm:$0xff]  ;;  %265 = vst [vmem:[%s2305_s12 + $0xa8] sm:$0xff] %v264_v21 }
  0x22   : > { %267 = vst [vmem:[%s2305_s12 + $0xb0] sm:$0xff] %v266_v22  ;;  %269 = vst [vmem:[%s2305_s12 + $0xb8] sm:$0xff] %v268_v23  ;;  %v270_v24 = vld [vmem:[%s2300_s11 + $0x180] sm:$0xff]  ;;  %v272_v25 = vld [vmem:[%s2300_s11 + $0x188] sm:$0xff] }
  0x23   : > { %v274_v26 = vld [vmem:[%s2300_s11 + $0x1a0] sm:$0xff]  ;;  %271 = vst [vmem:[%s2305_s12 + $0xc0] sm:$0xff] %v270_v24  ;;  %273 = vst [vmem:[%s2305_s12 + $0xc8] sm:$0xff] %v272_v25  ;;  %v276_v27 = vld [vmem:[%s2300_s11 + $0x1a8] sm:$0xff] }
  0x24   : > { %275 = vst [vmem:[%s2305_s12 + $0xd0] sm:$0xff] %v274_v26  ;;  %v278_v28 = vld [vmem:[%s2300_s11 + $0x1c0] sm:$0xff]  ;;  %v280_v29 = vld [vmem:[%s2300_s11 + $0x1c8] sm:$0xff]  ;;  %277 = vst [vmem:[%s2305_s12 + $0xd8] sm:$0xff] %v276_v27 }
  0x25   : > { %279 = vst [vmem:[%s2305_s12 + $0xe0] sm:$0xff] %v278_v28  ;;  %281 = vst [vmem:[%s2305_s12 + $0xe8] sm:$0xff] %v280_v29  ;;  %v282_v30 = vld [vmem:[%s2300_s11 + $0x1e0] sm:$0xff]  ;;  %v284_v31 = vld [vmem:[%s2300_s11 + $0x1e8] sm:$0xff] }
  0x26   : > { %v286_v32 = vld [vmem:[%s2300_s11 + $0x200] sm:$0xff]  ;;  %283 = vst [vmem:[%s2305_s12 + $0xf0] sm:$0xff] %v282_v30  ;;  %285 = vst [vmem:[%s2305_s12 + $0xf8] sm:$0xff] %v284_v31  ;;  %v288_v33 = vld [vmem:[%s2300_s11 + $0x208] sm:$0xff] }
  0x27   : > { %287 = vst [vmem:[%s2305_s12 + $0x100] sm:$0xff] %v286_v32  ;;  %v290_v34 = vld [vmem:[%s2300_s11 + $0x220] sm:$0xff]  ;;  %v292_v35 = vld [vmem:[%s2300_s11 + $0x228] sm:$0xff]  ;;  %289 = vst [vmem:[%s2305_s12 + $0x108] sm:$0xff] %v288_v33 }
  0x28   : > { %291 = vst [vmem:[%s2305_s12 + $0x110] sm:$0xff] %v290_v34  ;;  %293 = vst [vmem:[%s2305_s12 + $0x118] sm:$0xff] %v292_v35  ;;  %v294_v36 = vld [vmem:[%s2300_s11 + $0x240] sm:$0xff]  ;;  %v296_v37 = vld [vmem:[%s2300_s11 + $0x248] sm:$0xff] }
  0x29   : > { %v298_v38 = vld [vmem:[%s2300_s11 + $0x260] sm:$0xff]  ;;  %295 = vst [vmem:[%s2305_s12 + $0x120] sm:$0xff] %v294_v36  ;;  %297 = vst [vmem:[%s2305_s12 + $0x128] sm:$0xff] %v296_v37  ;;  %v300_v39 = vld [vmem:[%s2300_s11 + $0x268] sm:$0xff] }
  0x2a   : > { %299 = vst [vmem:[%s2305_s12 + $0x130] sm:$0xff] %v298_v38  ;;  %v302_v40 = vld [vmem:[%s2300_s11 + $0x280] sm:$0xff]  ;;  %v304_v41 = vld [vmem:[%s2300_s11 + $0x288] sm:$0xff]  ;;  %301 = vst [vmem:[%s2305_s12 + $0x138] sm:$0xff] %v300_v39 }
  0x2b   : > { %303 = vst [vmem:[%s2305_s12 + $0x140] sm:$0xff] %v302_v40  ;;  %305 = vst [vmem:[%s2305_s12 + $0x148] sm:$0xff] %v304_v41  ;;  %v306_v42 = vld [vmem:[%s2300_s11 + $0x2a0] sm:$0xff]  ;;  %v308_v43 = vld [vmem:[%s2300_s11 + $0x2a8] sm:$0xff] }
  0x2c   : > { %v310_v44 = vld [vmem:[%s2300_s11 + $0x2c0] sm:$0xff]  ;;  %307 = vst [vmem:[%s2305_s12 + $0x150] sm:$0xff] %v306_v42  ;;  %309 = vst [vmem:[%s2305_s12 + $0x158] sm:$0xff] %v308_v43  ;;  %v312_v45 = vld [vmem:[%s2300_s11 + $0x2c8] sm:$0xff] }
  0x2d   : > { %311 = vst [vmem:[%s2305_s12 + $0x160] sm:$0xff] %v310_v44  ;;  %v314_v46 = vld [vmem:[%s2300_s11 + $0x2e0] sm:$0xff]  ;;  %v316_v47 = vld [vmem:[%s2300_s11 + $0x2e8] sm:$0xff]  ;;  %313 = vst [vmem:[%s2305_s12 + $0x168] sm:$0xff] %v312_v45 }
  0x2e   : > { %315 = vst [vmem:[%s2305_s12 + $0x170] sm:$0xff] %v314_v46  ;;  %317 = vst [vmem:[%s2305_s12 + $0x178] sm:$0xff] %v316_v47  ;;  %v318_v48 = vld [vmem:[%s2300_s11 + $0x300] sm:$0xff]  ;;  %v320_v49 = vld [vmem:[%s2300_s11 + $0x308] sm:$0xff] }
  0x2f   : > { %v322_v50 = vld [vmem:[%s2300_s11 + $0x320] sm:$0xff]  ;;  %319 = vst [vmem:[%s2305_s12 + $0x180] sm:$0xff] %v318_v48  ;;  %321 = vst [vmem:[%s2305_s12 + $0x188] sm:$0xff] %v320_v49  ;;  %v324_v51 = vld [vmem:[%s2300_s11 + $0x328] sm:$0xff] }
  0x30   : > { %323 = vst [vmem:[%s2305_s12 + $0x190] sm:$0xff] %v322_v50  ;;  %v326_v52 = vld [vmem:[%s2300_s11 + $0x340] sm:$0xff]  ;;  %v328_v53 = vld [vmem:[%s2300_s11 + $0x348] sm:$0xff]  ;;  %325 = vst [vmem:[%s2305_s12 + $0x198] sm:$0xff] %v324_v51 }
  0x31   : > { %327 = vst [vmem:[%s2305_s12 + $0x1a0] sm:$0xff] %v326_v52  ;;  %329 = vst [vmem:[%s2305_s12 + $0x1a8] sm:$0xff] %v328_v53  ;;  %v330_v54 = vld [vmem:[%s2300_s11 + $0x360] sm:$0xff]  ;;  %v332_v55 = vld [vmem:[%s2300_s11 + $0x368] sm:$0xff] }
  0x32   : > { %v334_v56 = vld [vmem:[%s2300_s11 + $0x380] sm:$0xff]  ;;  %331 = vst [vmem:[%s2305_s12 + $0x1b0] sm:$0xff] %v330_v54  ;;  %333 = vst [vmem:[%s2305_s12 + $0x1b8] sm:$0xff] %v332_v55  ;;  %v336_v57 = vld [vmem:[%s2300_s11 + $0x388] sm:$0xff] }
  0x33   : > { %335 = vst [vmem:[%s2305_s12 + $0x1c0] sm:$0xff] %v334_v56  ;;  %v338_v58 = vld [vmem:[%s2300_s11 + $0x3a0] sm:$0xff]  ;;  %v340_v59 = vld [vmem:[%s2300_s11 + $0x3a8] sm:$0xff]  ;;  %337 = vst [vmem:[%s2305_s12 + $0x1c8] sm:$0xff] %v336_v57 }
  0x34   : > { %339 = vst [vmem:[%s2305_s12 + $0x1d0] sm:$0xff] %v338_v58  ;;  %341 = vst [vmem:[%s2305_s12 + $0x1d8] sm:$0xff] %v340_v59  ;;  %v342_v60 = vld [vmem:[%s2300_s11 + $0x3c0] sm:$0xff]  ;;  %v344_v61 = vld [vmem:[%s2300_s11 + $0x3c8] sm:$0xff] }
  0x35   : > { %v346_v62 = vld [vmem:[%s2300_s11 + $0x3e0] sm:$0xff]  ;;  %343 = vst [vmem:[%s2305_s12 + $0x1e0] sm:$0xff] %v342_v60  ;;  %345 = vst [vmem:[%s2305_s12 + $0x1e8] sm:$0xff] %v344_v61  ;;  %v348_v63 = vld [vmem:[%s2300_s11 + $0x3e8] sm:$0xff] }
  0x36   : > { %347 = vst [vmem:[%s2305_s12 + $0x1f0] sm:$0xff] %v346_v62  ;;  %v350_v0 = vld [vmem:[%s2300_s11 + $0x400] sm:$0xff]  ;;  %v352_v1 = vld [vmem:[%s2300_s11 + $0x408] sm:$0xff]  ;;  %349 = vst [vmem:[%s2305_s12 + $0x1f8] sm:$0xff] %v348_v63 }
  0x37   : > { %351 = vst [vmem:[%s2305_s12 + $0x200] sm:$0xff] %v350_v0  ;;  %353 = vst [vmem:[%s2305_s12 + $0x208] sm:$0xff] %v352_v1  ;;  %v354_v2 = vld [vmem:[%s2300_s11 + $0x420] sm:$0xff]  ;;  %v356_v3 = vld [vmem:[%s2300_s11 + $0x428] sm:$0xff] }
  0x38   : > { %v358_v4 = vld [vmem:[%s2300_s11 + $0x440] sm:$0xff]  ;;  %355 = vst [vmem:[%s2305_s12 + $0x210] sm:$0xff] %v354_v2  ;;  %357 = vst [vmem:[%s2305_s12 + $0x218] sm:$0xff] %v356_v3  ;;  %v360_v5 = vld [vmem:[%s2300_s11 + $0x448] sm:$0xff] }
  0x39   : > { %359 = vst [vmem:[%s2305_s12 + $0x220] sm:$0xff] %v358_v4  ;;  %v362_v6 = vld [vmem:[%s2300_s11 + $0x460] sm:$0xff]  ;;  %v364_v7 = vld [vmem:[%s2300_s11 + $0x468] sm:$0xff]  ;;  %361 = vst [vmem:[%s2305_s12 + $0x228] sm:$0xff] %v360_v5 }
  0x3a   : > { %363 = vst [vmem:[%s2305_s12 + $0x230] sm:$0xff] %v362_v6  ;;  %365 = vst [vmem:[%s2305_s12 + $0x238] sm:$0xff] %v364_v7  ;;  %v366_v8 = vld [vmem:[%s2300_s11 + $0x480] sm:$0xff]  ;;  %v368_v9 = vld [vmem:[%s2300_s11 + $0x488] sm:$0xff] }
  0x3b   : > { %v370_v10 = vld [vmem:[%s2300_s11 + $0x4a0] sm:$0xff]  ;;  %367 = vst [vmem:[%s2305_s12 + $0x240] sm:$0xff] %v366_v8  ;;  %369 = vst [vmem:[%s2305_s12 + $0x248] sm:$0xff] %v368_v9  ;;  %v372_v11 = vld [vmem:[%s2300_s11 + $0x4a8] sm:$0xff] }
  0x3c   : > { %371 = vst [vmem:[%s2305_s12 + $0x250] sm:$0xff] %v370_v10  ;;  %v374_v12 = vld [vmem:[%s2300_s11 + $0x4c0] sm:$0xff]  ;;  %v376_v13 = vld [vmem:[%s2300_s11 + $0x4c8] sm:$0xff]  ;;  %373 = vst [vmem:[%s2305_s12 + $0x258] sm:$0xff] %v372_v11 }
  0x3d   : > { %375 = vst [vmem:[%s2305_s12 + $0x260] sm:$0xff] %v374_v12  ;;  %377 = vst [vmem:[%s2305_s12 + $0x268] sm:$0xff] %v376_v13  ;;  %v378_v14 = vld [vmem:[%s2300_s11 + $0x4e0] sm:$0xff]  ;;  %v380_v15 = vld [vmem:[%s2300_s11 + $0x4e8] sm:$0xff] }
  0x3e   : > { %v382_v16 = vld [vmem:[%s2300_s11 + $0x500] sm:$0xff]  ;;  %379 = vst [vmem:[%s2305_s12 + $0x270] sm:$0xff] %v378_v14  ;;  %381 = vst [vmem:[%s2305_s12 + $0x278] sm:$0xff] %v380_v15  ;;  %v384_v17 = vld [vmem:[%s2300_s11 + $0x508] sm:$0xff] }
  0x3f   : > { %383 = vst [vmem:[%s2305_s12 + $0x280] sm:$0xff] %v382_v16  ;;  %v386_v18 = vld [vmem:[%s2300_s11 + $0x520] sm:$0xff]  ;;  %v388_v19 = vld [vmem:[%s2300_s11 + $0x528] sm:$0xff]  ;;  %385 = vst [vmem:[%s2305_s12 + $0x288] sm:$0xff] %v384_v17 }
  0x40   : > { %387 = vst [vmem:[%s2305_s12 + $0x290] sm:$0xff] %v386_v18  ;;  %389 = vst [vmem:[%s2305_s12 + $0x298] sm:$0xff] %v388_v19  ;;  %v390_v20 = vld [vmem:[%s2300_s11 + $0x540] sm:$0xff]  ;;  %v392_v21 = vld [vmem:[%s2300_s11 + $0x548] sm:$0xff] }
  0x41   : > { %v394_v22 = vld [vmem:[%s2300_s11 + $0x560] sm:$0xff]  ;;  %391 = vst [vmem:[%s2305_s12 + $0x2a0] sm:$0xff] %v390_v20  ;;  %393 = vst [vmem:[%s2305_s12 + $0x2a8] sm:$0xff] %v392_v21  ;;  %v396_v23 = vld [vmem:[%s2300_s11 + $0x568] sm:$0xff] }
  0x42   : > { %395 = vst [vmem:[%s2305_s12 + $0x2b0] sm:$0xff] %v394_v22  ;;  %v398_v24 = vld [vmem:[%s2300_s11 + $0x580] sm:$0xff]  ;;  %v400_v25 = vld [vmem:[%s2300_s11 + $0x588] sm:$0xff]  ;;  %397 = vst [vmem:[%s2305_s12 + $0x2b8] sm:$0xff] %v396_v23 }
  0x43   : > { %399 = vst [vmem:[%s2305_s12 + $0x2c0] sm:$0xff] %v398_v24  ;;  %401 = vst [vmem:[%s2305_s12 + $0x2c8] sm:$0xff] %v400_v25  ;;  %v402_v26 = vld [vmem:[%s2300_s11 + $0x5a0] sm:$0xff]  ;;  %v404_v27 = vld [vmem:[%s2300_s11 + $0x5a8] sm:$0xff] }
  0x44   : > { %v406_v28 = vld [vmem:[%s2300_s11 + $0x5c0] sm:$0xff]  ;;  %403 = vst [vmem:[%s2305_s12 + $0x2d0] sm:$0xff] %v402_v26  ;;  %405 = vst [vmem:[%s2305_s12 + $0x2d8] sm:$0xff] %v404_v27  ;;  %v408_v29 = vld [vmem:[%s2300_s11 + $0x5c8] sm:$0xff] }
  0x45   : > { %407 = vst [vmem:[%s2305_s12 + $0x2e0] sm:$0xff] %v406_v28  ;;  %v410_v30 = vld [vmem:[%s2300_s11 + $0x5e0] sm:$0xff]  ;;  %v412_v31 = vld [vmem:[%s2300_s11 + $0x5e8] sm:$0xff]  ;;  %409 = vst [vmem:[%s2305_s12 + $0x2e8] sm:$0xff] %v408_v29 }
  0x46   : > { %411 = vst [vmem:[%s2305_s12 + $0x2f0] sm:$0xff] %v410_v30  ;;  %413 = vst [vmem:[%s2305_s12 + $0x2f8] sm:$0xff] %v412_v31  ;;  %v414_v32 = vld [vmem:[%s2300_s11 + $0x600] sm:$0xff]  ;;  %v416_v33 = vld [vmem:[%s2300_s11 + $0x608] sm:$0xff] }
  0x47   : > { %v418_v34 = vld [vmem:[%s2300_s11 + $0x620] sm:$0xff]  ;;  %415 = vst [vmem:[%s2305_s12 + $0x300] sm:$0xff] %v414_v32  ;;  %417 = vst [vmem:[%s2305_s12 + $0x308] sm:$0xff] %v416_v33  ;;  %v420_v35 = vld [vmem:[%s2300_s11 + $0x628] sm:$0xff] }
  0x48   : > { %419 = vst [vmem:[%s2305_s12 + $0x310] sm:$0xff] %v418_v34  ;;  %v422_v36 = vld [vmem:[%s2300_s11 + $0x640] sm:$0xff]  ;;  %v424_v37 = vld [vmem:[%s2300_s11 + $0x648] sm:$0xff]  ;;  %421 = vst [vmem:[%s2305_s12 + $0x318] sm:$0xff] %v420_v35 }
  0x49   : > { %423 = vst [vmem:[%s2305_s12 + $0x320] sm:$0xff] %v422_v36  ;;  %425 = vst [vmem:[%s2305_s12 + $0x328] sm:$0xff] %v424_v37  ;;  %v426_v38 = vld [vmem:[%s2300_s11 + $0x660] sm:$0xff]  ;;  %v428_v39 = vld [vmem:[%s2300_s11 + $0x668] sm:$0xff] }
  0x4a   : > { %v430_v40 = vld [vmem:[%s2300_s11 + $0x680] sm:$0xff]  ;;  %427 = vst [vmem:[%s2305_s12 + $0x330] sm:$0xff] %v426_v38  ;;  %429 = vst [vmem:[%s2305_s12 + $0x338] sm:$0xff] %v428_v39  ;;  %v432_v41 = vld [vmem:[%s2300_s11 + $0x688] sm:$0xff] }
  0x4b   : > { %431 = vst [vmem:[%s2305_s12 + $0x340] sm:$0xff] %v430_v40  ;;  %v434_v42 = vld [vmem:[%s2300_s11 + $0x6a0] sm:$0xff]  ;;  %v436_v43 = vld [vmem:[%s2300_s11 + $0x6a8] sm:$0xff]  ;;  %433 = vst [vmem:[%s2305_s12 + $0x348] sm:$0xff] %v432_v41 }
  0x4c   : > { %435 = vst [vmem:[%s2305_s12 + $0x350] sm:$0xff] %v434_v42  ;;  %437 = vst [vmem:[%s2305_s12 + $0x358] sm:$0xff] %v436_v43  ;;  %v438_v44 = vld [vmem:[%s2300_s11 + $0x6c0] sm:$0xff]  ;;  %v440_v45 = vld [vmem:[%s2300_s11 + $0x6c8] sm:$0xff] }
  0x4d   : > { %v442_v46 = vld [vmem:[%s2300_s11 + $0x6e0] sm:$0xff]  ;;  %439 = vst [vmem:[%s2305_s12 + $0x360] sm:$0xff] %v438_v44  ;;  %441 = vst [vmem:[%s2305_s12 + $0x368] sm:$0xff] %v440_v45  ;;  %v444_v47 = vld [vmem:[%s2300_s11 + $0x6e8] sm:$0xff] }
  0x4e   : > { %443 = vst [vmem:[%s2305_s12 + $0x370] sm:$0xff] %v442_v46  ;;  %v446_v48 = vld [vmem:[%s2300_s11 + $0x700] sm:$0xff]  ;;  %v448_v49 = vld [vmem:[%s2300_s11 + $0x708] sm:$0xff]  ;;  %445 = vst [vmem:[%s2305_s12 + $0x378] sm:$0xff] %v444_v47 }
  0x4f   : > { %447 = vst [vmem:[%s2305_s12 + $0x380] sm:$0xff] %v446_v48  ;;  %449 = vst [vmem:[%s2305_s12 + $0x388] sm:$0xff] %v448_v49  ;;  %v450_v50 = vld [vmem:[%s2300_s11 + $0x720] sm:$0xff]  ;;  %v452_v51 = vld [vmem:[%s2300_s11 + $0x728] sm:$0xff] }
  0x50   : > { %v454_v52 = vld [vmem:[%s2300_s11 + $0x740] sm:$0xff]  ;;  %451 = vst [vmem:[%s2305_s12 + $0x390] sm:$0xff] %v450_v50  ;;  %453 = vst [vmem:[%s2305_s12 + $0x398] sm:$0xff] %v452_v51  ;;  %v456_v53 = vld [vmem:[%s2300_s11 + $0x748] sm:$0xff] }
  0x51   : > { %455 = vst [vmem:[%s2305_s12 + $0x3a0] sm:$0xff] %v454_v52  ;;  %v458_v54 = vld [vmem:[%s2300_s11 + $0x760] sm:$0xff]  ;;  %v460_v55 = vld [vmem:[%s2300_s11 + $0x768] sm:$0xff]  ;;  %457 = vst [vmem:[%s2305_s12 + $0x3a8] sm:$0xff] %v456_v53 }
  0x52   : > { %459 = vst [vmem:[%s2305_s12 + $0x3b0] sm:$0xff] %v458_v54  ;;  %461 = vst [vmem:[%s2305_s12 + $0x3b8] sm:$0xff] %v460_v55  ;;  %v462_v56 = vld [vmem:[%s2300_s11 + $0x780] sm:$0xff]  ;;  %v464_v57 = vld [vmem:[%s2300_s11 + $0x788] sm:$0xff] }
  0x53   : > { %v466_v58 = vld [vmem:[%s2300_s11 + $0x7a0] sm:$0xff]  ;;  %463 = vst [vmem:[%s2305_s12 + $0x3c0] sm:$0xff] %v462_v56  ;;  %465 = vst [vmem:[%s2305_s12 + $0x3c8] sm:$0xff] %v464_v57  ;;  %v468_v59 = vld [vmem:[%s2300_s11 + $0x7a8] sm:$0xff] }
  0x54   : > { %467 = vst [vmem:[%s2305_s12 + $0x3d0] sm:$0xff] %v466_v58  ;;  %v470_v60 = vld [vmem:[%s2300_s11 + $0x7c0] sm:$0xff]  ;;  %v472_v61 = vld [vmem:[%s2300_s11 + $0x7c8] sm:$0xff]  ;;  %469 = vst [vmem:[%s2305_s12 + $0x3d8] sm:$0xff] %v468_v59 }
  0x55   : > { %471 = vst [vmem:[%s2305_s12 + $0x3e0] sm:$0xff] %v470_v60  ;;  %473 = vst [vmem:[%s2305_s12 + $0x3e8] sm:$0xff] %v472_v61  ;;  %v474_v62 = vld [vmem:[%s2300_s11 + $0x7e0] sm:$0xff]  ;;  %v476_v63 = vld [vmem:[%s2300_s11 + $0x7e8] sm:$0xff] }
  0x56   : > { %475 = vst [vmem:[%s2305_s12 + $0x3f0] sm:$0xff] %v474_v62  ;;  %477 = vst [vmem:[%s2305_s12 + $0x3f8] sm:$0xff] %v476_v63 }
  0x57 PF: > { %p1760_p7 = scmp.ge.s32.totalorder %s2212_s21, 1  ;;  %p498_p8 = scmp.lt.s32.totalorder %s2212_s21, 17 }
  0x59   : > { %p499_p9 = pnand %p1760_p7, %p498_p8 }
  0x5a   : > { %s505_s13 = sand.u32 (!%p499_p9), 1, %s2188_s15   ;;  %s1762_s14 = sshll.u32 (!%p499_p9), %s2196_s17, 2 }
  0x5b   : > { %502 = sbr.rel (%p499_p9) target bundleno = 453 (0x1c5), region = 55  ;;  %s1761_s24 = sshll.u32 (!%p499_p9), %s505_s13, 10 }
  0x5c   : > { %p554_p10 = scmp.lt.s32.totalorder (!%p499_p9), %s1762_s14, 31  ;;  %s1764_s25 = sshll.u32 (!%p499_p9), %s2200_s18, 2 }
  0x5d   : > { %p564_p11 = scmp.lt.s32.totalorder (!%p499_p9), %s1764_s25, 7  ;;  %s2586_s13 = scalar_lea.vmem (!%p499_p9), [#allocation3], %s1761_s24 }
  0x5e   : > { %p1768_p12 = scmp.ne.s32.totalorder (!%p499_p9), %s2196_s17, 0 }
  0x60   : > { %s2785_s14 = smov (!%p554_p10, %s1762_s14), 31  ;;  %s2787_s25 = smov (!%p564_p11, %s1764_s25), 7 }
  0x61   : > { %s1763_s26 = sshll.u32 %s2785_s14, 2  ;;  %s566_s15 = scalar_lea.vmem %s2769_s2, %s2787_s25 }
  0x62   : > { %s2568_s30 = scalar_lea.vmem %s2767_s0, %s1763_s26  ;;  %s571_s18 = scalar_lea.vmem %s2770_s3, %s2787_s25 }
  0x63   : > { %s1767_s9 = sshll.u32 %s2787_s25, 3  ;;  %586 = sbr.rel (%p1768_p12) target bundleno = 107 (0x6b), region = 63 }
  0x64   : > { %s2584_s12 = scalar_lea.vmem %s2771_s4, %s1767_s9 }
  0x68   : > { %v2214_v0 = vmov 0.0  }
  0x69   : > { %587 = vst [vmem:[#allocation2 + $0x10] sm:$0xff] %v2214_v0  ;;  %588 = vst [vmem:[#allocation2] sm:$0xff] %v2214_v0 }
  0x6a   : > { %589 = vst [vmem:[#allocation2 + $0x18] sm:$0xff] %v2214_v0  ;;  %590 = vst [vmem:[#allocation2 + $0x8] sm:$0xff] %v2214_v0 }
  0x6b PF: > { %v1962_v1 = vld [vmem:[%s2586_s13 + $0xe4] ss:$16 sps:$4 sm:$0xff]   ;;  %v1966_v3 = vld [vmem:[%s2586_s13 + $0xe0] ss:$16 sps:$4 sm:$0xff]   ;;  %v596_v49 = vld [vmem:[%s2568_s30 + $0x8] sm:$0xff]  ;;  %p1901_p13 = scmp.ne.s32.totalorder %s2196_s17, 7 }
  0x6c   : > { %v1964_v2 = vld [vmem:[%s2586_s13 + $0x2e4] ss:$16 sps:$4 sm:$0xff]   ;;  %1379 = vmatprep.subr.bf16.mxu0 %v1962_v1  ;;  %v1967_v4 = vld [vmem:[%s2586_s13 + $0x2e0] ss:$16 sps:$4 sm:$0xff]   ;;  %v1772_v52 = vcombine.high %v596_v49, %v596_v49 }
  0x6d   : > { %1420 = vmatprep.subr.bf16.mxu1 %v1964_v2  ;;  %v1968_v5 = vld [vmem:[%s2586_s13 + $0xc4] ss:$16 sps:$4 sm:$0xff]   ;;  %1380 = vmatpush1.bf16.msra.mxu0 %v1966_v3  ;;  %v1972_v7 = vld [vmem:[%s2586_s13 + $0xc0] ss:$16 sps:$4 sm:$0xff]  }
  0x6e   : > { %1421 = vmatpush1.bf16.msra.mxu1 %v1967_v4  ;;  %v1970_v6 = vld [vmem:[%s2586_s13 + $0x2c4] ss:$16 sps:$4 sm:$0xff]   ;;  %1381 = vmatprep.subr.bf16.mxu0 %v1968_v5  ;;  %v1973_v8 = vld [vmem:[%s2586_s13 + $0x2c0] ss:$16 sps:$4 sm:$0xff]   ;;  %v2064_v5 = vld [vmem:[%s2586_s13 + $0xec] ss:$16 sps:$4 sm:$0xff]  }
  0x6f   : > { %1422 = vmatprep.subr.bf16.mxu1 %v1970_v6  ;;  %v1974_v9 = vld [vmem:[%s2586_s13 + $0xa4] ss:$16 sps:$4 sm:$0xff]   ;;  %v1978_v11 = vld [vmem:[%s2586_s13 + $0xa0] ss:$16 sps:$4 sm:$0xff]   ;;  %1452 = vmatprep.mubr.bf16.mxu1 %v1772_v52  ;;  %v2067_v6 = vld [vmem:[%s2586_s13 + $0x2ec] ss:$16 sps:$4 sm:$0xff]  }
  0x70   : > { %v1976_v10 = vld [vmem:[%s2586_s13 + $0x2a4] ss:$16 sps:$4 sm:$0xff]   ;;  %v1979_v12 = vld [vmem:[%s2586_s13 + $0x2a0] ss:$16 sps:$4 sm:$0xff]  }
  0x71   : > { %1382 = vmatpush1.bf16.msra.mxu0 %v1972_v7  ;;  %v1980_v13 = vld [vmem:[%s2586_s13 + $0x84] ss:$16 sps:$4 sm:$0xff]   ;;  %v1984_v15 = vld [vmem:[%s2586_s13 + $0x80] ss:$16 sps:$4 sm:$0xff]  }
  0x72   : > { %1423 = vmatpush1.bf16.msra.mxu1 %v1973_v8  ;;  %1383 = vmatprep.subr.bf16.mxu0 %v1974_v9  ;;  %v1982_v14 = vld [vmem:[%s2586_s13 + $0x284] ss:$16 sps:$4 sm:$0xff]   ;;  %v1985_v16 = vld [vmem:[%s2586_s13 + $0x280] ss:$16 sps:$4 sm:$0xff]   ;;  %v2662_v8 = vcombine.low %v596_v49, %v596_v49  ;;  %v2062_v9 = vld [vmem:[%s2586_s13 + $0xe8] ss:$16 sps:$4 sm:$0xff]  }
  0x73   : > { %1424 = vmatprep.subr.bf16.mxu1 %v1976_v10  ;;  %v1986_v17 = vld [vmem:[%s2586_s13 + $0x64] ss:$16 sps:$4 sm:$0xff]   ;;  %v1990_v19 = vld [vmem:[%s2586_s13 + $0x60] ss:$16 sps:$4 sm:$0xff]   ;;  %v2065_v10 = vld [vmem:[%s2586_s13 + $0x2e8] ss:$16 sps:$4 sm:$0xff]  }
  0x74   : > { %v1988_v18 = vld [vmem:[%s2586_s13 + $0x264] ss:$16 sps:$4 sm:$0xff]   ;;  %v1991_v20 = vld [vmem:[%s2586_s13 + $0x260] ss:$16 sps:$4 sm:$0xff]   ;;  %v2122_v49 = vld [vmem:[%s2586_s13 + $0x1a8] ss:$16 sps:$4 sm:$0xff]  }
  0x75   : > { %1384 = vmatpush1.bf16.msra.mxu0 %v1978_v11  ;;  %v1992_v21 = vld [vmem:[%s2586_s13 + $0x44] ss:$16 sps:$4 sm:$0xff]   ;;  %v1996_v23 = vld [vmem:[%s2586_s13 + $0x40] ss:$16 sps:$4 sm:$0xff]   ;;  %v2070_v11 = vld [vmem:[%s2586_s13 + $0xcc] ss:$16 sps:$4 sm:$0xff]  }
  0x76   : > { %1425 = vmatpush1.bf16.msra.mxu1 %v1979_v12  ;;  %1385 = vmatprep.subr.bf16.mxu0 %v1980_v13  ;;  %v1994_v22 = vld [vmem:[%s2586_s13 + $0x244] ss:$16 sps:$4 sm:$0xff]   ;;  %v1997_v24 = vld [vmem:[%s2586_s13 + $0x240] ss:$16 sps:$4 sm:$0xff]   ;;  %v2073_v12 = vld [vmem:[%s2586_s13 + $0x2cc] ss:$16 sps:$4 sm:$0xff]  }
  0x77   : > { %1426 = vmatprep.subr.bf16.mxu1 %v1982_v14  ;;  %v1998_v25 = vld [vmem:[%s2586_s13 + $0x24] ss:$16 sps:$4 sm:$0xff]   ;;  %v2002_v27 = vld [vmem:[%s2586_s13 + $0x20] ss:$16 sps:$4 sm:$0xff]   ;;  %v2068_v13 = vld [vmem:[%s2586_s13 + $0xc8] ss:$16 sps:$4 sm:$0xff]  }
  0x78   : > { %v2000_v26 = vld [vmem:[%s2586_s13 + $0x224] ss:$16 sps:$4 sm:$0xff]   ;;  %v2003_v28 = vld [vmem:[%s2586_s13 + $0x220] ss:$16 sps:$4 sm:$0xff]   ;;  %v2071_v14 = vld [vmem:[%s2586_s13 + $0x2c8] ss:$16 sps:$4 sm:$0xff]  }
  0x79   : > { %1386 = vmatpush1.bf16.msra.mxu0 %v1984_v15  ;;  %v2004_v29 = vld [vmem:[%s2586_s13 + $0x4] ss:$16 sps:$4 sm:$0xff]   ;;  %v2008_v31 = vld [vmem:[%s2586_s13] ss:$16 sps:$4 sm:$0xff]   ;;  %v2076_v15 = vld [vmem:[%s2586_s13 + $0xac] ss:$16 sps:$4 sm:$0xff]  }
  0x7a   : > { %1427 = vmatpush1.bf16.msra.mxu1 %v1985_v16  ;;  %1387 = vmatprep.subr.bf16.mxu0 %v1986_v17  ;;  %v2006_v30 = vld [vmem:[%s2586_s13 + $0x204] ss:$16 sps:$4 sm:$0xff]   ;;  %v2009_v32 = vld [vmem:[%s2586_s13 + $0x200] ss:$16 sps:$4 sm:$0xff]   ;;  %v2079_v16 = vld [vmem:[%s2586_s13 + $0x2ac] ss:$16 sps:$4 sm:$0xff]  }
  0x7b   : > { %1428 = vmatprep.subr.bf16.mxu1 %v1988_v18  ;;  %v2010_v33 = vld [vmem:[%s2586_s13 + $0x1e4] ss:$16 sps:$4 sm:$0xff]   ;;  %v2014_v35 = vld [vmem:[%s2586_s13 + $0x1e0] ss:$16 sps:$4 sm:$0xff]   ;;  %v2074_v17 = vld [vmem:[%s2586_s13 + $0xa8] ss:$16 sps:$4 sm:$0xff]  }
  0x7c   : > { %v2012_v34 = vld [vmem:[%s2586_s13 + $0x3e4] ss:$16 sps:$4 sm:$0xff]   ;;  %v2015_v36 = vld [vmem:[%s2586_s13 + $0x3e0] ss:$16 sps:$4 sm:$0xff]   ;;  %v2077_v18 = vld [vmem:[%s2586_s13 + $0x2a8] ss:$16 sps:$4 sm:$0xff]  }
  0x7d   : > { %1388 = vmatpush1.bf16.msra.mxu0 %v1990_v19  ;;  %v2016_v37 = vld [vmem:[%s2586_s13 + $0x1c4] ss:$16 sps:$4 sm:$0xff]   ;;  %v2020_v39 = vld [vmem:[%s2586_s13 + $0x1c0] ss:$16 sps:$4 sm:$0xff]   ;;  %v2082_v19 = vld [vmem:[%s2586_s13 + $0x8c] ss:$16 sps:$4 sm:$0xff]  }
  0x7e   : > { %1429 = vmatpush1.bf16.msra.mxu1 %v1991_v20  ;;  %1389 = vmatprep.subr.bf16.mxu0 %v1992_v21  ;;  %v2018_v38 = vld [vmem:[%s2586_s13 + $0x3c4] ss:$16 sps:$4 sm:$0xff]   ;;  %v2021_v40 = vld [vmem:[%s2586_s13 + $0x3c0] ss:$16 sps:$4 sm:$0xff]   ;;  %v2085_v20 = vld [vmem:[%s2586_s13 + $0x28c] ss:$16 sps:$4 sm:$0xff]  }
  0x7f   : > { %1430 = vmatprep.subr.bf16.mxu1 %v1994_v22  ;;  %v2022_v41 = vld [vmem:[%s2586_s13 + $0x1a4] ss:$16 sps:$4 sm:$0xff]   ;;  %v2026_v43 = vld [vmem:[%s2586_s13 + $0x1a0] ss:$16 sps:$4 sm:$0xff]   ;;  %v2080_v21 = vld [vmem:[%s2586_s13 + $0x88] ss:$16 sps:$4 sm:$0xff]  }
  0x80   : > { %v2024_v42 = vld [vmem:[%s2586_s13 + $0x3a4] ss:$16 sps:$4 sm:$0xff]   ;;  %v2027_v44 = vld [vmem:[%s2586_s13 + $0x3a0] ss:$16 sps:$4 sm:$0xff]   ;;  %v2083_v22 = vld [vmem:[%s2586_s13 + $0x288] ss:$16 sps:$4 sm:$0xff]  }
  0x81   : > { %1390 = vmatpush1.bf16.msra.mxu0 %v1996_v23  ;;  %v2028_v45 = vld [vmem:[%s2586_s13 + $0x184] ss:$16 sps:$4 sm:$0xff]   ;;  %v2032_v50 = vld [vmem:[%s2586_s13 + $0x180] ss:$16 sps:$4 sm:$0xff]   ;;  %v2088_v23 = vld [vmem:[%s2586_s13 + $0x6c] ss:$16 sps:$4 sm:$0xff]  }
  0x82   : > { %1431 = vmatpush1.bf16.msra.mxu1 %v1997_v24  ;;  %1391 = vmatprep.subr.bf16.mxu0 %v1998_v25  ;;  %v2030_v46 = vld [vmem:[%s2586_s13 + $0x384] ss:$16 sps:$4 sm:$0xff]   ;;  %v2033_v51 = vld [vmem:[%s2586_s13 + $0x380] ss:$16 sps:$4 sm:$0xff]   ;;  %v2091_v24 = vld [vmem:[%s2586_s13 + $0x26c] ss:$16 sps:$4 sm:$0xff]  }
  0x83   : > { %1432 = vmatprep.subr.bf16.mxu1 %v2000_v26  ;;  %v595_v47 = vld [vmem:[%s2568_s30] sm:$0xff]  ;;  %v2086_v25 = vld [vmem:[%s2586_s13 + $0x68] ss:$16 sps:$4 sm:$0xff]  }
  0x84   : > { %v2636_v48 = vcombine.high %v595_v47, %v595_v47  ;;  %v2034_v53 = vld [vmem:[%s2586_s13 + $0x164] ss:$16 sps:$4 sm:$0xff]   ;;  %v2038_v55 = vld [vmem:[%s2586_s13 + $0x160] ss:$16 sps:$4 sm:$0xff]   ;;  %v2660_v7 = vcombine.low %v595_v47, %v595_v47  ;;  %v2089_v26 = vld [vmem:[%s2586_s13 + $0x268] ss:$16 sps:$4 sm:$0xff]  }
  0x85   : > { %1392 = vmatpush1.bf16.msra.mxu0 %v2002_v27  ;;  %v2036_v54 = vld [vmem:[%s2586_s13 + $0x364] ss:$16 sps:$4 sm:$0xff]   ;;  %v2039_v56 = vld [vmem:[%s2586_s13 + $0x360] ss:$16 sps:$4 sm:$0xff]   ;;  %v2094_v27 = vld [vmem:[%s2586_s13 + $0x4c] ss:$16 sps:$4 sm:$0xff]  }
  0x86   : > { %1433 = vmatpush1.bf16.msra.mxu1 %v2003_v28  ;;  %1393 = vmatprep.subr.bf16.mxu0 %v2004_v29  ;;  %v2040_v57 = vld [vmem:[%s2586_s13 + $0x144] ss:$16 sps:$4 sm:$0xff]   ;;  %v2044_v59 = vld [vmem:[%s2586_s13 + $0x140] ss:$16 sps:$4 sm:$0xff]   ;;  %v2097_v28 = vld [vmem:[%s2586_s13 + $0x24c] ss:$16 sps:$4 sm:$0xff]  }
  0x87   : > { %1434 = vmatprep.subr.bf16.mxu1 %v2006_v30  ;;  %1411 = vmatprep.mubr.bf16.mxu0 %v2636_v48  ;;  %v2042_v58 = vld [vmem:[%s2586_s13 + $0x344] ss:$16 sps:$4 sm:$0xff]   ;;  %v2045_v60 = vld [vmem:[%s2586_s13 + $0x340] ss:$16 sps:$4 sm:$0xff]   ;;  %v2092_v29 = vld [vmem:[%s2586_s13 + $0x48] ss:$16 sps:$4 sm:$0xff]  }
  0x88   : > { %v2046_v61 = vld [vmem:[%s2586_s13 + $0x124] ss:$16 sps:$4 sm:$0xff]   ;;  %v2050_v63 = vld [vmem:[%s2586_s13 + $0x120] ss:$16 sps:$4 sm:$0xff]   ;;  %v2095_v30 = vld [vmem:[%s2586_s13 + $0x248] ss:$16 sps:$4 sm:$0xff]  }
  0x89   : > { %1394 = vmatpush1.bf16.msra.mxu0 %v2008_v31  ;;  %v2048_v62 = vld [vmem:[%s2586_s13 + $0x324] ss:$16 sps:$4 sm:$0xff]   ;;  %v2051_v0 = vld [vmem:[%s2586_s13 + $0x320] ss:$16 sps:$4 sm:$0xff]   ;;  %v2100_v31 = vld [vmem:[%s2586_s13 + $0x2c] ss:$16 sps:$4 sm:$0xff]  }
  0x8a   : > { %1435 = vmatpush1.bf16.msra.mxu1 %v2009_v32  ;;  %1395 = vmatprep.subr.bf16.mxu0 %v2010_v33  ;;  %v2052_v1 = vld [vmem:[%s2586_s13 + $0x104] ss:$16 sps:$4 sm:$0xff]   ;;  %v2056_v3 = vld [vmem:[%s2586_s13 + $0x100] ss:$16 sps:$4 sm:$0xff]   ;;  %v2103_v32 = vld [vmem:[%s2586_s13 + $0x22c] ss:$16 sps:$4 sm:$0xff]  }
  0x8b   : > { %1436 = vmatprep.subr.bf16.mxu1 %v2012_v34  ;;  %v2054_v2 = vld [vmem:[%s2586_s13 + $0x304] ss:$16 sps:$4 sm:$0xff]   ;;  %v2057_v4 = vld [vmem:[%s2586_s13 + $0x300] ss:$16 sps:$4 sm:$0xff]   ;;  %v2098_v33 = vld [vmem:[%s2586_s13 + $0x28] ss:$16 sps:$4 sm:$0xff]  }
  0x8c   : > { %v2101_v34 = vld [vmem:[%s2586_s13 + $0x228] ss:$16 sps:$4 sm:$0xff]   ;;  %v2124_v47 = vld [vmem:[%s2586_s13 + $0x1ac] ss:$16 sps:$4 sm:$0xff]  }
  0x8d   : > { %1396 = vmatpush2.bf16.msra.mxu0 %v2014_v35  ;;  %v2106_v35 = vld [vmem:[%s2586_s13 + $0xc] ss:$16 sps:$4 sm:$0xff]  }
  0x8e   : > { %1437 = vmatpush2.bf16.msra.mxu1 %v2015_v36  ;;  %1397 = vmatprep.subr.bf16.mxu0 %v2016_v37  ;;  %v2109_v36 = vld [vmem:[%s2586_s13 + $0x20c] ss:$16 sps:$4 sm:$0xff]   ;;  %v2104_v37 = vld [vmem:[%s2586_s13 + $0x8] ss:$16 sps:$4 sm:$0xff]  }
  0x8f   : > { %1438 = vmatprep.subr.bf16.mxu1 %v2018_v38  ;;  %v2107_v38 = vld [vmem:[%s2586_s13 + $0x208] ss:$16 sps:$4 sm:$0xff]  }
  0x91   : > { %1398 = vmatpush2.bf16.msra.mxu0 %v2020_v39  ;;  %v2112_v39 = vld [vmem:[%s2586_s13 + $0x1ec] ss:$16 sps:$4 sm:$0xff]  }
  0x92   : > { %1439 = vmatpush2.bf16.msra.mxu1 %v2021_v40  ;;  %1399 = vmatprep.subr.bf16.mxu0 %v2022_v41  ;;  %v2115_v40 = vld [vmem:[%s2586_s13 + $0x3ec] ss:$16 sps:$4 sm:$0xff]   ;;  %v2110_v41 = vld [vmem:[%s2586_s13 + $0x1e8] ss:$16 sps:$4 sm:$0xff]  }
  0x93   : > { %1440 = vmatprep.subr.bf16.mxu1 %v2024_v42  ;;  %v2113_v42 = vld [vmem:[%s2586_s13 + $0x3e8] ss:$16 sps:$4 sm:$0xff]  }
  0x95   : > { %1400 = vmatpush2.bf16.msra.mxu0 %v2026_v43  ;;  %v2118_v43 = vld [vmem:[%s2586_s13 + $0x1cc] ss:$16 sps:$4 sm:$0xff]  }
  0x96   : > { %1441 = vmatpush2.bf16.msra.mxu1 %v2027_v44  ;;  %1401 = vmatprep.subr.bf16.mxu0 %v2028_v45  ;;  %v2121_v44 = vld [vmem:[%s2586_s13 + $0x3cc] ss:$16 sps:$4 sm:$0xff]   ;;  %v2116_v45 = vld [vmem:[%s2586_s13 + $0x1c8] ss:$16 sps:$4 sm:$0xff]  }
  0x97   : > { %1442 = vmatprep.subr.bf16.mxu1 %v2030_v46  ;;  %v2119_v46 = vld [vmem:[%s2586_s13 + $0x3c8] ss:$16 sps:$4 sm:$0xff]  }
  0x99   : > { %1402 = vmatpush2.bf16.msra.mxu0 %v2032_v50  ;;  %v2125_v50 = vld [vmem:[%s2586_s13 + $0x3a8] ss:$16 sps:$4 sm:$0xff]  }
  0x9a   : > { %1443 = vmatpush2.bf16.msra.mxu1 %v2033_v51  ;;  %1403 = vmatprep.subr.bf16.mxu0 %v2034_v53  ;;  %v2130_v51 = vld [vmem:[%s2586_s13 + $0x18c] ss:$16 sps:$4 sm:$0xff]   ;;  %v2128_v53 = vld [vmem:[%s2586_s13 + $0x188] ss:$16 sps:$4 sm:$0xff]  }
  0x9b   : > { %1444 = vmatprep.subr.bf16.mxu1 %v2036_v54  ;;  %v2131_v54 = vld [vmem:[%s2586_s13 + $0x388] ss:$16 sps:$4 sm:$0xff]  }
  0x9d   : > { %1404 = vmatpush2.bf16.msra.mxu0 %v2038_v55  ;;  %v2136_v55 = vld [vmem:[%s2586_s13 + $0x16c] ss:$16 sps:$4 sm:$0xff]  }
  0x9e   : > { %1445 = vmatpush2.bf16.msra.mxu1 %v2039_v56  ;;  %1405 = vmatprep.subr.bf16.mxu0 %v2040_v57  ;;  %v2139_v56 = vld [vmem:[%s2586_s13 + $0x36c] ss:$16 sps:$4 sm:$0xff]   ;;  %v2134_v57 = vld [vmem:[%s2586_s13 + $0x168] ss:$16 sps:$4 sm:$0xff]  }
  0x9f   : > { %1446 = vmatprep.subr.bf16.mxu1 %v2042_v58  ;;  %v2137_v58 = vld [vmem:[%s2586_s13 + $0x368] ss:$16 sps:$4 sm:$0xff]  }
  0xa1   : > { %1406 = vmatpush2.bf16.msra.mxu0 %v2044_v59  ;;  %v2142_v59 = vld [vmem:[%s2586_s13 + $0x14c] ss:$16 sps:$4 sm:$0xff]  }
  0xa2   : > { %1447 = vmatpush2.bf16.msra.mxu1 %v2045_v60  ;;  %1407 = vmatprep.subr.bf16.mxu0 %v2046_v61  ;;  %v2145_v60 = vld [vmem:[%s2586_s13 + $0x34c] ss:$16 sps:$4 sm:$0xff]   ;;  %v2140_v61 = vld [vmem:[%s2586_s13 + $0x148] ss:$16 sps:$4 sm:$0xff]  }
  0xa3   : > { %1448 = vmatprep.subr.bf16.mxu1 %v2048_v62  ;;  %v2143_v62 = vld [vmem:[%s2586_s13 + $0x348] ss:$16 sps:$4 sm:$0xff]  }
  0xa5   : > { %1408 = vmatpush2.bf16.msra.mxu0 %v2050_v63  ;;  %v2148_v63 = vld [vmem:[%s2586_s13 + $0x12c] ss:$16 sps:$4 sm:$0xff]  }
  0xa6   : > { %1449 = vmatpush2.bf16.msra.mxu1 %v2051_v0  ;;  %1409 = vmatprep.subr.bf16.mxu0 %v2052_v1  ;;  %v2151_v0 = vld [vmem:[%s2586_s13 + $0x32c] ss:$16 sps:$4 sm:$0xff]   ;;  %v2146_v1 = vld [vmem:[%s2586_s13 + $0x128] ss:$16 sps:$4 sm:$0xff]  }
  0xa7   : > { %1450 = vmatprep.subr.bf16.mxu1 %v2054_v2  ;;  %v2149_v2 = vld [vmem:[%s2586_s13 + $0x328] ss:$16 sps:$4 sm:$0xff]  }
  0xa9   : > { %1410 = vmatpush2.bf16.msra.mxu0 %v2056_v3  ;;  %v2154_v3 = vld [vmem:[%s2586_s13 + $0x10c] ss:$16 sps:$4 sm:$0xff]  }
  0xaa   : > { %1451 = vmatpush2.bf16.msra.mxu1 %v2057_v4  ;;  %1461 = vmatprep.subr.bf16.mxu0 %v2064_v5  ;;  %v2157_v4 = vld [vmem:[%s2586_s13 + $0x30c] ss:$16 sps:$4 sm:$0xff]   ;;  %v2152_v5 = vld [vmem:[%s2586_s13 + $0x108] ss:$16 sps:$4 sm:$0xff]  }
  0xab   : > { %1502 = vmatprep.subr.bf16.mxu1 %v2067_v6  ;;  %v2155_v6 = vld [vmem:[%s2586_s13 + $0x308] ss:$16 sps:$4 sm:$0xff]  }
  0xac   : > { %1412 = vmatmul.mubr.bf16.vlgmr.msra.gmra.mxu0 %v2660_v7 }
  0xad   : > { %1453 = vmatmul.mubr.bf16.vlgmr.msra.gmra.mxu1 %v2662_v8  ;;  %1462 = vmatpush1.bf16.msra.mxu0 %v2062_v9 }
  0xae   : > { %1503 = vmatpush1.bf16.msra.mxu1 %v2065_v10  ;;  %1463 = vmatprep.subr.bf16.mxu0 %v2070_v11  ;;  %v591_v10 = vld [vmem:[#allocation2 + $0x10] sm:$0xff] }
  0xaf   : > { %1504 = vmatprep.subr.bf16.mxu1 %v2073_v12  ;;  %1493 = vmatprep.mubr.bf16.mxu0 %v2636_v48  ;;  %v2127_v48 = vld [vmem:[%s2586_s13 + $0x3ac] ss:$16 sps:$4 sm:$0xff]  }
  0xb0   : > { %1534 = vmatprep.mubr.bf16.mxu1 %v1772_v52  ;;  %v2133_v52 = vld [vmem:[%s2586_s13 + $0x38c] ss:$16 sps:$4 sm:$0xff]  }
  0xb1   : > { %1464 = vmatpush1.bf16.msra.mxu0 %v2068_v13 }
  0xb2   : > { %1505 = vmatpush1.bf16.msra.mxu1 %v2071_v14  ;;  %1465 = vmatprep.subr.bf16.mxu0 %v2076_v15  ;;  %v592_v14 = vld [vmem:[#allocation2] sm:$0xff] }
  0xb3   : > { %1506 = vmatprep.subr.bf16.mxu1 %v2079_v16 }
  0xb5   : > { %1466 = vmatpush1.bf16.msra.mxu0 %v2074_v17 }
  0xb6   : > { %1507 = vmatpush1.bf16.msra.mxu1 %v2077_v18  ;;  %1467 = vmatprep.subr.bf16.mxu0 %v2082_v19 }
  0xb7   : > { %1508 = vmatprep.subr.bf16.mxu1 %v2085_v20 }
  0xb9   : > { %1468 = vmatpush1.bf16.msra.mxu0 %v2080_v21 }
  0xba   : > { %1509 = vmatpush1.bf16.msra.mxu1 %v2083_v22  ;;  %1469 = vmatprep.subr.bf16.mxu0 %v2088_v23 }
  0xbb   : > { %1510 = vmatprep.subr.bf16.mxu1 %v2091_v24 }
  0xbd   : > { %1470 = vmatpush1.bf16.msra.mxu0 %v2086_v25 }
  0xbe   : > { %1511 = vmatpush1.bf16.msra.mxu1 %v2089_v26  ;;  %1471 = vmatprep.subr.bf16.mxu0 %v2094_v27  ;;  %v594_v26 = vld [vmem:[#allocation2 + $0x8] sm:$0xff] }
  0xbf   : > { %1512 = vmatprep.subr.bf16.mxu1 %v2097_v28 }
  0xc1   : > { %1472 = vmatpush1.bf16.msra.mxu0 %v2092_v29 }
  0xc2   : > { %1513 = vmatpush1.bf16.msra.mxu1 %v2095_v30  ;;  %1473 = vmatprep.subr.bf16.mxu0 %v2100_v31 }
  0xc3   : > { %1514 = vmatprep.subr.bf16.mxu1 %v2103_v32 }
  0xc5   : > { %1474 = vmatpush1.bf16.msra.mxu0 %v2098_v33 }
  0xc6   : > { %1515 = vmatpush1.bf16.msra.mxu1 %v2101_v34  ;;  %1475 = vmatprep.subr.bf16.mxu0 %v2106_v35 }
  0xc7   : > { %1516 = vmatprep.subr.bf16.mxu1 %v2109_v36 }
  0xc9   : > { %1476 = vmatpush1.bf16.msra.mxu0 %v2104_v37 }
  0xca   : > { %1517 = vmatpush1.bf16.msra.mxu1 %v2107_v38  ;;  %1477 = vmatprep.subr.bf16.mxu0 %v2112_v39 }
  0xcb   : > { %1518 = vmatprep.subr.bf16.mxu1 %v2115_v40 }
  0xcd   : > { %1478 = vmatpush2.bf16.msra.mxu0 %v2110_v41 }
  0xce   : > { %1519 = vmatpush2.bf16.msra.mxu1 %v2113_v42  ;;  %1479 = vmatprep.subr.bf16.mxu0 %v2118_v43 }
  0xcf   : > { %1520 = vmatprep.subr.bf16.mxu1 %v2121_v44 }
  0xd1   : > { %1480 = vmatpush2.bf16.msra.mxu0 %v2116_v45 }
  0xd2   : > { %1521 = vmatpush2.bf16.msra.mxu1 %v2119_v46  ;;  %1481 = vmatprep.subr.bf16.mxu0 %v2124_v47 }
  0xd3   : > { %1522 = vmatprep.subr.bf16.mxu1 %v2127_v48 }
  0xd5   : > { %1482 = vmatpush2.bf16.msra.mxu0 %v2122_v49 }
  0xd6   : > { %1523 = vmatpush2.bf16.msra.mxu1 %v2125_v50  ;;  %1483 = vmatprep.subr.bf16.mxu0 %v2130_v51 }
  0xd7   : > { %1524 = vmatprep.subr.bf16.mxu1 %v2133_v52 }
  0xd9   : > { %1484 = vmatpush2.bf16.msra.mxu0 %v2128_v53 }
  0xda   : > { %1525 = vmatpush2.bf16.msra.mxu1 %v2131_v54  ;;  %1485 = vmatprep.subr.bf16.mxu0 %v2136_v55 }
  0xdb   : > { %1526 = vmatprep.subr.bf16.mxu1 %v2139_v56 }
  0xdd   : > { %1486 = vmatpush2.bf16.msra.mxu0 %v2134_v57 }
  0xde   : > { %1527 = vmatpush2.bf16.msra.mxu1 %v2137_v58  ;;  %1487 = vmatprep.subr.bf16.mxu0 %v2142_v59 }
  0xdf   : > { %1528 = vmatprep.subr.bf16.mxu1 %v2145_v60 }
  0xe1   : > { %1488 = vmatpush2.bf16.msra.mxu0 %v2140_v61 }
  0xe2   : > { %1529 = vmatpush2.bf16.msra.mxu1 %v2143_v62  ;;  %1489 = vmatprep.subr.bf16.mxu0 %v2148_v63 }
  0xe3   : > { %1530 = vmatprep.subr.bf16.mxu1 %v2151_v0 }
  0xe5   : > { %1490 = vmatpush2.bf16.msra.mxu0 %v2146_v1 }
  0xe6   : > { %1531 = vmatpush2.bf16.msra.mxu1 %v2149_v2  ;;  %1491 = vmatprep.subr.bf16.mxu0 %v2154_v3 }
  0xe7   : > { %1532 = vmatprep.subr.bf16.mxu1 %v2157_v4 }
  0xe9   : > { %1492 = vmatpush2.bf16.msra.mxu0 %v2152_v5 }
  0xea   : > { %1533 = vmatpush2.bf16.msra.mxu1 %v2155_v6 }
  0xec   : > { %1494 = vmatmul.mubr.bf16.vlgmr.msra.gmra.mxu0 %v2660_v7  ;;  %v593_v7 = vld [vmem:[#allocation2 + $0x18] sm:$0xff] }
  0xed   : > { %1535 = vmatmul.mubr.bf16.vlgmr.msra.gmra.mxu1 %v2662_v8 }
 0x16c   : > { %v1413_v9 = vpop.f32.mrf.mxu0 }
 0x16d   : > { %v1454_v11 = vpop.f32.mrf.mxu1 }
 0x16e   : > { %v1455_v12 = vadd.f32 %v1454_v11, %v1413_v9  ;;  %v1415_v13 = vpop.f32.mrf.mxu0 }
 0x16f   : > { %v1456_v15 = vpop.f32.mrf.mxu1 }
 0x170   : > { %v1543_v16 = vadd.f32 %v1455_v12, %v591_v10  ;;  %v1457_v17 = vadd.f32 %v1456_v15, %v1415_v13  ;;  %v1417_v18 = vpop.f32.mrf.mxu0 }
 0x171   : > { %v1458_v19 = vpop.f32.mrf.mxu1 }
 0x172   : > { %1547 = vst [vmem:[#allocation2 + $0x10] sm:$0xff] %v1543_v16  ;;  %v1544_v20 = vadd.f32 %v1457_v17, %v592_v14  ;;  %v1418_v21 = vpop.f32.mrf.mxu0 }
 0x173   : > { %v1459_v22 = vpop.f32.mrf.mxu1 }
 0x174   : > { %1548 = vst [vmem:[#allocation2] sm:$0xff] %v1544_v20 }
 0x1ac   : > { %v1495_v23 = vpop.f32.mrf.mxu0 }
 0x1ad   : > { %v1536_v24 = vpop.f32.mrf.mxu1 }
 0x1ae   : > { %v1537_v8 = vadd.f32 %v1536_v24, %v1495_v23  ;;  %v1497_v25 = vpop.f32.mrf.mxu0 }
 0x1af   : > { %v1538_v27 = vpop.f32.mrf.mxu1 }
 0x1b0   : > { %v1545_v28 = vadd.f32 %v1537_v8, %v593_v7  ;;  %v1539_v29 = vadd.f32 %v1538_v27, %v1497_v25  ;;  %v1499_v30 = vpop.f32.mrf.mxu0  ;;  %1554 = sbr.rel (%p1901_p13) target bundleno = 453 (0x1c5), region = 67 }
 0x1b1   : > { %v1540_v31 = vpop.f32.mrf.mxu1 }
 0x1b2   : > { %1549 = vst [vmem:[#allocation2 + $0x18] sm:$0xff] %v1545_v28  ;;  %v1546_v32 = vadd.f32 %v1539_v29, %v594_v26  ;;  %v1500_v33 = vpop.f32.mrf.mxu0 }
 0x1b3   : > { %v1541_v34 = vpop.f32.mrf.mxu1 }
 0x1b4   : > { %1550 = vst [vmem:[#allocation2 + $0x8] sm:$0xff] %v1546_v32 }
 0x1b5   : > { %v1561_v35 = vlaneseq  ;;  %v1559_v37 = vld [vmem:[%s566_s15] sm:$0xf]  ;;  %v1555_v43 = vld [vmem:[#allocation2 + $0x10] sm:$0xff] }
 0x1b6   : > { %v1585_v38 = vld [vmem:[%s571_s18] sm:$0xf] }
 0x1b7   : > { %v1562_v36 = vshrl.u32 %v1561_v35, 7  ;;  %v1556_v44 = vld [vmem:[#allocation2] sm:$0xff] }
 0x1b9   : > { %v1563_v39 = vsub.s32 0, %v1562_v36  ;;  %v1567_v40 = vsub.s32 1, %v1562_v36  ;;  %v1571_v41 = vsub.s32 2, %v1562_v36  ;;  %v1575_v42 = vsub.s32 3, %v1562_v36  ;;  %v1557_v49 = vld [vmem:[#allocation2 + $0x18] sm:$0xff] }
 0x1bb   : > { %v1564_v45 = vrot.slane %v1559_v37, %v1563_v39  ;;  %v1590_v46 = vrot.slane %v1585_v38, %v1563_v39  ;;  %v1568_v47 = vrot.slane %v1559_v37, %v1567_v40  ;;  %v1594_v48 = vrot.slane %v1585_v38, %v1567_v40  ;;  %v1558_v50 = vld [vmem:[#allocation2 + $0x8] sm:$0xff] }
 0x1bc   : > { %v1572_v51 = vrot.slane %v1559_v37, %v1571_v41  ;;  %v1598_v52 = vrot.slane %v1585_v38, %v1571_v41  ;;  %v1576_v53 = vrot.slane %v1559_v37, %v1575_v42  ;;  %v1602_v54 = vrot.slane %v1585_v38, %v1575_v42 }
 0x1bd   : > { %v1581_v55 = vmul.f32 %v1564_v45, %v1555_v43  ;;  %v1582_v56 = vmul.f32 %v1568_v47, %v1556_v44 }
 0x1be   : > { %v1583_v57 = vmul.f32 %v1572_v51, %v1557_v49  ;;  %v1584_v58 = vmul.f32 %v1576_v53, %v1558_v50 }
 0x1bf   : > { %v1607_v59 = vadd.f32 %v1590_v46, %v1581_v55  ;;  %v1608_v60 = vadd.f32 %v1594_v48, %v1582_v56 }
 0x1c0   : > { %v1609_v61 = vadd.f32 %v1598_v52, %v1583_v57  ;;  %v1610_v62 = vadd.f32 %v1602_v54, %v1584_v58 }
 0x1c1   : > { %v1611_v63 = vmax.f32 %v1607_v59, 0.0  ;;  %v1612_v0 = vmax.f32 %v1608_v60, 0.0 }
 0x1c2   : > { %v1613_v1 = vmax.f32 %v1609_v61, 0.0  ;;  %v1614_v2 = vmax.f32 %v1610_v62, 0.0 }
 0x1c3   : > { %1615 = vst [vmem:[%s2584_s12] sm:$0xff] %v1611_v63  ;;  %1616 = vst [vmem:[%s2584_s12 + $0x8] sm:$0xff] %v1612_v0 }
 0x1c4   : > { %1617 = vst [vmem:[%s2584_s12 + $0x10] sm:$0xff] %v1613_v1  ;;  %1618 = vst [vmem:[%s2584_s12 + $0x18] sm:$0xff] %v1614_v2 }
 0x1c5 PF: > { %s14_s21 = sadd.s32 1, %s2212_s21   ;;  %s2772_s15 = smov %s2192_s16 }
 0x1c6   : > { %p11_p0 = scmp.ge.s32.totalorder %s14_s21, 18   ;;  %s2773_s16 = smov %s2291_s28 }
 0x1c7   : > { %s2774_s17 = smov %s2204_s19  ;;  %s2775_s18 = smov %s2208_s20 }
 0x1c8   : > { %s2776_s19 = smov %s2779_s22  ;;  %s2777_s20 = smov %s2783_s23 }
 0x1c9   :  { %13 = sbr.rel (!%p11_p0) target bundleno = 4 (0x4), region = 111 }

</bundles_post_ra>
